<compile_context>
chip_gen: v7x
topology: tpu7x:2x2x1
jax: 0.10.0
libtpu: 0.0.40
codegen_flags: <defaults>
</compile_context>

<pallas_src>
import functools

import jax
import jax.numpy as jnp
from jax.experimental import pallas as pl
from jax.experimental.pallas import tpu as pltpu


# ---------------------------------------------------------------------------
# VMEM budget: ~3/4 of physical per-TC VMEM, safe 48 MiB fallback.  Largest
# resident set (lin12: double-buffered 1.75 MiB w2 block + 128 KiB w1) is tiny.
# ---------------------------------------------------------------------------
def _pick_vmem_limit_bytes():
    try:
        cap = int(pltpu.get_tpu_info().vmem_capacity_bytes)
        return max(32 * 1024 * 1024, min(96 * 1024 * 1024, (cap * 3) // 4))
    except Exception:
        return 48 * 1024 * 1024


_VMEM_LIMIT_BYTES = _pick_vmem_limit_bytes()


# ---------------------------------------------------------------------------
# Fused Linear(latent,1024)+ReLU -> Linear(1024,N)+ReLU kernel.
# bf16 weights / bf16 MXU operands, f32 accumulate + epilogue.
# ---------------------------------------------------------------------------
def _lin12_kernel(z_ref, w1_ref, b1_ref, w2_ref, b2_ref, o_ref):
    # lin1 is recomputed per N-block: it is ~B*64*1024 MACs (negligible next
    # to the 1024x896 lin2 block) and keeping it block-local avoids any
    # cross-block scratch dependency, so the grid axis can stay "parallel"
    # (megacore-safe) on v7x.
    h = jnp.dot(z_ref[...].astype(jnp.bfloat16), w1_ref[...],
                preferred_element_type=jnp.float32)
    h = jnp.maximum(h + b1_ref[...], 0.0)
    acc = jnp.dot(h.astype(jnp.bfloat16), w2_ref[...],
                  preferred_element_type=jnp.float32)
    acc = jnp.maximum(acc + b2_ref[...], 0.0)
    o_ref[...] = acc


def linear_relu_stack(z, w1, b1, w2, b2, tn=896):
    """relu(relu(z @ w1 + b1) @ w2 + b2).
    z:(B,Kp) f32, w1:(Kp,H1) bf16, w2:(H1,N) bf16, biases f32 (1,*).
    N is tiled into `tn`-wide "parallel" blocks (v7x megacore splits the
    dominant w2 HBM stream; per-block weight is ~1.75 MiB double-buffered)."""
    B, Kp = z.shape
    H1 = w1.shape[1]
    N = w2.shape[1]
    if N % tn != 0:
        tn = N
    grid = (N // tn,)

    flops = 2 * B * (Kp * H1 + H1 * N)
    bytes_accessed = (z.size * 4 + w1.size * 2 + b1.size * 4
                      + w2.size * 2 + b2.size * 4 + B * N * 4)

    return pl.pallas_call(
        _lin12_kernel,
        out_shape=jax.ShapeDtypeStruct((B, N), jnp.float32),
        grid_spec=pltpu.PrefetchScalarGridSpec(
            num_scalar_prefetch=0,
            grid=grid,
            in_specs=[
                pl.BlockSpec((B, Kp), lambda j: (0, 0)),
                pl.BlockSpec((Kp, H1), lambda j: (0, 0)),
                pl.BlockSpec((1, H1), lambda j: (0, 0)),
                pl.BlockSpec((H1, tn), lambda j: (0, j)),
                pl.BlockSpec((1, tn), lambda j: (0, j)),
            ],
            out_specs=pl.BlockSpec((B, tn), lambda j: (0, j)),
        ),
        compiler_params=pltpu.CompilerParams(
            dimension_semantics=("parallel",),
            vmem_limit_bytes=_VMEM_LIMIT_BYTES,
        ),
        cost_estimate=pl.CostEstimate(flops=flops, transcendentals=0,
                                      bytes_accessed=bytes_accessed),
    )(z, w1, b1, w2, b2)


# ---------------------------------------------------------------------------
# ConvTranspose2d(K=4, stride=2, padding=1) via sub-pixel (phase) decomposition
#
#   out(b, 2j+py, 2i+px, co) =
#     bias[co] + sum_{dy,dx,ci} x_pad[b, j+py+dy, i+px+dx, ci]
#                               * W_pt[ci, co, KMAP[py][dy], KMAP[px][dx]]
# where x_pad is x zero-padded by 1 on each spatial side.  The 2x2 tap gather
# and the 4 accumulated MXU dots happen inside the Pallas kernel.
# ---------------------------------------------------------------------------
_KMAP = ((3, 1), (2, 0))   # output parity -> original 4x4 kernel index per 2x2 tap
_TAPS = ((0, 0), (0, 1), (1, 0), (1, 1))


def prep_deconv_weight(w_pt):
    """PyTorch ConvTranspose2d weight (Cin,Cout,4,4) -> (4, Cin, 4*Cout).
    Leading dim: 2x2 tap (dy,dx).  Columns: (py,px)-phase major then co."""
    Cin, Cout, K, K2 = w_pt.shape
    assert K == 4 and K2 == 4
    cols = []
    for py in range(2):
        for px in range(2):
            taps = [w_pt[:, :, _KMAP[py][dy], _KMAP[px][dx]]
                    for dy, dx in _TAPS]                           # each (Cin, Cout)
            cols.append(jnp.concatenate(taps, axis=0))             # (4*Cin, Cout)
    return jnp.concatenate(cols, axis=1).reshape(4, Cin, 4 * Cout)


def _deconv_kernel(xp_ref, w_ref, b_ref, o_ref, *, act):
    """act(phase-decomposed ConvTranspose s2/k4).
    xp_ref: (B, nwy+1, nwx+1, Cin) zero-padded input (f32); the 2x2 tap gather
    is done here with shifted in-VMEM slices (no HBM patch matrices, no
    cross-lane transposes).  o_ref: (B*nwy*nwx, 4*Cout) f32, rows window-major,
    columns phase-major."""
    B, Hp, Wp, Cin = xp_ref.shape
    nwy, nwx = Hp - 1, Wp - 1
    M, Ncol = o_ref.shape
    acc = jnp.zeros((M, Ncol), jnp.float32)
    for t, (dy, dx) in enumerate(_TAPS):
        tap = xp_ref[:, dy:dy + nwy, dx:dx + nwx, :].reshape(M, Cin)
        acc = acc + jnp.dot(tap.astype(jnp.bfloat16), w_ref[t],
                            preferred_element_type=jnp.float32)
    acc = acc + b_ref[...]
    if act == "relu":
        acc = jnp.maximum(acc, 0.0)
    else:
        acc = jax.nn.sigmoid(acc)
    o_ref[...] = acc


def _interleave_phases(r, Hh, Ww):
    """r: (B, nwy, nwx, 2, 2, Cout) window/phase-major deconv output ->
    stride-2 phase-interleaved (B, 2*Hh, 2*Ww, Cout).  Tiny XLA glue (<0.2 MiB).
    TODO(synk): fold into the deconv kernel via strided stores."""
    B = r.shape[0]
    Cout = r.shape[-1]
    p = [[r[:, py:py + Hh, px:px + Ww, py, px, :] for px in range(2)]
         for py in range(2)]
    rows = [jnp.stack(p[py], axis=3) for py in range(2)]      # (B, Hh, Ww, 2, Cout)
    y = jnp.stack(rows, axis=2)                               # (B, Hh, 2, Ww, 2, Cout)
    return y.reshape(B, 2 * Hh, 2 * Ww, Cout)


def deconv_s2k4(x_nhwc, w4, b_row, act):
    """ConvTranspose2d(Cin,Cout,4,stride=2,padding=1) + act.
    x:(B,H,W,Cin) f32, w4:(4,Cin,4*Cout) bf16, b_row:(1,4*Cout) f32.
    Returns (B, 2H, 2W, Cout) f32."""
    B, H, W, Cin = x_nhwc.shape
    Ncol = w4.shape[2]
    Cout = Ncol // 4
    # Window grid rounded up to a sublane-tile multiple so the in-kernel
    # (B,nwy,nwx,Cin)->(M,Cin) collapse is layout-trivial; the extra windows
    # only read trailing zero rows and are dropped by the interleave below.
    nwy = -(-(H + 1) // 8) * 8
    nwx = -(-(W + 1) // 8) * 8
    xp = jnp.pad(x_nhwc, ((0, 0), (1, nwy - H), (1, nwx - W), (0, 0)))
    M = B * nwy * nwx

    out = pl.pallas_call(
        functools.partial(_deconv_kernel, act=act),
        out_shape=jax.ShapeDtypeStruct((M, Ncol), jnp.float32),
        grid_spec=pltpu.PrefetchScalarGridSpec(
            num_scalar_prefetch=0,
            grid=(1,),
            in_specs=[
                pl.BlockSpec((B, nwy + 1, nwx + 1, Cin), lambda i: (0, 0, 0, 0)),
                pl.BlockSpec((4, Cin, Ncol), lambda i: (0, 0, 0)),
                pl.BlockSpec((1, Ncol), lambda i: (0, 0)),
            ],
            out_specs=pl.BlockSpec((M, Ncol), lambda i: (0, 0)),
        ),
        compiler_params=pltpu.CompilerParams(
            dimension_semantics=("arbitrary",),
            vmem_limit_bytes=_VMEM_LIMIT_BYTES,
        ),
    )(xp, w4, b_row)

    r = out.reshape(B, nwy, nwx, 2, 2, Cout)
    return _interleave_phases(r, H, W)


# ---------------------------------------------------------------------------
# Parameters: synthetic init in PyTorch layouts + one-time kernel-layout prep
# ---------------------------------------------------------------------------
def init_generator_params_torch_layout(key, latent_dim=50, x_shape=(1, 28, 28),
                                        cshape=(128, 7, 7)):
    C, H, W = cshape
    iels = C * H * W
    cout = x_shape[0]
    k = jax.random.split(key, 8)
    s = 0.02
    return {
        "lin1.w": s * jax.random.normal(k[0], (1024, latent_dim), jnp.float32),
        "lin1.b": s * jax.random.normal(k[1], (1024,), jnp.float32),
        "lin2.w": s * jax.random.normal(k[2], (iels, 1024), jnp.float32),
        "lin2.b": s * jax.random.normal(k[3], (iels,), jnp.float32),
        "deconv1.w": s * jax.random.normal(k[4], (C, 64, 4, 4), jnp.float32),
        "deconv1.b": s * jax.random.normal(k[5], (64,), jnp.float32),
        "deconv2.w": s * jax.random.normal(k[6], (64, cout, 4, 4), jnp.float32),
        "deconv2.b": s * jax.random.normal(k[7], (cout,), jnp.float32),
    }


def prepare_params(raw, latent_dim=50, cshape=(128, 7, 7)):
    """One-time transform to kernel-friendly layouts (hoisted out of forward)."""
    C, H, W = cshape
    iels = C * H * W
    lat_pad = -(-latent_dim // 64) * 64

    w1 = raw["lin1.w"].T                                          # (latent, 1024)
    w1 = jnp.pad(w1, ((0, lat_pad - latent_dim), (0, 0)))         # zero rows: exact
    w2 = raw["lin2.w"].T                                          # (1024, iels) NCHW cols
    w2 = w2.reshape(-1, C, H, W).transpose(0, 2, 3, 1).reshape(-1, iels)   # NHWC cols
    b2 = raw["lin2.b"].reshape(C, H, W).transpose(1, 2, 0).reshape(-1)

    return {
        "w1": w1.astype(jnp.bfloat16),
        "b1": raw["lin1.b"].reshape(1, -1),
        "w2": w2.astype(jnp.bfloat16),
        "b2": b2.reshape(1, -1),
        "wd1": prep_deconv_weight(raw["deconv1.w"]).astype(jnp.bfloat16),
        "bd1": jnp.tile(raw["deconv1.b"], 4).reshape(1, -1),
        "wd2": prep_deconv_weight(raw["deconv2.w"]).astype(jnp.bfloat16),
        "bd2": jnp.tile(raw["deconv2.b"], 4).reshape(1, -1),
    }


# ---------------------------------------------------------------------------
# Generator forward (matches the PyTorch module semantics)
# ---------------------------------------------------------------------------
def generator_forward(params, z1, z2, x_shape=(1, 28, 28), cshape=(128, 7, 7)):
    B = z1.shape[0]
    C, H, W = cshape
    lat_pad = params["w1"].shape[0]
    lat = z1.shape[1] + z2.shape[1]
    # torch.cat((z1, z2), dim=1), zero-padded to a lane-friendly latent width
    # (padded rows of w1 are zero, so this is exact).
    z = jnp.concatenate([z1, z2, jnp.zeros((B, lat_pad - lat), z1.dtype)], axis=1)

    # Fused Linear(latent,1024)+ReLU -> Linear(1024, H*W*C)+ReLU.
    # w2/b2 columns were permuted at prep time so this directly emits NHWC.
    h2 = linear_relu_stack(z, params["w1"], params["b1"],
                           params["w2"], params["b2"], tn=896)        # (B, H*W*C)

    h = h2.reshape(B, H, W, C)
    h = deconv_s2k4(h, params["wd1"], params["bd1"], act="relu")      # (B,2H,2W,64)
    h = deconv_s2k4(h, params["wd2"], params["bd2"], act="sigmoid")   # (B,4H,4W,Cout)

    return jnp.transpose(h, (0, 3, 1, 2)).reshape(B, *x_shape)


# ---------------------------------------------------------------------------
# Pure-JAX f32 reference of the PyTorch module (for numerical validation)
# ---------------------------------------------------------------------------
def _conv_transpose_ref(x_nchw, w_pt, b, stride=2, padding=1):
    k = w_pt.shape[-1]
    y = jax.lax.conv_general_dilated(
        x_nchw, jnp.flip(w_pt, axis=(-2, -1)),
        window_strides=(1, 1),
        padding=[(k - 1 - padding, k - 1 - padding)] * 2,
        lhs_dilation=(stride, stride),
        dimension_numbers=("NCHW", "IOHW", "NCHW"),
    )
    return y + b.reshape(1, -1, 1, 1)


def reference_forward(raw, z1, z2, x_shape=(1, 28, 28), cshape=(128, 7, 7)):
    C, H, W = cshape
    z = jnp.concatenate([z1, z2], axis=1)
    h = jax.nn.relu(z @ raw["lin1.w"].T + raw["lin1.b"])
    h = jax.nn.relu(h @ raw["lin2.w"].T + raw["lin2.b"])
    x = h.reshape(z.shape[0], C, H, W)
    x = jax.nn.relu(_conv_transpose_ref(x, raw["deconv1.w"], raw["deconv1.b"]))
    x = jax.nn.sigmoid(_conv_transpose_ref(x, raw["deconv2.w"], raw["deconv2.b"]))
    return x.reshape(z.shape[0], *x_shape)


if __name__ == "__main__":
    key = jax.random.PRNGKey(0)
    pkey, zkey1, zkey2 = jax.random.split(key, 3)

    latent_dim = 50
    batch = 2
    x_shape = (1, 28, 28)
    cshape = (128, 7, 7)

    raw = init_generator_params_torch_layout(pkey, latent_dim, x_shape, cshape)
    params = prepare_params(raw, latent_dim, cshape)

    # z1 and z2 are concatenated along dim=1 to form the latent of size 50.
    z1 = jax.random.normal(zkey1, (batch, latent_dim // 2), jnp.float32)
    z2 = jax.random.normal(zkey2, (batch, latent_dim - latent_dim // 2), jnp.float32)

    fwd = jax.jit(functools.partial(generator_forward, x_shape=x_shape, cshape=cshape))
    out = jax.block_until_ready(fwd(params, z1, z2))

    assert out.shape == (batch,) + x_shape, out.shape
    assert bool(jnp.all(jnp.isfinite(out)))
    assert bool(jnp.all((out >= 0.0) & (out <= 1.0)))        # sigmoid range

    # Numerical check against a pure-JAX f32 reference (validates the
    # ConvTranspose phase decomposition, the weight/bias layout permutations
    # and the bf16 weight storage end to end).
    ref_fn = jax.jit(functools.partial(reference_forward, x_shape=x_shape,
                                       cshape=cshape))
    ref = jax.block_until_ready(ref_fn(raw, z1, z2))
    max_err = float(jnp.max(jnp.abs(out - ref)))
    assert max_err < 2e-2, f"max |kernel - reference| = {max_err}"

    print("KERNEL_OK")
</pallas_src>

<mosaic_0001>
module attributes {stable_mosaic.version = 11 : i64} {
  func.func @_lin12_kernel(%arg0: i32, %arg1: memref<2x64xf32, #tpu.memory_space<vmem>>, %arg2: memref<64x1024xbf16, #tpu.memory_space<vmem>>, %arg3: memref<1x1024xf32, #tpu.memory_space<vmem>>, %arg4: memref<1024x896xbf16, #tpu.memory_space<vmem>>, %arg5: memref<1x896xf32, #tpu.memory_space<vmem>>, %arg6: memref<2x896xf32, #tpu.memory_space<vmem>>) attributes {dimension_semantics = [#tpu.dimension_semantics<parallel>], iteration_bounds = array<i64: 7>, scalar_prefetch = 0 : i64, scratch_operands = 0 : i64, tpu.core_type = #tpu.core_type<tc>, window_params = [{pipeline_mode = #tpu.pipeline_mode<synchronous>, transform_indices = @transform_0, window_bounds = array<i64: 2, 64>}, {pipeline_mode = #tpu.pipeline_mode<synchronous>, transform_indices = @transform_1, window_bounds = array<i64: 64, 1024>}, {pipeline_mode = #tpu.pipeline_mode<synchronous>, transform_indices = @transform_2, window_bounds = array<i64: 1, 1024>}, {transform_indices = @transform_3, window_bounds = array<i64: 1024, 896>}, {transform_indices = @transform_4, window_bounds = array<i64: 1, 896>}, {transform_indices = @transform_5, window_bounds = array<i64: 2, 896>}]} {
    %c0 = arith.constant 0 : index
    %c0_0 = arith.constant 0 : index
    %0 = vector.load %arg1[%c0, %c0_0] : memref<2x64xf32, #tpu.memory_space<vmem>>, vector<2x64xf32>
    %1 = arith.truncf %0 : vector<2x64xf32> to vector<2x64xbf16>
    %c0_1 = arith.constant 0 : index
    %c0_2 = arith.constant 0 : index
    %2 = vector.load %arg2[%c0_1, %c0_2] : memref<64x1024xbf16, #tpu.memory_space<vmem>>, vector<64x1024xbf16>
    %cst = arith.constant dense<0.000000e+00> : vector<2x1024xf32>
    %3 = tpu.matmul %1, %2, %cst {dimension_numbers = #tpu.dot_dimension_numbers<[1], [0], [0], [1], [0, 0, 1, 1], [], []>} : vector<2x64xbf16>, vector<64x1024xbf16>, vector<2x1024xf32> -> vector<2x1024xf32>
    %c0_3 = arith.constant 0 : index
    %c0_4 = arith.constant 0 : index
    %4 = vector.load %arg3[%c0_3, %c0_4] : memref<1x1024xf32, #tpu.memory_space<vmem>>, vector<1x1024xf32>
    %5 = vector.broadcast %4 : vector<1x1024xf32> to vector<2x1024xf32>
    %6 = arith.addf %3, %5 : vector<2x1024xf32>
    %cst_5 = arith.constant 0.000000e+00 : f32
    %7 = vector.broadcast %cst_5 : f32 to vector<2x1024xf32>
    %8 = arith.maximumf %6, %7 : vector<2x1024xf32>
    %9 = arith.truncf %8 : vector<2x1024xf32> to vector<2x1024xbf16>
    %c0_6 = arith.constant 0 : index
    %c0_7 = arith.constant 0 : index
    %10 = vector.load %arg4[%c0_6, %c0_7] : memref<1024x896xbf16, #tpu.memory_space<vmem>>, vector<1024x896xbf16>
    %cst_8 = arith.constant dense<0.000000e+00> : vector<2x896xf32>
    %11 = tpu.matmul %9, %10, %cst_8 {dimension_numbers = #tpu.dot_dimension_numbers<[1], [0], [0], [1], [0, 0, 1, 1], [], []>} : vector<2x1024xbf16>, vector<1024x896xbf16>, vector<2x896xf32> -> vector<2x896xf32>
    %c0_9 = arith.constant 0 : index
    %c0_10 = arith.constant 0 : index
    %12 = vector.load %arg5[%c0_9, %c0_10] : memref<1x896xf32, #tpu.memory_space<vmem>>, vector<1x896xf32>
    %13 = vector.broadcast %12 : vector<1x896xf32> to vector<2x896xf32>
    %14 = arith.addf %11, %13 : vector<2x896xf32>
    %cst_11 = arith.constant 0.000000e+00 : f32
    %15 = vector.broadcast %cst_11 : f32 to vector<2x896xf32>
    %16 = arith.maximumf %14, %15 : vector<2x896xf32>
    %c0_12 = arith.constant 0 : index
    %c0_13 = arith.constant 0 : index
    %17 = vector.load %arg6[%c0_12, %c0_13] : memref<2x896xf32, #tpu.memory_space<vmem>>, vector<2x896xf32>
    tpu.vector_store %arg6[%c0_12, %c0_13], %16 {strides = array<i32>} : memref<2x896xf32, #tpu.memory_space<vmem>>, vector<2x896xf32>,
    return
  }
  func.func @transform_0(%arg0: i32) -> (i32, i32) {
    %c0_i32 = arith.constant 0 : i32
    %c0_i32_0 = arith.constant 0 : i32
    %c0_i32_1 = arith.constant 0 : i32
    return %c0_i32, %c0_i32_0 : i32, i32
  }
  func.func @transform_1(%arg0: i32) -> (i32, i32) {
    %c0_i32 = arith.constant 0 : i32
    %c0_i32_0 = arith.constant 0 : i32
    %c0_i32_1 = arith.constant 0 : i32
    return %c0_i32, %c0_i32_0 : i32, i32
  }
  func.func @transform_2(%arg0: i32) -> (i32, i32) {
    %c0_i32 = arith.constant 0 : i32
    %c0_i32_0 = arith.constant 0 : i32
    %c0_i32_1 = arith.constant 0 : i32
    return %c0_i32, %c0_i32_0 : i32, i32
  }
  func.func @transform_3(%arg0: i32) -> (i32, i32) {
    %c0_i32 = arith.constant 0 : i32
    %c0_i32_0 = arith.constant 0 : i32
    return %c0_i32, %arg0 : i32, i32
  }
  func.func @transform_4(%arg0: i32) -> (i32, i32) {
    %c0_i32 = arith.constant 0 : i32
    %c0_i32_0 = arith.constant 0 : i32
    return %c0_i32, %arg0 : i32, i32
  }
  func.func @transform_5(%arg0: i32) -> (i32, i32) {
    %c0_i32 = arith.constant 0 : i32
    %c0_i32_0 = arith.constant 0 : i32
    return %c0_i32, %arg0 : i32, i32
  }
}

module attributes {stable_mosaic.version = 11 : i64} {
  func.func @_deconv_kernel(%arg0: i32, %arg1: memref<2x9x9x128xf32, #tpu.memory_space<vmem>>, %arg2: memref<4x128x256xbf16, #tpu.memory_space<vmem>>, %arg3: memref<1x256xf32, #tpu.memory_space<vmem>>, %arg4: memref<128x256xf32, #tpu.memory_space<vmem>>) attributes {dimension_semantics = [#tpu.dimension_semantics<arbitrary>], iteration_bounds = array<i64: 1>, scalar_prefetch = 0 : i64, scratch_operands = 0 : i64, tpu.core_type = #tpu.core_type<tc>, window_params = [{pipeline_mode = #tpu.pipeline_mode<synchronous>, transform_indices = @transform_0, window_bounds = array<i64: 2, 9, 9, 128>}, {pipeline_mode = #tpu.pipeline_mode<synchronous>, transform_indices = @transform_1, window_bounds = array<i64: 4, 128, 256>}, {pipeline_mode = #tpu.pipeline_mode<synchronous>, transform_indices = @transform_2, window_bounds = array<i64: 1, 256>}, {pipeline_mode = #tpu.pipeline_mode<synchronous>, transform_indices = @transform_3, window_bounds = array<i64: 128, 256>}]} {
    %cst = arith.constant 0.000000e+00 : f32
    %0 = vector.broadcast %cst : f32 to vector<128x256xf32>
    %c0 = arith.constant 0 : index
    %c0_0 = arith.constant 0 : index
    %c0_1 = arith.constant 0 : index
    %c0_2 = arith.constant 0 : index
    %1 = vector.load %arg1[%c0, %c0_0, %c0_1, %c0_2] : memref<2x9x9x128xf32, #tpu.memory_space<vmem>>, vector<2x8x8x128xf32>
    %2 = vector.shape_cast %1 : vector<2x8x8x128xf32> to vector<128x128xf32>
    %3 = arith.truncf %2 : vector<128x128xf32> to vector<128x128xbf16>
    %c0_3 = arith.constant 0 : index
    %c0_4 = arith.constant 0 : index
    %c0_5 = arith.constant 0 : index
    %4 = vector.load %arg2[%c0_3, %c0_4, %c0_5] : memref<4x128x256xbf16, #tpu.memory_space<vmem>>, vector<1x128x256xbf16>
    %5 = vector.shape_cast %4 : vector<1x128x256xbf16> to vector<128x256xbf16>
    %cst_6 = arith.constant dense<0.000000e+00> : vector<128x256xf32>
    %6 = tpu.matmul %3, %5, %cst_6 {dimension_numbers = #tpu.dot_dimension_numbers<[1], [0], [0], [1], [0, 0, 1, 1], [], []>} : vector<128x128xbf16>, vector<128x256xbf16>, vector<128x256xf32> -> vector<128x256xf32>
    %7 = arith.addf %0, %6 : vector<128x256xf32>
    %c0_7 = arith.constant 0 : index
    %c0_8 = arith.constant 0 : index
    %c1 = arith.constant 1 : index
    %c0_9 = arith.constant 0 : index
    %8 = vector.load %arg1[%c0_7, %c0_8, %c1, %c0_9] : memref<2x9x9x128xf32, #tpu.memory_space<vmem>>, vector<2x8x8x128xf32>
    %9 = vector.shape_cast %8 : vector<2x8x8x128xf32> to vector<128x128xf32>
    %10 = arith.truncf %9 : vector<128x128xf32> to vector<128x128xbf16>
    %c1_10 = arith.constant 1 : index
    %c0_11 = arith.constant 0 : index
    %c0_12 = arith.constant 0 : index
    %11 = vector.load %arg2[%c1_10, %c0_11, %c0_12] : memref<4x128x256xbf16, #tpu.memory_space<vmem>>, vector<1x128x256xbf16>
    %12 = vector.shape_cast %11 : vector<1x128x256xbf16> to vector<128x256xbf16>
    %cst_13 = arith.constant dense<0.000000e+00> : vector<128x256xf32>
    %13 = tpu.matmul %10, %12, %cst_13 {dimension_numbers = #tpu.dot_dimension_numbers<[1], [0], [0], [1], [0, 0, 1, 1], [], []>} : vector<128x128xbf16>, vector<128x256xbf16>, vector<128x256xf32> -> vector<128x256xf32>
    %14 = arith.addf %7, %13 : vector<128x256xf32>
    %c0_14 = arith.constant 0 : index
    %c1_15 = arith.constant 1 : index
    %c0_16 = arith.constant 0 : index
    %c0_17 = arith.constant 0 : index
    %15 = vector.load %arg1[%c0_14, %c1_15, %c0_16, %c0_17] : memref<2x9x9x128xf32, #tpu.memory_space<vmem>>, vector<2x8x8x128xf32>
    %16 = vector.shape_cast %15 : vector<2x8x8x128xf32> to vector<128x128xf32>
    %17 = arith.truncf %16 : vector<128x128xf32> to vector<128x128xbf16>
    %c2 = arith.constant 2 : index
    %c0_18 = arith.constant 0 : index
    %c0_19 = arith.constant 0 : index
    %18 = vector.load %arg2[%c2, %c0_18, %c0_19] : memref<4x128x256xbf16, #tpu.memory_space<vmem>>, vector<1x128x256xbf16>
    %19 = vector.shape_cast %18 : vector<1x128x256xbf16> to vector<128x256xbf16>
    %cst_20 = arith.constant dense<0.000000e+00> : vector<128x256xf32>
    %20 = tpu.matmul %17, %19, %cst_20 {dimension_numbers = #tpu.dot_dimension_numbers<[1], [0], [0], [1], [0, 0, 1, 1], [], []>} : vector<128x128xbf16>, vector<128x256xbf16>, vector<128x256xf32> -> vector<128x256xf32>
    %21 = arith.addf %14, %20 : vector<128x256xf32>
    %c0_21 = arith.constant 0 : index
    %c1_22 = arith.constant 1 : index
    %c1_23 = arith.constant 1 : index
    %c0_24 = arith.constant 0 : index
    %22 = vector.load %arg1[%c0_21, %c1_22, %c1_23, %c0_24] : memref<2x9x9x128xf32, #tpu.memory_space<vmem>>, vector<2x8x8x128xf32>
    %23 = vector.shape_cast %22 : vector<2x8x8x128xf32> to vector<128x128xf32>
    %24 = arith.truncf %23 : vector<128x128xf32> to vector<128x128xbf16>
    %c3 = arith.constant 3 : index
    %c0_25 = arith.constant 0 : index
    %c0_26 = arith.constant 0 : index
    %25 = vector.load %arg2[%c3, %c0_25, %c0_26] : memref<4x128x256xbf16, #tpu.memory_space<vmem>>, vector<1x128x256xbf16>
    %26 = vector.shape_cast %25 : vector<1x128x256xbf16> to vector<128x256xbf16>
    %cst_27 = arith.constant dense<0.000000e+00> : vector<128x256xf32>
    %27 = tpu.matmul %24, %26, %cst_27 {dimension_numbers = #tpu.dot_dimension_numbers<[1], [0], [0], [1], [0, 0, 1, 1], [], []>} : vector<128x128xbf16>, vector<128x256xbf16>, vector<128x256xf32> -> vector<128x256xf32>
    %28 = arith.addf %21, %27 : vector<128x256xf32>
    %c0_28 = arith.constant 0 : index
    %c0_29 = arith.constant 0 : index
    %29 = vector.load %arg3[%c0_28, %c0_29] : memref<1x256xf32, #tpu.memory_space<vmem>>, vector<1x256xf32>
    %30 = vector.broadcast %29 : vector<1x256xf32> to vector<128x256xf32>
    %31 = arith.addf %28, %30 : vector<128x256xf32>
    %cst_30 = arith.constant 0.000000e+00 : f32
    %32 = vector.broadcast %cst_30 : f32 to vector<128x256xf32>
    %33 = arith.maximumf %31, %32 : vector<128x256xf32>
    %c0_31 = arith.constant 0 : index
    %c0_32 = arith.constant 0 : index
    %34 = vector.load %arg4[%c0_31, %c0_32] : memref<128x256xf32, #tpu.memory_space<vmem>>, vector<128x256xf32>
    tpu.vector_store %arg4[%c0_31, %c0_32], %33 {strides = array<i32>} : memref<128x256xf32, #tpu.memory_space<vmem>>, vector<128x256xf32>,
    return
  }
  func.func @transform_0(%arg0: i32) -> (i32, i32, i32, i32) {
    %c0_i32 = arith.constant 0 : i32
    %c0_i32_0 = arith.constant 0 : i32
    %c0_i32_1 = arith.constant 0 : i32
    %c0_i32_2 = arith.constant 0 : i32
    %c0_i32_3 = arith.constant 0 : i32
    return %c0_i32, %c0_i32_0, %c0_i32_1, %c0_i32_2 : i32, i32, i32, i32
  }
  func.func @transform_1(%arg0: i32) -> (i32, i32, i32) {
    %c0_i32 = arith.constant 0 : i32
    %c0_i32_0 = arith.constant 0 : i32
    %c0_i32_1 = arith.constant 0 : i32
    %c0_i32_2 = arith.constant 0 : i32
    return %c0_i32, %c0_i32_0, %c0_i32_1 : i32, i32, i32
  }
  func.func @transform_2(%arg0: i32) -> (i32, i32) {
    %c0_i32 = arith.constant 0 : i32
    %c0_i32_0 = arith.constant 0 : i32
    %c0_i32_1 = arith.constant 0 : i32
    return %c0_i32, %c0_i32_0 : i32, i32
  }
  func.func @transform_3(%arg0: i32) -> (i32, i32) {
    %c0_i32 = arith.constant 0 : i32
    %c0_i32_0 = arith.constant 0 : i32
    %c0_i32_1 = arith.constant 0 : i32
    return %c0_i32, %c0_i32_0 : i32, i32
  }
}

module attributes {stable_mosaic.version = 11 : i64} {
  func.func @_deconv_kernel(%arg0: i32, %arg1: memref<2x17x17x64xf32, #tpu.memory_space<vmem>>, %arg2: memref<4x64x4xbf16, #tpu.memory_space<vmem>>, %arg3: memref<1x4xf32, #tpu.memory_space<vmem>>, %arg4: memref<512x4xf32, #tpu.memory_space<vmem>>) attributes {dimension_semantics = [#tpu.dimension_semantics<arbitrary>], iteration_bounds = array<i64: 1>, scalar_prefetch = 0 : i64, scratch_operands = 0 : i64, tpu.core_type = #tpu.core_type<tc>, window_params = [{pipeline_mode = #tpu.pipeline_mode<synchronous>, transform_indices = @transform_0, window_bounds = array<i64: 2, 17, 17, 64>}, {pipeline_mode = #tpu.pipeline_mode<synchronous>, transform_indices = @transform_1, window_bounds = array<i64: 4, 64, 4>}, {pipeline_mode = #tpu.pipeline_mode<synchronous>, transform_indices = @transform_2, window_bounds = array<i64: 1, 4>}, {pipeline_mode = #tpu.pipeline_mode<synchronous>, transform_indices = @transform_3, window_bounds = array<i64: 512, 4>}]} {
    %cst = arith.constant 0.000000e+00 : f32
    %0 = vector.broadcast %cst : f32 to vector<512x4xf32>
    %c0 = arith.constant 0 : index
    %c0_0 = arith.constant 0 : index
    %c0_1 = arith.constant 0 : index
    %c0_2 = arith.constant 0 : index
    %1 = vector.load %arg1[%c0, %c0_0, %c0_1, %c0_2] : memref<2x17x17x64xf32, #tpu.memory_space<vmem>>, vector<2x16x16x64xf32>
    %2 = vector.shape_cast %1 : vector<2x16x16x64xf32> to vector<512x64xf32>
    %3 = arith.truncf %2 : vector<512x64xf32> to vector<512x64xbf16>
    %c0_3 = arith.constant 0 : index
    %c0_4 = arith.constant 0 : index
    %c0_5 = arith.constant 0 : index
    %4 = vector.load %arg2[%c0_3, %c0_4, %c0_5] : memref<4x64x4xbf16, #tpu.memory_space<vmem>>, vector<1x64x4xbf16>
    %5 = vector.shape_cast %4 : vector<1x64x4xbf16> to vector<64x4xbf16>
    %cst_6 = arith.constant dense<0.000000e+00> : vector<512x4xf32>
    %6 = tpu.matmul %3, %5, %cst_6 {dimension_numbers = #tpu.dot_dimension_numbers<[1], [0], [0], [1], [0, 0, 1, 1], [], []>} : vector<512x64xbf16>, vector<64x4xbf16>, vector<512x4xf32> -> vector<512x4xf32>
    %7 = arith.addf %0, %6 : vector<512x4xf32>
    %c0_7 = arith.constant 0 : index
    %c0_8 = arith.constant 0 : index
    %c1 = arith.constant 1 : index
    %c0_9 = arith.constant 0 : index
    %8 = vector.load %arg1[%c0_7, %c0_8, %c1, %c0_9] : memref<2x17x17x64xf32, #tpu.memory_space<vmem>>, vector<2x16x16x64xf32>
    %9 = vector.shape_cast %8 : vector<2x16x16x64xf32> to vector<512x64xf32>
    %10 = arith.truncf %9 : vector<512x64xf32> to vector<512x64xbf16>
    %c1_10 = arith.constant 1 : index
    %c0_11 = arith.constant 0 : index
    %c0_12 = arith.constant 0 : index
    %11 = vector.load %arg2[%c1_10, %c0_11, %c0_12] : memref<4x64x4xbf16, #tpu.memory_space<vmem>>, vector<1x64x4xbf16>
    %12 = vector.shape_cast %11 : vector<1x64x4xbf16> to vector<64x4xbf16>
    %cst_13 = arith.constant dense<0.000000e+00> : vector<512x4xf32>
    %13 = tpu.matmul %10, %12, %cst_13 {dimension_numbers = #tpu.dot_dimension_numbers<[1], [0], [0], [1], [0, 0, 1, 1], [], []>} : vector<512x64xbf16>, vector<64x4xbf16>, vector<512x4xf32> -> vector<512x4xf32>
    %14 = arith.addf %7, %13 : vector<512x4xf32>
    %c0_14 = arith.constant 0 : index
    %c1_15 = arith.constant 1 : index
    %c0_16 = arith.constant 0 : index
    %c0_17 = arith.constant 0 : index
    %15 = vector.load %arg1[%c0_14, %c1_15, %c0_16, %c0_17] : memref<2x17x17x64xf32, #tpu.memory_space<vmem>>, vector<2x16x16x64xf32>
    %16 = vector.shape_cast %15 : vector<2x16x16x64xf32> to vector<512x64xf32>
    %17 = arith.truncf %16 : vector<512x64xf32> to vector<512x64xbf16>
    %c2 = arith.constant 2 : index
    %c0_18 = arith.constant 0 : index
    %c0_19 = arith.constant 0 : index
    %18 = vector.load %arg2[%c2, %c0_18, %c0_19] : memref<4x64x4xbf16, #tpu.memory_space<vmem>>, vector<1x64x4xbf16>
    %19 = vector.shape_cast %18 : vector<1x64x4xbf16> to vector<64x4xbf16>
    %cst_20 = arith.constant dense<0.000000e+00> : vector<512x4xf32>
    %20 = tpu.matmul %17, %19, %cst_20 {dimension_numbers = #tpu.dot_dimension_numbers<[1], [0], [0], [1], [0, 0, 1, 1], [], []>} : vector<512x64xbf16>, vector<64x4xbf16>, vector<512x4xf32> -> vector<512x4xf32>
    %21 = arith.addf %14, %20 : vector<512x4xf32>
    %c0_21 = arith.constant 0 : index
    %c1_22 = arith.constant 1 : index
    %c1_23 = arith.constant 1 : index
    %c0_24 = arith.constant 0 : index
    %22 = vector.load %arg1[%c0_21, %c1_22, %c1_23, %c0_24] : memref<2x17x17x64xf32, #tpu.memory_space<vmem>>, vector<2x16x16x64xf32>
    %23 = vector.shape_cast %22 : vector<2x16x16x64xf32> to vector<512x64xf32>
    %24 = arith.truncf %23 : vector<512x64xf32> to vector<512x64xbf16>
    %c3 = arith.constant 3 : index
    %c0_25 = arith.constant 0 : index
    %c0_26 = arith.constant 0 : index
    %25 = vector.load %arg2[%c3, %c0_25, %c0_26] : memref<4x64x4xbf16, #tpu.memory_space<vmem>>, vector<1x64x4xbf16>
    %26 = vector.shape_cast %25 : vector<1x64x4xbf16> to vector<64x4xbf16>
    %cst_27 = arith.constant dense<0.000000e+00> : vector<512x4xf32>
    %27 = tpu.matmul %24, %26, %cst_27 {dimension_numbers = #tpu.dot_dimension_numbers<[1], [0], [0], [1], [0, 0, 1, 1], [], []>} : vector<512x64xbf16>, vector<64x4xbf16>, vector<512x4xf32> -> vector<512x4xf32>
    %28 = arith.addf %21, %27 : vector<512x4xf32>
    %c0_28 = arith.constant 0 : index
    %c0_29 = arith.constant 0 : index
    %29 = vector.load %arg3[%c0_28, %c0_29] : memref<1x4xf32, #tpu.memory_space<vmem>>, vector<1x4xf32>
    %30 = vector.broadcast %29 : vector<1x4xf32> to vector<512x4xf32>
    %31 = arith.addf %28, %30 : vector<512x4xf32>
    %32 = arith.negf %31 : vector<512x4xf32>
    %33 = math.exp %32 : vector<512x4xf32>
    %cst_30 = arith.constant 1.000000e+00 : f32
    %34 = vector.broadcast %cst_30 : f32 to vector<512x4xf32>
    %35 = arith.addf %34, %33 : vector<512x4xf32>
    %36 = arith.divf %34, %35 : vector<512x4xf32>
    %c0_31 = arith.constant 0 : index
    %c0_32 = arith.constant 0 : index
    %37 = vector.load %arg4[%c0_31, %c0_32] : memref<512x4xf32, #tpu.memory_space<vmem>>, vector<512x4xf32>
    tpu.vector_store %arg4[%c0_31, %c0_32], %36 {strides = array<i32>} : memref<512x4xf32, #tpu.memory_space<vmem>>, vector<512x4xf32>,
    return
  }
  func.func @transform_0(%arg0: i32) -> (i32, i32, i32, i32) {
    %c0_i32 = arith.constant 0 : i32
    %c0_i32_0 = arith.constant 0 : i32
    %c0_i32_1 = arith.constant 0 : i32
    %c0_i32_2 = arith.constant 0 : i32
    %c0_i32_3 = arith.constant 0 : i32
    return %c0_i32, %c0_i32_0, %c0_i32_1, %c0_i32_2 : i32, i32, i32, i32
  }
  func.func @transform_1(%arg0: i32) -> (i32, i32, i32) {
    %c0_i32 = arith.constant 0 : i32
    %c0_i32_0 = arith.constant 0 : i32
    %c0_i32_1 = arith.constant 0 : i32
    %c0_i32_2 = arith.constant 0 : i32
    return %c0_i32, %c0_i32_0, %c0_i32_1 : i32, i32, i32
  }
  func.func @transform_2(%arg0: i32) -> (i32, i32) {
    %c0_i32 = arith.constant 0 : i32
    %c0_i32_0 = arith.constant 0 : i32
    %c0_i32_1 = arith.constant 0 : i32
    return %c0_i32, %c0_i32_0 : i32, i32
  }
  func.func @transform_3(%arg0: i32) -> (i32, i32) {
    %c0_i32 = arith.constant 0 : i32
    %c0_i32_0 = arith.constant 0 : i32
    %c0_i32_1 = arith.constant 0 : i32
    return %c0_i32, %c0_i32_0 : i32, i32
  }
}

</mosaic_0001>

<bundles_post_ra>
// kernel: generator_forward.4
= control target key start
LH: loop header
LB: loop body
LE: loop exit
PB: predicated region body
PF: predicated region fallthrough
CT: control target
= control target key end

     0   :  { %v1464_v1 = vmov 0   ;;  %s2079_s1 = inlined_call_operand.vmem [shape: bf16[4,128,256], index: 1, kind: input, shape index: {}]   ;;  %s2080_s0 = inlined_call_operand.vmem [shape: f32[2,9,9,128], index: 0, kind: input, shape index: {}]   ;;  %s2081_s2 = inlined_call_operand.vmem [shape: f32[1,256], index: 2, kind: input, shape index: {}]   ;;  %s2082_s3 = inlined_call_operand.vmem [shape: f32[128,256], index: 3, kind: output, shape index: {}]  }
   0x1   :  { %v1368_v0 = vld [vmem:[%s2079_s1 + $0x84] ss:$8 sps:$4 sm:$0xff]   ;;  %208 = vmatprep.mubr.bf16.mxu1 %v1464_v1  ;;  %636 = vmatprep.mubr.bf16.mxu0 %v1464_v1  ;;  %v1372_v3 = vld [vmem:[%s2079_s1 + $0x80] ss:$8 sps:$4 sm:$0xff]   ;;  %v1374_v5 = vld [vmem:[%s2079_s1 + $0x94] ss:$8 sps:$4 sm:$0xff]  }
   0x2   :  { %v1370_v2 = vld [vmem:[%s2079_s1 + $0x104] ss:$8 sps:$4 sm:$0xff]   ;;  %176 = vmatprep.subr.bf16.mxu1 %v1368_v0  ;;  %v1373_v4 = vld [vmem:[%s2079_s1 + $0x100] ss:$8 sps:$4 sm:$0xff]   ;;  %v1376_v6 = vld [vmem:[%s2079_s1 + $0x114] ss:$8 sps:$4 sm:$0xff]  }
   0x3   :  { %604 = vmatprep.subr.bf16.mxu0 %v1370_v2  ;;  %177 = vmatpush1.bf16.msra.mxu1 %v1372_v3  ;;  %v1378_v7 = vld [vmem:[%s2079_s1 + $0x90] ss:$8 sps:$4 sm:$0xff]   ;;  %v1380_v9 = vld [vmem:[%s2079_s1 + $0xa4] ss:$8 sps:$4 sm:$0xff]   ;;  %v1384_v11 = vld [vmem:[%s2079_s1 + $0xa0] ss:$8 sps:$4 sm:$0xff]  }
   0x4   :  { %605 = vmatpush1.bf16.msra.mxu0 %v1373_v4  ;;  %178 = vmatprep.subr.bf16.mxu1 %v1374_v5  ;;  %v1379_v8 = vld [vmem:[%s2079_s1 + $0x110] ss:$8 sps:$4 sm:$0xff]   ;;  %v1382_v10 = vld [vmem:[%s2079_s1 + $0x124] ss:$8 sps:$4 sm:$0xff]   ;;  %v1385_v12 = vld [vmem:[%s2079_s1 + $0x120] ss:$8 sps:$4 sm:$0xff]  }
   0x5   :  { %606 = vmatprep.subr.bf16.mxu0 %v1376_v6  ;;  %v1386_v13 = vld [vmem:[%s2079_s1 + $0xb4] ss:$8 sps:$4 sm:$0xff]   ;;  %v1390_v15 = vld [vmem:[%s2079_s1 + $0xb0] ss:$8 sps:$4 sm:$0xff]   ;;  %v1392_v17 = vld [vmem:[%s2079_s1 + $0xc4] ss:$8 sps:$4 sm:$0xff]  }
   0x6   :  { %v1388_v14 = vld [vmem:[%s2079_s1 + $0x134] ss:$8 sps:$4 sm:$0xff]   ;;  %v1391_v16 = vld [vmem:[%s2079_s1 + $0x130] ss:$8 sps:$4 sm:$0xff]   ;;  %v1394_v18 = vld [vmem:[%s2079_s1 + $0x144] ss:$8 sps:$4 sm:$0xff]  }
   0x7   :  { %179 = vmatpush1.bf16.msra.mxu1 %v1378_v7  ;;  %v1396_v19 = vld [vmem:[%s2079_s1 + $0xc0] ss:$8 sps:$4 sm:$0xff]   ;;  %v1398_v21 = vld [vmem:[%s2079_s1 + $0xd4] ss:$8 sps:$4 sm:$0xff]   ;;  %v1402_v23 = vld [vmem:[%s2079_s1 + $0xd0] ss:$8 sps:$4 sm:$0xff]  }
   0x8   :  { %607 = vmatpush1.bf16.msra.mxu0 %v1379_v8  ;;  %180 = vmatprep.subr.bf16.mxu1 %v1380_v9  ;;  %v1397_v20 = vld [vmem:[%s2079_s1 + $0x140] ss:$8 sps:$4 sm:$0xff]   ;;  %v1400_v22 = vld [vmem:[%s2079_s1 + $0x154] ss:$8 sps:$4 sm:$0xff]   ;;  %v1403_v24 = vld [vmem:[%s2079_s1 + $0x150] ss:$8 sps:$4 sm:$0xff]  }
   0x9   :  { %608 = vmatprep.subr.bf16.mxu0 %v1382_v10  ;;  %v1404_v25 = vld [vmem:[%s2079_s1 + $0xe4] ss:$8 sps:$4 sm:$0xff]   ;;  %v1408_v27 = vld [vmem:[%s2079_s1 + $0xe0] ss:$8 sps:$4 sm:$0xff]   ;;  %v1410_v29 = vld [vmem:[%s2079_s1 + $0xf4] ss:$8 sps:$4 sm:$0xff]  }
   0xa   :  { %v1406_v26 = vld [vmem:[%s2079_s1 + $0x164] ss:$8 sps:$4 sm:$0xff]   ;;  %v1409_v28 = vld [vmem:[%s2079_s1 + $0x160] ss:$8 sps:$4 sm:$0xff]   ;;  %v1412_v30 = vld [vmem:[%s2079_s1 + $0x174] ss:$8 sps:$4 sm:$0xff]  }
   0xb   :  { %181 = vmatpush1.bf16.msra.mxu1 %v1384_v11  ;;  %v1414_v31 = vld [vmem:[%s2079_s1 + $0xf0] ss:$8 sps:$4 sm:$0xff]   ;;  %v55_v33 = vld [vmem:[%s2080_s0 + $0x1] sm:$0xff]  ;;  %v1424_v48 = vld [vmem:[%s2079_s1 + $0x14] ss:$8 sps:$4 sm:$0xff]  }
   0xc   :  { %609 = vmatpush1.bf16.msra.mxu0 %v1385_v12  ;;  %182 = vmatprep.subr.bf16.mxu1 %v1386_v13  ;;  %v1415_v32 = vld [vmem:[%s2079_s1 + $0x170] ss:$8 sps:$4 sm:$0xff]   ;;  %v1594_v35 = vld [vmem:[%s2080_s0 + $0x20] sm:$0xff]  ;;  %v1427_v51 = vld [vmem:[%s2079_s1 + $0x194] ss:$8 sps:$4 sm:$0xff]  }
   0xd   :  { %610 = vmatprep.subr.bf16.mxu0 %v1388_v14  ;;  %v1589_v34 = vld [vmem:[%s2080_s0 + $0x11] sm:$0xff]  ;;  %v1418_v39 = vld [vmem:[%s2079_s1 + $0x4] ss:$8 sps:$4 sm:$0xff]   ;;  %v1416_v42 = vld [vmem:[%s2079_s1] ss:$8 sps:$4 sm:$0xff]  }
   0xe   :  { %v1599_v36 = vld [vmem:[%s2080_s0 + $0x30] sm:$0xff]  ;;  %v1421_v40 = vld [vmem:[%s2079_s1 + $0x184] ss:$8 sps:$4 sm:$0xff]   ;;  %v71_v41 = vpack.c.bf16 %v1589_v34, %v55_v33  ;;  %v1419_v46 = vld [vmem:[%s2079_s1 + $0x180] ss:$8 sps:$4 sm:$0xff]  }
   0xf   :  { %183 = vmatpush1.bf16.msra.mxu1 %v1390_v15  ;;  %v1604_v37 = vld [vmem:[%s2080_s0 + $0x10] sm:$0xff]  ;;  %v32_v38 = vpack.c.bf16 %v1599_v36, %v1594_v35  ;;  %v1623_v44 = vld [vmem:[%s2080_s0 + $0x40] sm:$0xff] }
  0x10   :  { %611 = vmatpush1.bf16.msra.mxu0 %v1391_v16  ;;  %184 = vmatprep.subr.bf16.mxu1 %v1392_v17  ;;  %v499_v43 = vpack.c.bf16 %v1594_v35, %v1604_v37  ;;  %v1628_v45 = vld [vmem:[%s2080_s0 + $0x50] sm:$0xff]  ;;  %v1641_v49 = vld [vmem:[%s2080_s0 + $0x21] sm:$0xff]  ;;  %v500_v60 = vpack.c.bf16 %v1623_v44, %v1599_v36 }
  0x11   :  { %612 = vmatprep.subr.bf16.mxu0 %v1394_v18  ;;  %v33_v47 = vpack.c.bf16 %v1628_v45, %v1623_v44  ;;  %v1646_v50 = vld [vmem:[%s2080_s0 + $0x31] sm:$0xff]  ;;  %v1657_v53 = vld [vmem:[%s2080_s0 + $0x60] sm:$0xff]  ;;  %v1017_v44 = vlaneseq }
  0x12   :  { %v1422_v52 = vld [vmem:[%s2079_s1 + $0x10] ss:$8 sps:$4 sm:$0xff]   ;;  %v1430_v57 = vld [vmem:[%s2079_s1 + $0x24] ss:$8 sps:$4 sm:$0xff]   ;;  %v72_v59 = vpack.c.bf16 %v1646_v50, %v1641_v49  ;;  %v1428_v61 = vld [vmem:[%s2079_s1 + $0x20] ss:$8 sps:$4 sm:$0xff]   ;;  %v501_v12 = vpack.c.bf16 %v1657_v53, %v1628_v45 }
  0x13   :  { %185 = vmatpush1.bf16.msra.mxu1 %v1396_v19  ;;  %v1662_v54 = vld [vmem:[%s2080_s0 + $0x70] sm:$0xff]  ;;  %v1433_v58 = vld [vmem:[%s2079_s1 + $0x1a4] ss:$8 sps:$4 sm:$0xff]   ;;  %v1431_v62 = vld [vmem:[%s2079_s1 + $0x1a0] ss:$8 sps:$4 sm:$0xff]   ;;  %v1018_v45 = vshrl.u32 %v1017_v44, 7 }
  0x14   :  { %613 = vmatpush1.bf16.msra.mxu0 %v1397_v20  ;;  %186 = vmatprep.subr.bf16.mxu1 %v1398_v21  ;;  %v1425_v55 = vld [vmem:[%s2079_s1 + $0x190] ss:$8 sps:$4 sm:$0xff]   ;;  %v34_v56 = vpack.c.bf16 %v1662_v54, %v1657_v53  ;;  %v1436_v63 = vld [vmem:[%s2079_s1 + $0x34] ss:$8 sps:$4 sm:$0xff]   ;;  %v1696_v2 = vld [vmem:[%s2080_s0 + $0x41] sm:$0xff] }
  0x15   :  { %614 = vmatprep.subr.bf16.mxu0 %v1400_v22  ;;  %v1439_v0 = vld [vmem:[%s2079_s1 + $0x1b4] ss:$8 sps:$4 sm:$0xff]   ;;  %v1706_v4 = vld [vmem:[%s2080_s0 + $0xc0] sm:$0xff]  ;;  %v1434_v7 = vld [vmem:[%s2079_s1 + $0x30] ss:$8 sps:$4 sm:$0xff]  }
  0x16   :  { %v1701_v3 = vld [vmem:[%s2080_s0 + $0xb0] sm:$0xff]  ;;  %v1442_v9 = vld [vmem:[%s2079_s1 + $0x44] ss:$8 sps:$4 sm:$0xff]   ;;  %v1440_v16 = vld [vmem:[%s2079_s1 + $0x40] ss:$8 sps:$4 sm:$0xff]  }
  0x17   :  { %187 = vmatpush1.bf16.msra.mxu1 %v1402_v23  ;;  %v1713_v5 = vld [vmem:[%s2080_s0 + $0x51] sm:$0xff]  ;;  %v36_v6 = vpack.c.bf16 %v1706_v4, %v1701_v3  ;;  %v1445_v10 = vld [vmem:[%s2079_s1 + $0x1c4] ss:$8 sps:$4 sm:$0xff]   ;;  %v1443_v17 = vld [vmem:[%s2079_s1 + $0x1c0] ss:$8 sps:$4 sm:$0xff]  }
  0x18   :  { %615 = vmatpush1.bf16.msra.mxu0 %v1403_v24  ;;  %188 = vmatprep.subr.bf16.mxu1 %v1404_v25  ;;  %v1437_v8 = vld [vmem:[%s2079_s1 + $0x1b0] ss:$8 sps:$4 sm:$0xff]   ;;  %v73_v11 = vpack.c.bf16 %v1713_v5, %v1696_v2  ;;  %v1741_v14 = vld [vmem:[%s2080_s0 + $0xe0] sm:$0xff]  ;;  %v1448_v18 = vld [vmem:[%s2079_s1 + $0x54] ss:$8 sps:$4 sm:$0xff]  }
  0x19   :  { %616 = vmatprep.subr.bf16.mxu0 %v1406_v26  ;;  %v1736_v13 = vld [vmem:[%s2080_s0 + $0xd0] sm:$0xff]  ;;  %v1757_v19 = vld [vmem:[%s2080_s0 + $0x61] sm:$0xff] }
  0x1a   :  { %v37_v15 = vpack.c.bf16 %v1741_v14, %v1736_v13  ;;  %v1762_v20 = vld [vmem:[%s2080_s0 + $0x71] sm:$0xff]  ;;  %v1182_v21 = vld [vmem:[%s2080_s0 + $0x80] sm:$0xff] }
  0x1b   :  { %189 = vmatpush1.bf16.msra.mxu1 %v1408_v27  ;;  %v1451_v22 = vld [vmem:[%s2079_s1 + $0x1d4] ss:$8 sps:$4 sm:$0xff]   ;;  %v1446_v23 = vld [vmem:[%s2079_s1 + $0x50] ss:$8 sps:$4 sm:$0xff]   ;;  %v1784_v26 = vld [vmem:[%s2080_s0 + $0x100] sm:$0xff] }
  0x1c   :  { %617 = vmatpush1.bf16.msra.mxu0 %v1409_v28  ;;  %190 = vmatprep.subr.bf16.mxu1 %v1410_v29  ;;  %v1449_v24 = vld [vmem:[%s2079_s1 + $0x1d0] ss:$8 sps:$4 sm:$0xff]   ;;  %v1791_v27 = vld [vmem:[%s2080_s0 + $0xa0] sm:$0xff] }
  0x1d   :  { %618 = vmatprep.subr.bf16.mxu0 %v1412_v30  ;;  %v1779_v25 = vld [vmem:[%s2080_s0 + $0xf0] sm:$0xff]  ;;  %v1454_v28 = vld [vmem:[%s2079_s1 + $0x64] ss:$8 sps:$4 sm:$0xff]  }
  0x1e   :  { %v38_v29 = vpack.c.bf16 %v1784_v26, %v1779_v25  ;;  %v1457_v30 = vld [vmem:[%s2079_s1 + $0x1e4] ss:$8 sps:$4 sm:$0xff]  }
  0x1f   :  { %191 = vmatpush1.bf16.msra.mxu1 %v1414_v31  ;;  %v1804_v31 = vld [vmem:[%s2080_s0] sm:$0xff] }
  0x20   :  { %619 = vmatpush1.bf16.msra.mxu0 %v1415_v32  ;;  %369 = vmatprep.subr.bf16.mxu1 %v1418_v39  ;;  %v1809_v32 = vld [vmem:[%s2080_s0 + $0x81] sm:$0xff]  ;;  %v31_v39 = vpack.c.bf16 %v1604_v37, %v1804_v31 }
  0x21   :  { %870 = vmatprep.subr.bf16.mxu0 %v1421_v40  ;;  %v1814_v33 = vld [vmem:[%s2080_s0 + $0x101] sm:$0xff]  ;;  %v768_v40 = vpack.c.bf16 %v1809_v32, %v1762_v20 }
  0x22   :  { %209 = vmatmul.mubr.bf16.vlgmr.msra.gmra.mrb[0].mxu1 %v71_v41  ;;  %v1823_v41 = vld [vmem:[%s2080_s0 + $0x90] sm:$0xff] }
  0x23   :  { %637 = vmatmul.mubr.bf16.vlgmr.msra.gmra.mrb[0].mxu0 %v499_v43  ;;  %370 = vmatpush1.bf16.msra.mxu1 %v1416_v42  ;;  %v1828_v42 = vld [vmem:[%s2080_s0 + $0x111] sm:$0xff]  ;;  %v74_v43 = vpack.c.bf16 %v1762_v20, %v1757_v19  ;;  %v35_v37 = vpack.c.bf16 %v1791_v27, %v1823_v41 }
  0x24   :  { %871 = vmatpush1.bf16.msra.mxu0 %v1419_v46  ;;  %218 = vmatprep.mubr.bf16.mxu1 %v1464_v1  ;;  %v502_v46 = vpack.c.bf16 %v1182_v21, %v1662_v54 }
  0x25   :  { %646 = vmatprep.mubr.bf16.mxu0 %v1464_v1  ;;  %371 = vmatprep.subr.bf16.mxu1 %v1424_v48  ;;  %v772_v48 = vpack.c.bf16 %v1828_v42, %v1814_v33 }
  0x26   :  { %872 = vmatprep.subr.bf16.mxu0 %v1427_v51  ;;  %v1452_v51 = vld [vmem:[%s2079_s1 + $0x60] ss:$8 sps:$4 sm:$0xff]  }
  0x27   :  { %372 = vmatpush1.bf16.msra.mxu1 %v1422_v52  ;;  %v1455_v52 = vld [vmem:[%s2079_s1 + $0x1e0] ss:$8 sps:$4 sm:$0xff]  }
  0x28   :  { %873 = vmatpush1.bf16.msra.mxu0 %v1425_v55  ;;  %373 = vmatprep.subr.bf16.mxu1 %v1430_v57  ;;  %v1460_v55 = vld [vmem:[%s2079_s1 + $0x74] ss:$8 sps:$4 sm:$0xff]  }
  0x29   :  { %874 = vmatprep.subr.bf16.mxu0 %v1433_v58  ;;  %v1463_v57 = vld [vmem:[%s2079_s1 + $0x1f4] ss:$8 sps:$4 sm:$0xff]  }
  0x2a   :  { %219 = vmatmul.mubr.bf16.gmra.mrb[4].mxu1 %v72_v59  ;;  %v63_v58 = vld [vmem:[%s2080_s0 + $0x91] sm:$0xff]  ;;  %v64_v59 = vld [vmem:[%s2080_s0 + $0xa1] sm:$0xff] }
  0x2b   :  { %647 = vmatmul.mubr.bf16.gmra.mrb[4].mxu0 %v500_v60  ;;  %228 = vmatprep.mubr.bf16.mxu1 %v1464_v1  ;;  %v1458_v60 = vld [vmem:[%s2079_s1 + $0x70] ss:$8 sps:$4 sm:$0xff]  }
  0x2c   :  { %656 = vmatprep.mubr.bf16.mxu0 %v1464_v1  ;;  %374 = vmatpush1.bf16.msra.mxu1 %v1428_v61  ;;  %v1461_v61 = vld [vmem:[%s2079_s1 + $0x1f0] ss:$8 sps:$4 sm:$0xff]  }
  0x2d   :  { %875 = vmatpush1.bf16.msra.mxu0 %v1431_v62  ;;  %375 = vmatprep.subr.bf16.mxu1 %v1436_v63  ;;  %v75_v62 = vpack.c.bf16 %v64_v59, %v63_v58  ;;  %v503_v63 = vpack.c.bf16 %v1701_v3, %v1791_v27 }
  0x2e   :  { %876 = vmatprep.subr.bf16.mxu0 %v1439_v0  ;;  %v65_v0 = vld [vmem:[%s2080_s0 + $0xb1] sm:$0xff] }
  0x2f   :  { %v769_v35 = vpack.c.bf16 %v65_v0, %v64_v59 }
  0x30   :  { %376 = vmatpush1.bf16.msra.mxu1 %v1434_v7  ;;  %v66_v7 = vld [vmem:[%s2080_s0 + $0xc1] sm:$0xff] }
  0x31   :  { %877 = vmatpush1.bf16.msra.mxu0 %v1437_v8  ;;  %377 = vmatprep.subr.bf16.mxu1 %v1442_v9  ;;  %v76_v8 = vpack.c.bf16 %v66_v7, %v65_v0  ;;  %v504_v9 = vpack.c.bf16 %v1736_v13, %v1706_v4 }
  0x32   :  { %878 = vmatprep.subr.bf16.mxu0 %v1445_v10  ;;  %229 = vmatmul.mubr.bf16.gmra.mrb[8].mxu1 %v73_v11  ;;  %v67_v10 = vld [vmem:[%s2080_s0 + $0xd1] sm:$0xff]  ;;  %v68_v11 = vld [vmem:[%s2080_s0 + $0xe1] sm:$0xff] }
  0x33   :  { %657 = vmatmul.mubr.bf16.gmra.mrb[8].mxu0 %v501_v12  ;;  %238 = vmatprep.mubr.bf16.mxu1 %v1464_v1  ;;  %v77_v12 = vpack.c.bf16 %v68_v11, %v67_v10  ;;  %v770_v36 = vpack.c.bf16 %v67_v10, %v66_v7 }
  0x34   :  { %666 = vmatprep.mubr.bf16.mxu0 %v1464_v1  ;;  %378 = vmatpush1.bf16.msra.mxu1 %v1440_v16  ;;  %v505_v16 = vpack.c.bf16 %v1779_v25, %v1741_v14 }
  0x35   :  { %879 = vmatpush1.bf16.msra.mxu0 %v1443_v17  ;;  %379 = vmatprep.subr.bf16.mxu1 %v1448_v18  ;;  %v69_v17 = vld [vmem:[%s2080_s0 + $0xf1] sm:$0xff] }
  0x36   :  { %880 = vmatprep.subr.bf16.mxu0 %v1451_v22  ;;  %v1190_v18 = vld [vmem:[%s2080_s0 + $0x110] sm:$0xff]  ;;  %v78_v21 = vpack.c.bf16 %v1814_v33, %v69_v17 }
  0x37   :  { %v506_v22 = vpack.c.bf16 %v1190_v18, %v1784_v26 }
  0x38   :  { %380 = vmatpush1.bf16.msra.mxu1 %v1446_v23  ;;  %v765_v23 = vpack.c.bf16 %v1641_v49, %v1589_v34  ;;  %v767_v34 = vpack.c.bf16 %v1757_v19, %v1713_v5  ;;  %v1015_v49 = vld [vmem:[%s2081_s2] sm:$0x3] }
  0x39   :  { %881 = vmatpush1.bf16.msra.mxu0 %v1449_v24  ;;  %381 = vmatprep.subr.bf16.mxu1 %v1454_v28  ;;  %v766_v24 = vpack.c.bf16 %v1696_v2, %v1646_v50  ;;  %v1023_v50 = vsub.s32 1, %v1018_v45 }
  0x3a   :  { %882 = vmatprep.subr.bf16.mxu0 %v1457_v30  ;;  %239 = vmatmul.mubr.bf16.gmra.mrb[12].mxu1 %v74_v43 }
  0x3b   :  { %667 = vmatmul.mubr.bf16.gmra.mrb[12].mxu0 %v502_v46  ;;  %248 = vmatprep.mubr.bf16.mxu1 %v1464_v1 }
  0x3c   :  { %676 = vmatprep.mubr.bf16.mxu0 %v1464_v1  ;;  %382 = vmatpush1.bf16.msra.mxu1 %v1452_v51 }
  0x3d   :  { %883 = vmatpush1.bf16.msra.mxu0 %v1455_v52  ;;  %383 = vmatprep.subr.bf16.mxu1 %v1460_v55 }
  0x3e   :  { %884 = vmatprep.subr.bf16.mxu0 %v1463_v57 }
  0x40   :  { %384 = vmatpush1.bf16.msra.mxu1 %v1458_v60 }
  0x41   :  { %885 = vmatpush1.bf16.msra.mxu0 %v1461_v61 }
  0x42   :  { %249 = vmatmul.mubr.bf16.gmra.mrb[16].mxu1 %v75_v62 }
  0x43   :  { %677 = vmatmul.mubr.bf16.gmra.mrb[16].mxu0 %v503_v63  ;;  %258 = vmatprep.mubr.bf16.mxu1 %v1464_v1 }
  0x44   :  { %686 = vmatprep.mubr.bf16.mxu0 %v1464_v1 }
  0x4a   :  { %259 = vmatmul.mubr.bf16.gmra.mrb[20].mxu1 %v76_v8 }
  0x4b   :  { %687 = vmatmul.mubr.bf16.gmra.mrb[20].mxu0 %v504_v9  ;;  %268 = vmatprep.mubr.bf16.mxu1 %v1464_v1 }
  0x4c   :  { %696 = vmatprep.mubr.bf16.mxu0 %v1464_v1 }
  0x52   :  { %269 = vmatmul.mubr.bf16.gmra.mrb[24].mxu1 %v77_v12 }
  0x53   :  { %697 = vmatmul.mubr.bf16.gmra.mrb[24].mxu0 %v505_v16  ;;  %278 = vmatprep.mubr.bf16.mxu1 %v1464_v1 }
  0x54   :  { %706 = vmatprep.mubr.bf16.mxu0 %v1464_v1 }
  0x5a   :  { %279 = vmatmul.mubr.bf16.gmra.mrb[28].mxu1 %v78_v21 }
  0x5b   :  { %707 = vmatmul.mubr.bf16.gmra.mrb[28].mxu0 %v506_v22  ;;  %401 = vmatprep.mubr.bf16.mxu1 %v1464_v1 }
  0x5c   :  { %902 = vmatprep.mubr.bf16.mxu0 %v1464_v1 }
  0x62   :  { %402 = vmatmul.mubr.bf16.vlgmr.msra.gmra.mrb[0].mxu1 %v31_v39 }
  0x63   :  { %903 = vmatmul.mubr.bf16.vlgmr.msra.gmra.mrb[0].mxu0 %v765_v23  ;;  %411 = vmatprep.mubr.bf16.mxu1 %v1464_v1 }
  0x64   :  { %912 = vmatprep.mubr.bf16.mxu0 %v1464_v1 }
  0x6a   :  { %412 = vmatmul.mubr.bf16.gmra.mrb[4].mxu1 %v32_v38  ;;  %v771_v38 = vpack.c.bf16 %v69_v17, %v68_v11 }
  0x6b   :  { %913 = vmatmul.mubr.bf16.gmra.mrb[4].mxu0 %v766_v24  ;;  %421 = vmatprep.mubr.bf16.mxu1 %v1464_v1 }
  0x6c   :  { %922 = vmatprep.mubr.bf16.mxu0 %v1464_v1 }
  0x72   :  { %422 = vmatmul.mubr.bf16.gmra.mrb[8].mxu1 %v33_v47  ;;  %v1019_v47 = vsub.s32 0, %v1018_v45 }
  0x73   :  { %923 = vmatmul.mubr.bf16.gmra.mrb[8].mxu0 %v767_v34  ;;  %431 = vmatprep.mubr.bf16.mxu1 %v1464_v1 }
  0x74   :  { %932 = vmatprep.mubr.bf16.mxu0 %v1464_v1  ;;  %v1947_v53 = vrot.slane %v1015_v49, %v1019_v47 }
  0x7a   :  { %432 = vmatmul.mubr.bf16.gmra.mrb[12].mxu1 %v34_v56  ;;  %v1949_v56 = vrot.slane %v1015_v49, %v1023_v50 }
  0x7b   :  { %933 = vmatmul.mubr.bf16.gmra.mrb[12].mxu0 %v768_v40  ;;  %441 = vmatprep.mubr.bf16.mxu1 %v1464_v1 }
  0x7c   :  { %942 = vmatprep.mubr.bf16.mxu0 %v1464_v1 }
  0x82   :  { %442 = vmatmul.mubr.bf16.gmra.mrb[16].mxu1 %v35_v37 }
  0x83   :  { %943 = vmatmul.mubr.bf16.gmra.mrb[16].mxu0 %v769_v35  ;;  %451 = vmatprep.mubr.bf16.mxu1 %v1464_v1 }
  0x84   :  { %952 = vmatprep.mubr.bf16.mxu0 %v1464_v1 }
  0x8a   :  { %452 = vmatmul.mubr.bf16.gmra.mrb[20].mxu1 %v36_v6 }
  0x8b   :  { %953 = vmatmul.mubr.bf16.gmra.mrb[20].mxu0 %v770_v36  ;;  %461 = vmatprep.mubr.bf16.mxu1 %v1464_v1 }
  0x8c   :  { %962 = vmatprep.mubr.bf16.mxu0 %v1464_v1 }
  0x92   :  { %462 = vmatmul.mubr.bf16.gmra.mrb[24].mxu1 %v37_v15 }
  0x93   :  { %963 = vmatmul.mubr.bf16.gmra.mrb[24].mxu0 %v771_v38  ;;  %471 = vmatprep.mubr.bf16.mxu1 %v1464_v1 }
  0x94   :  { %972 = vmatprep.mubr.bf16.mxu0 %v1464_v1 }
  0x9a   :  { %472 = vmatmul.mubr.bf16.gmra.mrb[28].mxu1 %v38_v29 }
  0x9b   :  { %973 = vmatmul.mubr.bf16.gmra.mrb[28].mxu0 %v772_v48 }
 0x135   :  { %v403_v54 = vpop.f32.mrb[0].mxu1 }
 0x136   :  { %v904_v1 = vpop.f32.mrb[0].mxu0  ;;  %v405_v3 = vpop.f32.mrb[1].mxu1 }
 0x137   :  { %v1271_v2 = vadd.f32 %v904_v1, %v403_v54  ;;  %v906_v4 = vpop.f32.mrb[1].mxu0  ;;  %v407_v6 = vpop.f32.mrb[2].mxu1 }
 0x138   :  { %v1272_v5 = vadd.f32 %v906_v4, %v405_v3  ;;  %v908_v13 = vpop.f32.mrb[2].mxu0  ;;  %v409_v19 = vpop.f32.mrb[3].mxu1 }
 0x139   :  { %v1027_v14 = vadd.f32 %v1271_v2, %v1947_v53  ;;  %v1273_v15 = vadd.f32 %v908_v13, %v407_v6  ;;  %v910_v20 = vpop.f32.mrb[3].mxu0 }
 0x13a   :  { %v1028_v25 = vadd.f32 %v1272_v5, %v1949_v56  ;;  %v1274_v26 = vadd.f32 %v910_v20, %v409_v19 }
 0x13b   :  { %v1059_v27 = vmax.f32 %v1027_v14, 0.0  ;;  %v1029_v28 = vadd.f32 %v1273_v15, %v1947_v53 }
 0x13c   :  { %v1060_v29 = vmax.f32 %v1028_v25, 0.0  ;;  %v1030_v30 = vadd.f32 %v1274_v26, %v1949_v56 }
 0x13d   :  { %1091 = vst [vmem:[%s2082_s3] sm:$0xff] %v1059_v27  ;;  %v1061_v31 = vmax.f32 %v1029_v28, 0.0  ;;  %v413_v33 = vpop.f32.mrb[4].mxu1 }
 0x13e   :  { %1092 = vst [vmem:[%s2082_s3 + $0x8] sm:$0xff] %v1060_v29  ;;  %v1062_v32 = vmax.f32 %v1030_v30, 0.0  ;;  %v914_v39 = vpop.f32.mrb[4].mxu0  ;;  %v415_v41 = vpop.f32.mrb[5].mxu1 }
 0x13f   :  { %1093 = vst [vmem:[%s2082_s3 + $0x10] sm:$0xff] %v1061_v31  ;;  %v1275_v40 = vadd.f32 %v914_v39, %v413_v33  ;;  %v916_v42 = vpop.f32.mrb[5].mxu0  ;;  %v417_v46 = vpop.f32.mrb[6].mxu1 }
 0x140   :  { %1094 = vst [vmem:[%s2082_s3 + $0x18] sm:$0xff] %v1062_v32  ;;  %v1276_v43 = vadd.f32 %v916_v42, %v415_v41  ;;  %v918_v37 = vpop.f32.mrb[6].mxu0  ;;  %v419_v52 = vpop.f32.mrb[7].mxu1 }
 0x141   :  { %v1031_v48 = vadd.f32 %v1275_v40, %v1947_v53  ;;  %v1277_v51 = vadd.f32 %v918_v37, %v417_v46  ;;  %v920_v55 = vpop.f32.mrb[7].mxu0 }
 0x142   :  { %v1032_v57 = vadd.f32 %v1276_v43, %v1949_v56  ;;  %v1278_v58 = vadd.f32 %v920_v55, %v419_v52 }
 0x143   :  { %v1063_v59 = vmax.f32 %v1031_v48, 0.0  ;;  %v1033_v60 = vadd.f32 %v1277_v51, %v1947_v53 }
 0x144   :  { %v1064_v61 = vmax.f32 %v1032_v57, 0.0  ;;  %v1034_v62 = vadd.f32 %v1278_v58, %v1949_v56 }
 0x145   :  { %1095 = vst [vmem:[%s2082_s3 + $0x20] sm:$0xff] %v1063_v59  ;;  %v1065_v63 = vmax.f32 %v1033_v60, 0.0  ;;  %v423_v7 = vpop.f32.mrb[8].mxu1 }
 0x146   :  { %1096 = vst [vmem:[%s2082_s3 + $0x28] sm:$0xff] %v1064_v61  ;;  %v1066_v0 = vmax.f32 %v1034_v62, 0.0  ;;  %v924_v8 = vpop.f32.mrb[8].mxu0  ;;  %v425_v10 = vpop.f32.mrb[9].mxu1 }
 0x147   :  { %1097 = vst [vmem:[%s2082_s3 + $0x30] sm:$0xff] %v1065_v63  ;;  %v1279_v9 = vadd.f32 %v924_v8, %v423_v7  ;;  %v926_v11 = vpop.f32.mrb[9].mxu0  ;;  %v427_v16 = vpop.f32.mrb[10].mxu1 }
 0x148   :  { %1098 = vst [vmem:[%s2082_s3 + $0x38] sm:$0xff] %v1066_v0  ;;  %v1280_v12 = vadd.f32 %v926_v11, %v425_v10  ;;  %v928_v17 = vpop.f32.mrb[10].mxu0  ;;  %v429_v22 = vpop.f32.mrb[11].mxu1 }
 0x149   :  { %v1035_v18 = vadd.f32 %v1279_v9, %v1947_v53  ;;  %v1281_v21 = vadd.f32 %v928_v17, %v427_v16  ;;  %v930_v23 = vpop.f32.mrb[11].mxu0 }
 0x14a   :  { %v1036_v24 = vadd.f32 %v1280_v12, %v1949_v56  ;;  %v1282_v34 = vadd.f32 %v930_v23, %v429_v22 }
 0x14b   :  { %v1067_v35 = vmax.f32 %v1035_v18, 0.0  ;;  %v1037_v36 = vadd.f32 %v1281_v21, %v1947_v53 }
 0x14c   :  { %v1068_v38 = vmax.f32 %v1036_v24, 0.0  ;;  %v1038_v44 = vadd.f32 %v1282_v34, %v1949_v56 }
 0x14d   :  { %1099 = vst [vmem:[%s2082_s3 + $0x40] sm:$0xff] %v1067_v35  ;;  %v1069_v45 = vmax.f32 %v1037_v36, 0.0  ;;  %v433_v49 = vpop.f32.mrb[12].mxu1 }
 0x14e   :  { %1100 = vst [vmem:[%s2082_s3 + $0x48] sm:$0xff] %v1068_v38  ;;  %v1070_v47 = vmax.f32 %v1038_v44, 0.0  ;;  %v934_v50 = vpop.f32.mrb[12].mxu0  ;;  %v435_v1 = vpop.f32.mrb[13].mxu1 }
 0x14f   :  { %1101 = vst [vmem:[%s2082_s3 + $0x50] sm:$0xff] %v1069_v45  ;;  %v1283_v54 = vadd.f32 %v934_v50, %v433_v49  ;;  %v936_v2 = vpop.f32.mrb[13].mxu0  ;;  %v437_v4 = vpop.f32.mrb[14].mxu1 }
 0x150   :  { %1102 = vst [vmem:[%s2082_s3 + $0x58] sm:$0xff] %v1070_v47  ;;  %v1284_v3 = vadd.f32 %v936_v2, %v435_v1  ;;  %v938_v5 = vpop.f32.mrb[14].mxu0  ;;  %v439_v14 = vpop.f32.mrb[15].mxu1 }
 0x151   :  { %v1039_v6 = vadd.f32 %v1283_v54, %v1947_v53  ;;  %v1285_v13 = vadd.f32 %v938_v5, %v437_v4  ;;  %v940_v15 = vpop.f32.mrb[15].mxu0 }
 0x152   :  { %v1040_v19 = vadd.f32 %v1284_v3, %v1949_v56  ;;  %v1286_v20 = vadd.f32 %v940_v15, %v439_v14 }
 0x153   :  { %v1071_v25 = vmax.f32 %v1039_v6, 0.0  ;;  %v1041_v26 = vadd.f32 %v1285_v13, %v1947_v53 }
 0x154   :  { %v1072_v27 = vmax.f32 %v1040_v19, 0.0  ;;  %v1042_v28 = vadd.f32 %v1286_v20, %v1949_v56 }
 0x155   :  { %1103 = vst [vmem:[%s2082_s3 + $0x60] sm:$0xff] %v1071_v25  ;;  %v1073_v29 = vmax.f32 %v1041_v26, 0.0  ;;  %v443_v31 = vpop.f32.mrb[16].mxu1 }
 0x156   :  { %1104 = vst [vmem:[%s2082_s3 + $0x68] sm:$0xff] %v1072_v27  ;;  %v1074_v30 = vmax.f32 %v1042_v28, 0.0  ;;  %v944_v32 = vpop.f32.mrb[16].mxu0  ;;  %v445_v39 = vpop.f32.mrb[17].mxu1 }
 0x157   :  { %1105 = vst [vmem:[%s2082_s3 + $0x70] sm:$0xff] %v1073_v29  ;;  %v1287_v33 = vadd.f32 %v944_v32, %v443_v31  ;;  %v946_v40 = vpop.f32.mrb[17].mxu0  ;;  %v447_v42 = vpop.f32.mrb[18].mxu1 }
 0x158   :  { %1106 = vst [vmem:[%s2082_s3 + $0x78] sm:$0xff] %v1074_v30  ;;  %v1288_v41 = vadd.f32 %v946_v40, %v445_v39  ;;  %v948_v43 = vpop.f32.mrb[18].mxu0  ;;  %v449_v48 = vpop.f32.mrb[19].mxu1 }
 0x159   :  { %v1043_v46 = vadd.f32 %v1287_v33, %v1947_v53  ;;  %v1289_v37 = vadd.f32 %v948_v43, %v447_v42  ;;  %v950_v51 = vpop.f32.mrb[19].mxu0 }
 0x15a   :  { %v1044_v52 = vadd.f32 %v1288_v41, %v1949_v56  ;;  %v1290_v55 = vadd.f32 %v950_v51, %v449_v48 }
 0x15b   :  { %v1075_v57 = vmax.f32 %v1043_v46, 0.0  ;;  %v1045_v58 = vadd.f32 %v1289_v37, %v1947_v53 }
 0x15c   :  { %v1076_v59 = vmax.f32 %v1044_v52, 0.0  ;;  %v1046_v60 = vadd.f32 %v1290_v55, %v1949_v56 }
 0x15d   :  { %1107 = vst [vmem:[%s2082_s3 + $0x80] sm:$0xff] %v1075_v57  ;;  %v1077_v61 = vmax.f32 %v1045_v58, 0.0  ;;  %v453_v63 = vpop.f32.mrb[20].mxu1 }
 0x15e   :  { %1108 = vst [vmem:[%s2082_s3 + $0x88] sm:$0xff] %v1076_v59  ;;  %v1078_v62 = vmax.f32 %v1046_v60, 0.0  ;;  %v954_v0 = vpop.f32.mrb[20].mxu0  ;;  %v455_v8 = vpop.f32.mrb[21].mxu1 }
 0x15f   :  { %1109 = vst [vmem:[%s2082_s3 + $0x90] sm:$0xff] %v1077_v61  ;;  %v1291_v7 = vadd.f32 %v954_v0, %v453_v63  ;;  %v956_v9 = vpop.f32.mrb[21].mxu0  ;;  %v457_v11 = vpop.f32.mrb[22].mxu1 }
 0x160   :  { %1110 = vst [vmem:[%s2082_s3 + $0x98] sm:$0xff] %v1078_v62  ;;  %v1292_v10 = vadd.f32 %v956_v9, %v455_v8  ;;  %v958_v12 = vpop.f32.mrb[22].mxu0  ;;  %v459_v18 = vpop.f32.mrb[23].mxu1 }
 0x161   :  { %v1047_v16 = vadd.f32 %v1291_v7, %v1947_v53  ;;  %v1293_v17 = vadd.f32 %v958_v12, %v457_v11  ;;  %v960_v21 = vpop.f32.mrb[23].mxu0 }
 0x162   :  { %v1048_v22 = vadd.f32 %v1292_v10, %v1949_v56  ;;  %v1294_v23 = vadd.f32 %v960_v21, %v459_v18 }
 0x163   :  { %v1079_v24 = vmax.f32 %v1047_v16, 0.0  ;;  %v1049_v34 = vadd.f32 %v1293_v17, %v1947_v53 }
 0x164   :  { %v1080_v35 = vmax.f32 %v1048_v22, 0.0  ;;  %v1050_v36 = vadd.f32 %v1294_v23, %v1949_v56 }
 0x165   :  { %1111 = vst [vmem:[%s2082_s3 + $0xa0] sm:$0xff] %v1079_v24  ;;  %v1081_v38 = vmax.f32 %v1049_v34, 0.0  ;;  %v463_v45 = vpop.f32.mrb[24].mxu1 }
 0x166   :  { %1112 = vst [vmem:[%s2082_s3 + $0xa8] sm:$0xff] %v1080_v35  ;;  %v1082_v44 = vmax.f32 %v1050_v36, 0.0  ;;  %v964_v47 = vpop.f32.mrb[24].mxu0  ;;  %v465_v50 = vpop.f32.mrb[25].mxu1 }
 0x167   :  { %1113 = vst [vmem:[%s2082_s3 + $0xb0] sm:$0xff] %v1081_v38  ;;  %v1295_v49 = vadd.f32 %v964_v47, %v463_v45  ;;  %v966_v54 = vpop.f32.mrb[25].mxu0  ;;  %v467_v2 = vpop.f32.mrb[26].mxu1 }
 0x168   :  { %1114 = vst [vmem:[%s2082_s3 + $0xb8] sm:$0xff] %v1082_v44  ;;  %v1296_v1 = vadd.f32 %v966_v54, %v465_v50  ;;  %v968_v3 = vpop.f32.mrb[26].mxu0  ;;  %v469_v6 = vpop.f32.mrb[27].mxu1 }
 0x169   :  { %v1051_v4 = vadd.f32 %v1295_v49, %v1947_v53  ;;  %v1297_v5 = vadd.f32 %v968_v3, %v467_v2  ;;  %v970_v13 = vpop.f32.mrb[27].mxu0 }
 0x16a   :  { %v1052_v14 = vadd.f32 %v1296_v1, %v1949_v56  ;;  %v1298_v15 = vadd.f32 %v970_v13, %v469_v6 }
 0x16b   :  { %v1083_v19 = vmax.f32 %v1051_v4, 0.0  ;;  %v1053_v20 = vadd.f32 %v1297_v5, %v1947_v53 }
 0x16c   :  { %v1084_v25 = vmax.f32 %v1052_v14, 0.0  ;;  %v1054_v26 = vadd.f32 %v1298_v15, %v1949_v56 }
 0x16d   :  { %1115 = vst [vmem:[%s2082_s3 + $0xc0] sm:$0xff] %v1083_v19  ;;  %v1085_v27 = vmax.f32 %v1053_v20, 0.0  ;;  %v473_v29 = vpop.f32.mrb[28].mxu1 }
 0x16e   :  { %1116 = vst [vmem:[%s2082_s3 + $0xc8] sm:$0xff] %v1084_v25  ;;  %v1086_v28 = vmax.f32 %v1054_v26, 0.0  ;;  %v974_v30 = vpop.f32.mrb[28].mxu0  ;;  %v475_v32 = vpop.f32.mrb[29].mxu1 }
 0x16f   :  { %1117 = vst [vmem:[%s2082_s3 + $0xd0] sm:$0xff] %v1085_v27  ;;  %v1299_v31 = vadd.f32 %v974_v30, %v473_v29  ;;  %v976_v33 = vpop.f32.mrb[29].mxu0  ;;  %v477_v40 = vpop.f32.mrb[30].mxu1 }
 0x170   :  { %1118 = vst [vmem:[%s2082_s3 + $0xd8] sm:$0xff] %v1086_v28  ;;  %v1300_v39 = vadd.f32 %v976_v33, %v475_v32  ;;  %v978_v41 = vpop.f32.mrb[30].mxu0  ;;  %v479_v46 = vpop.f32.mrb[31].mxu1 }
 0x171   :  { %v1055_v42 = vadd.f32 %v1299_v31, %v1947_v53  ;;  %v1301_v43 = vadd.f32 %v978_v41, %v477_v40  ;;  %v980_v37 = vpop.f32.mrb[31].mxu0 }
 0x172   :  { %v1056_v48 = vadd.f32 %v1300_v39, %v1949_v56  ;;  %v1302_v51 = vadd.f32 %v980_v37, %v479_v46 }
 0x173   :  { %v1087_v52 = vmax.f32 %v1055_v42, 0.0  ;;  %v1057_v55 = vadd.f32 %v1301_v43, %v1947_v53 }
 0x174   :  { %v1088_v57 = vmax.f32 %v1056_v48, 0.0  ;;  %v1058_v58 = vadd.f32 %v1302_v51, %v1949_v56 }
 0x175   :  { %1119 = vst [vmem:[%s2082_s3 + $0xe0] sm:$0xff] %v1087_v52  ;;  %v1089_v59 = vmax.f32 %v1057_v55, 0.0 }
 0x176   :  { %1120 = vst [vmem:[%s2082_s3 + $0xe8] sm:$0xff] %v1088_v57  ;;  %v1090_v60 = vmax.f32 %v1058_v58, 0.0 }
 0x177   :  { %1121 = vst [vmem:[%s2082_s3 + $0xf0] sm:$0xff] %v1089_v59 }
 0x178   :  { %1122 = vst [vmem:[%s2082_s3 + $0xf8] sm:$0xff] %v1090_v60 }

// kernel: generator_forward.3
= control target key start
LH: loop header
LB: loop body
LE: loop exit
PB: predicated region body
PF: predicated region fallthrough
CT: control target
= control target key end

     0   :  { %s6738_s0 = inlined_call_operand.vmem [shape: f32[2,64], index: 0, kind: input, shape index: {}]   ;;  %s6739_s1 = inlined_call_operand.hbm [shape: bf16[64,1024], index: 1, kind: input, shape index: {}]   ;;  %s6740_s2 = inlined_call_operand.hbm [shape: f32[1,1024], index: 2, kind: input, shape index: {}]   ;;  %s6741_s3 = inlined_call_operand.hbm [shape: bf16[1024,6272], index: 3, kind: input, shape index: {}]   ;;  %s6742_s4 = inlined_call_operand.hbm [shape: f32[1,6272], index: 4, kind: input, shape index: {}]   ;;  %s6743_s5 = inlined_call_operand.vmem [shape: f32[2,6272], index: 5, kind: output, shape index: {}]  }
   0x1   :  { %6751 = sst [smem:[#allocation11_spill]] %s6739_s1 }
   0x2   :  { %6752 = sst [smem:[#allocation12_spill]] %s6741_s3 }
   0x3   :  { %10 = vsyncpa [#allocation3], 0 }
   0x4   :  { %11 = vsyncpa [#allocation5], 0  ;;  %s5936_s18 = smov 0   ;;  %s5938_s19 = smov 0  }
   0x5   :  { %s5940_s20 = smov 0   ;;  %s5942_s21 = smov 0  }
   0x6 LB: > { %s5955_s22 = sadd.s32 4294967295, %s5893_s21   ;;  %s5958_s23 = sadd.s32 1, %s5893_s21   ;;  %s5893_s21 = sphi %s5942_s21, %s6775_s21   ;;  %s5889_s20 = sphi %s5940_s20, %s6774_s20   ;;  %s5885_s19 = sphi %s5938_s19, %s6773_s19   ;;  %s5881_s18 = sphi %s5936_s18, %s6772_s18  }
   0x7   : > { %s84_s24 = ssub.s32 %s5893_s21, %s5958_s23  ;;  %s87_s25 = sadd.s32 1, %s5889_s20 }
   0x8   : > { %p85_p0 = scmp.eq.s32.totalorder %s84_s24, 0  ;;  %p94_p1 = scmp.ne.s32.totalorder %s5889_s20, %s5885_s19 }
   0x9   : > { %p95_p2 = scmp.eq.s32.totalorder %s5893_s21, 0  ;;  %p100_p3 = scmp.ne.s32.totalorder %s5885_s19, %s5881_s18 }
   0xa   : > { %s5968_s26 = scalar_select %p85_p0, %s5889_s20, %s87_s25  }
   0xb   : > { %p5970_p4 = por %p95_p2, %p94_p1  ;;  %p6744_p5 = scmp.eq.s32.totalorder %s5955_s22, 0 }
   0xc   : > { %p4393_p6 = scmp.ge.s32.totalorder %s5893_s21, 1  ;;  %p163_p7 = scmp.lt.s32.totalorder %s5893_s21, 8 }
   0xd   : > { %p5979_p8 = por %p6744_p5, %p100_p3  ;;  %s5895_s30 = smov [#allocation2]  }
   0xe   : > { %p5983_p9 = pnand %p4393_p6, %p163_p7  ;;  %s178_s6 = sshll.u32 %s5895_s30, 4  ;;  %s179_s6 = int_to_ptr.vmem [resolvable:$true] %s178_s6 }
   0xf   : > { %s6754_s28 = scalar_select %p5979_p8, 1, 0 }
  0x10   : > { %s6755_s29 = scalar_select %p5983_p9, 1, 0 }
  0x11   : > { %p5035_p10 = pneg %p5983_p9  ;;  %p5051_p12 = scmp.lt.s32.totalorder %s5893_s21, 7 }
  0x12   : > { %s203_s8 = sand.u32 1, %s5893_s21   ;;  %s205_s9 = sand.u32 1, %s5889_s20  }
  0x13   : > { %p5991_p11 = pnand %p5035_p10, %p6744_p5  ;;  %p6000_p13 = pnand %p5051_p12, %p5970_p4 }
  0x14   : > { %s6758_s1 = sld [smem:[#allocation11_spill]] }
  0x15   : > { %s6757_s10 = scalar_select %p6000_p13, 1, 0 }
  0x16   : > { %p6748_p1 = pneg %p5991_p11 }
  0x1a   : > { %s5735_s13 = scalar_lea.hbm %s6758_s1, 4096 }
  0x1b   : > { %p5736_p0 = scmp.ne.s32.totalorder %s6758_s1, %s5735_s13  ;;  %p5742_p4 = scmp.lt.u32.totalorder %s5735_s13, %s6758_s1 }
  0x1d   : > { %p5738_p2 = pnand %p6748_p1, %p5736_p0 }
  0x1f   : > { %p5739_p3 = pneg %p5738_p2 }
  0x21   : > { %p5744_p6 = pnand %p5742_p4, %p5739_p3 }
  0x23   : > { %5747 = shalt.err (!%p5744_p6)
}
  0x24   : > { %s5748_s18 = scalar_lea.vmem %s179_s6, 4096  ;;  %p5756_p5 = scmp.lt.s32.totalorder %s179_s6, %s179_s6 }
  0x25   : > { %p5749_p7 = scmp.ne.s32.totalorder %s179_s6, %s5748_s18  ;;  %p5757_p8 = scmp.lt.s32.totalorder %s5748_s18, %s5748_s18 }
  0x27   : > { %p5751_p10 = pnand %p5749_p7, %p6748_p1  ;;  %p5758_p9 = por %p5757_p8, %p5756_p5 }
  0x29   : > { %p5752_p12 = pneg %p5751_p10 }
  0x2b   : > { %p5759_p13 = pnand %p5758_p9, %p5752_p12 }
  0x2d   : > { %5762 = shalt.err (!%p5759_p13)
}
  0x2e   : > { %s5896_s24 = smov 512   ;;  %s5897_s25 = smov 32  }
  0x2f   : > { %5038 = dma.hbm_to_vmem [thread:$0]  (!%p5991_p11), %s6758_s1, 4096, %s179_s6, [#allocation3], %s5896_s24, %s5896_s24, %s5897_s25  }
  0x30   : > { %s5019_s11 = smul.u32 3584, %s205_s9  ;;  %s6759_s3 = sld [smem:[#allocation12_spill]] }
  0x31   : > { %s4889_s12 = smul.u32 448, %s5893_s21  ;;  %s6036_s18 = scalar_lea.sflag [#allocation3], %s203_s8 }
  0x32   : > { %s207_s16 = scalar_lea.vmem [#allocation6], %s5019_s11  ;;  %p6760_p8 = scmp.ne.s32.totalorder %s6757_s10, 0 }
  0x33   : > { %s214_s17 = sshll.u32 %s207_s16, 4  ;;  %s6034_s17 = int_to_ptr.vmem [resolvable:$true] %s214_s17 }
  0x34   : > { %p6749_p9 = pneg %p6760_p8 }
  0x36   : > { %s6032_s15 = scalar_lea.hbm %s6759_s3, %s4889_s12  ;;  %s5768_s25 = scalar_lea.hbm %s6759_s3, 401408 }
  0x37   : > { %s5763_s27 = scalar_lea.hbm %s6032_s15, 57344  ;;  %p5769_p2 = scmp.lt.u32.totalorder %s6032_s15, %s6759_s3 }
  0x38   : > { %p5764_p5 = scmp.ne.s32.totalorder %s6032_s15, %s5763_s27  ;;  %p5770_p3 = scmp.lt.u32.totalorder %s5768_s25, %s5763_s27 }
  0x39   : > { %p5772_p6 = scmp.lt.u32.totalorder %s5763_s27, %s6032_s15 }
  0x3a   : > { %p5766_p13 = pnand %p6749_p9, %p5764_p5  ;;  %p5771_p4 = por %p5770_p3, %p5769_p2 }
  0x3c   : > { %p5767_p0 = pneg %p5766_p13  ;;  %p5773_p7 = por %p5772_p6, %p5771_p4 }
  0x3e   : > { %p5774_p10 = pnand %p5773_p7, %p5767_p0 }
  0x40   : > { %5777 = shalt.err (!%p5774_p10)
}
  0x41   : > { %s5778_s8 = scalar_lea.vmem %s6034_s17, 57344  ;;  %s5898_s11 = smov [#allocation6]  }
  0x42   : > { %p5779_p12 = scmp.ne.s32.totalorder %s6034_s17, %s5778_s8  ;;  %s5783_s13 = sshll.u32 %s5898_s11, 4  ;;  %s5784_s13 = int_to_ptr.vmem [resolvable:$false] %s5783_s13 }
  0x43   : > { %s5785_s14 = scalar_lea.vmem %s5784_s13, 114688  ;;  %p5786_p1 = scmp.lt.s32.totalorder %s6034_s17, %s5784_s13 }
  0x44   : > { %p5781_p5 = pnand %p5779_p12, %p6749_p9  ;;  %p5787_p2 = scmp.lt.s32.totalorder %s5785_s14, %s5778_s8 }
  0x46   : > { %p5782_p13 = pneg %p5781_p5  ;;  %p5788_p3 = por %p5787_p2, %p5786_p1 }
  0x48   : > { %p5789_p4 = pnand %p5788_p3, %p5782_p13 }
  0x4a   : > { %5792 = shalt.err (!%p5789_p4)
}
  0x4b   : > { %s5899_s16 = smov 3136   ;;  %s5900_s27 = smov 448  }
  0x4c   : > { %s5901_s6 = smov 28   ;;  %s5902_s24 = smov [#allocation4]  }
  0x4d   : > { %5045 = dma.hbm_to_vmem [thread:$0]  (!%p6760_p8), %s6032_s15, 57344, %s6034_s17, %s6036_s18, %s5899_s16, %s5900_s27, %s5901_s6  }
  0x4e   : > { %s192_s25 = sshll.u32 %s5902_s24, 4  ;;  %s5020_s30 = smul.u32 7, %s205_s9  ;;  %s193_s25 = int_to_ptr.vmem [resolvable:$true] %s192_s25 }
  0x4f   : > { %s4890_s12 = smul.u32 112, %s5893_s21  ;;  %s5793_s13 = scalar_lea.hbm %s6740_s2, 128 }
  0x50   : > { %p5794_p1 = scmp.ne.s32.totalorder %s6740_s2, %s5793_s13  ;;  %p6761_p0 = pneg %p5991_p11 }
  0x51   : > { %p5800_p10 = scmp.lt.u32.totalorder %s5793_s13, %s6740_s2 }
  0x52   : > { %p5796_p6 = pnand %p5794_p1, %p6761_p0 }
  0x54   : > { %p5797_p7 = pneg %p5796_p6 }
  0x56   : > { %p5802_p12 = pnand %p5800_p10, %p5797_p7 }
  0x58   : > { %5805 = shalt.err (!%p5802_p12)
}
  0x59   : > { %s5806_s9 = scalar_lea.vmem %s193_s25, 128  ;;  %p6762_p13 = pmov %p6761_p0 }
  0x5a   : > { %p5807_p5 = scmp.ne.s32.totalorder %s193_s25, %s5806_s9  ;;  %p5814_p4 = scmp.lt.s32.totalorder %s193_s25, %s193_s25 }
  0x5b   : > { %p5815_p9 = scmp.lt.s32.totalorder %s5806_s9, %s5806_s9 }
  0x5c   : > { %p5809_p2 = pnand %p5807_p5, %p6762_p13 }
  0x5d   : > { %p5816_p8 = por %p5815_p9, %p5814_p4 }
  0x5e   : > { %p5810_p3 = pneg %p5809_p2 }
  0x60   : > { %p5817_p0 = pnand %p5816_p8, %p5810_p3 }
  0x62   : > { %5820 = shalt.err (!%p5817_p0)
}
  0x63   : > { %5041 = dma.hbm_to_vmem [thread:$0]  (!%p5991_p11), %s6740_s2, 128, %s193_s25, [#allocation5]  }
  0x64   : > { %s6090_s16 = scalar_lea.hbm %s6742_s4, %s4890_s12  ;;  %s228_s27 = scalar_lea.vmem [#allocation7], %s5020_s30 }
  0x65   : > { %s236_s6 = sshll.u32 %s228_s27, 4  ;;  %s5821_s24 = scalar_lea.hbm %s6090_s16, 112  ;;  %s237_s6 = int_to_ptr.vmem [resolvable:$true] %s236_s6 }
  0x66   : > { %p5822_p8 = scmp.ne.s32.totalorder %s6090_s16, %s5821_s24  ;;  %p6763_p9 = scmp.ne.s32.totalorder %s6757_s10, 0 }
  0x67   : > { %s5826_s8 = scalar_lea.hbm %s6742_s4, 784  ;;  %p5827_p11 = scmp.lt.u32.totalorder %s6090_s16, %s6742_s4 }
  0x68   : > { %p6764_p1 = pneg %p6763_p9  ;;  %p5828_p10 = scmp.lt.u32.totalorder %s5826_s8, %s5821_s24 }
  0x69   : > { %p5830_p5 = scmp.lt.u32.totalorder %s5821_s24, %s6090_s16 }
  0x6a   : > { %p5824_p6 = pnand %p5822_p8, %p6764_p1  ;;  %p5829_p12 = por %p5828_p10, %p5827_p11 }
  0x6c   : > { %p5825_p7 = pneg %p5824_p6  ;;  %p5831_p13 = por %p5830_p5, %p5829_p12 }
  0x6e   : > { %p5832_p2 = pnand %p5831_p13, %p5825_p7 }
  0x70   : > { %5835 = shalt.err (!%p5832_p2)
}
  0x71   : > { %s5836_s30 = scalar_lea.vmem %s237_s6, 112  ;;  %p6765_p4 = pmov %p6764_p1 }
  0x72   : > { %p5837_p3 = scmp.ne.s32.totalorder %s237_s6, %s5836_s30  ;;  %s5903_s13 = smov [#allocation7]  }
  0x73   : > { %s5841_s14 = sshll.u32 %s5903_s13, 4  ;;  %s5842_s14 = int_to_ptr.vmem [resolvable:$false] %s5841_s14 }
  0x74   : > { %p5839_p0 = pnand %p5837_p3, %p6765_p4  ;;  %s5843_s15 = scalar_lea.vmem %s5842_s14, 224 }
  0x75   : > { %p5844_p1 = scmp.lt.s32.totalorder %s237_s6, %s5842_s14  ;;  %p5845_p6 = scmp.lt.s32.totalorder %s5843_s15, %s5836_s30 }
  0x76   : > { %p5840_p8 = pneg %p5839_p0 }
  0x77   : > { %p5846_p10 = por %p5845_p6, %p5844_p1 }
  0x79   : > { %p5847_p11 = pnand %p5846_p10, %p5840_p8 }
  0x7b   : > { %5850 = shalt.err (!%p5847_p11)
}
  0x7c   : > { %5048 = dma.hbm_to_vmem [thread:$0]  (!%p6763_p9), %s6090_s16, 112, %s237_s6, %s6036_s18  }
  0x7d   : > { %p6766_p7 = scmp.ne.s32.totalorder %s6755_s29, 0 }
  0x7e   : > { %p6767_p12 = scmp.eq.s32.totalorder (!%p6766_p7), %s5955_s22, 0 }
  0x7f   : > { %245 = sbr.rel (%p6766_p7) target bundleno = 993 (0x3e1), region = 40 }
  0x86   : > { %5868 = dma.done.wait (%p6767_p12), [#allocation3], 4096   ;;  %p6768_p5 = pmov %p6767_p12 }
  0x88   : > { %5870 = vsyncadd (%p6768_p5), [#allocation3], 4294963200  ;;  %p6769_p13 = pmov %p6768_p5 }
  0x89   : > { %p6770_p2 = pmov %p6768_p5 }
  0x8a   : > { %5872 = dma.done.wait (%p6769_p13), [#allocation5], 128  }
  0x8b   : > { %5874 = vsyncadd (%p6770_p2), [#allocation5], 4294967168  ;;  %s255_s10 = sand.u32 1, %s5955_s22   ;;  %s257_s18 = sand.u32 1, %s5885_s19  }
  0x8c   : > { %s5021_s29 = smul.u32 3584, %s257_s18  ;;  %s256_s9 = scalar_lea.sflag [#allocation3], %s255_s10 }
  0x8d   : > { %p6771_p9 = scmp.ne.s32.totalorder %s6754_s28, 0 }
  0x8e   : > { %s6126_s1 = scalar_lea.vmem [#allocation6], %s5021_s29 }
  0x8f   : > { %5876 = dma.done.wait (%p6771_p9), %s256_s9, 57456  }
  0x90   : > { %5878 = vsyncadd (%p6771_p9), %s256_s9, 4294909840  ;;  %v5904_v0 = vmov 0   ;;  %v311_v1 = vld [vmem:[#allocation2] sm:$0xff]  ;;  %v312_v3 = vld [vmem:[#allocation2 + $0x8] sm:$0xff]  ;;  %vm545_vm0 = vcmask 523264   ;;  %s5022_s3 = smul.u32 7, %s257_s18 }
  0x91   : > { %581 = vmatprep.mubr.bf16.mxu0 %v5904_v0  ;;  %622 = vmatprep.mubr.bf16.mxu1 %v5904_v0  ;;  %v315_v2 = vld [vmem:[#allocation2 + $0x20] sm:$0xff]  ;;  %v316_v5 = vld [vmem:[#allocation2 + $0x28] sm:$0xff]  ;;  %v313_v31 = vld [vmem:[#allocation2 + $0x10] sm:$0xff]  ;;  %s302_s16 = smul.u32 7, %s5955_s22 }
  0x92   : > { %v4404_v4 = vcombine.high %v311_v1, %v315_v2  ;;  %v4403_v6 = vcombine.low %v311_v1, %v315_v2  ;;  %v319_v7 = vld [vmem:[#allocation2 + $0x40] sm:$0xff]  ;;  %v4406_v9 = vcombine.high %v312_v3, %v316_v5  ;;  %v4405_v10 = vcombine.low %v312_v3, %v316_v5  ;;  %v320_v12 = vld [vmem:[#allocation2 + $0x48] sm:$0xff]  ;;  %v317_v32 = vld [vmem:[#allocation2 + $0x30] sm:$0xff]  ;;  %s268_s17 = scalar_lea.vmem [#allocation7], %s5022_s3 }
  0x93   : > { %v323_v8 = vld [vmem:[#allocation2 + $0x60] sm:$0xff]  ;;  %v324_v13 = vld [vmem:[#allocation2 + $0x68] sm:$0xff]  ;;  %v314_v33 = vld [vmem:[#allocation2 + $0x18] sm:$0xff]  ;;  %v4408_v38 = vcombine.high %v313_v31, %v317_v32  ;;  %v4407_v44 = vcombine.low %v313_v31, %v317_v32  ;;  %p303_p3 = scmp.lt.s32.totalorder %s302_s16, 48 }
  0x94   : > { %v4412_v11 = vcombine.high %v319_v7, %v323_v8  ;;  %v327_v14 = vld [vmem:[#allocation2 + $0x80] sm:$0xff]  ;;  %549 = vmatprep.subr.bf16.mxu0 %v4404_v4  ;;  %v4414_v15 = vcombine.high %v320_v12, %v324_v13  ;;  %v328_v17 = vld [vmem:[#allocation2 + $0x88] sm:$0xff]  ;;  %590 = vmatprep.subr.bf16.mxu1 %v4406_v9  ;;  %v4411_v19 = vcombine.low %v319_v7, %v323_v8  ;;  %v318_v34 = vld [vmem:[#allocation2 + $0x38] sm:$0xff] }
  0x95   : > { %v331_v16 = vld [vmem:[#allocation2 + $0xa0] sm:$0xff]  ;;  %v332_v18 = vld [vmem:[#allocation2 + $0xa8] sm:$0xff]  ;;  %550 = vmatpush1.bf16.msra.mxu0 %v4403_v6  ;;  %591 = vmatpush1.bf16.msra.mxu1 %v4405_v10  ;;  %v4413_v20 = vcombine.low %v320_v12, %v324_v13  ;;  %v321_v39 = vld [vmem:[#allocation2 + $0x50] sm:$0xff]  ;;  %v4410_v41 = vcombine.high %v314_v33, %v318_v34  ;;  %v4409_v49 = vcombine.low %v314_v33, %v318_v34  ;;  %s6777_s16 = smov (!%p303_p3, %s302_s16), 48 }
  0x96   : > { %551 = vmatprep.subr.bf16.mxu0 %v4412_v11  ;;  %v4420_v21 = vcombine.high %v327_v14, %v331_v16  ;;  %592 = vmatprep.subr.bf16.mxu1 %v4414_v15  ;;  %v4422_v22 = vcombine.high %v328_v17, %v332_v18  ;;  %v335_v23 = vld [vmem:[#allocation2 + $0xc0] sm:$0xff]  ;;  %v336_v25 = vld [vmem:[#allocation2 + $0xc8] sm:$0xff]  ;;  %v4419_v27 = vcombine.low %v327_v14, %v331_v16  ;;  %v325_v40 = vld [vmem:[#allocation2 + $0x70] sm:$0xff]  ;;  %s4402_s22 = sshll.u32 %s6777_s16, 1 }
  0x97   : > { %v339_v24 = vld [vmem:[#allocation2 + $0xe0] sm:$0xff]  ;;  %v340_v26 = vld [vmem:[#allocation2 + $0xe8] sm:$0xff]  ;;  %v4421_v28 = vcombine.low %v328_v17, %v332_v18  ;;  %v322_v43 = vld [vmem:[#allocation2 + $0x58] sm:$0xff]  ;;  %v4416_v46 = vcombine.high %v321_v39, %v325_v40  ;;  %v4415_v52 = vcombine.low %v321_v39, %v325_v40  ;;  %s6712_s24 = scalar_lea.vmem %s6743_s5, %s4402_s22 }
  0x98   : > { %v4428_v29 = vcombine.high %v335_v23, %v339_v24  ;;  %v4430_v30 = vcombine.high %v336_v25, %v340_v26  ;;  %v4427_v35 = vcombine.low %v335_v23, %v339_v24  ;;  %v309_v36 = vld [vmem:[%s6738_s0] sm:$0x3]  ;;  %v4429_v37 = vcombine.low %v336_v25, %v340_v26  ;;  %v326_v45 = vld [vmem:[#allocation2 + $0x78] sm:$0xff]  ;;  %v329_v47 = vld [vmem:[#allocation2 + $0x90] sm:$0xff] }
  0x99   : > { %552 = vmatpush1.bf16.msra.mxu0 %v4411_v19  ;;  %593 = vmatpush1.bf16.msra.mxu1 %v4413_v20  ;;  %v310_v42 = vpack.c.bf16 %v309_v36, %v309_v36  ;;  %v333_v48 = vld [vmem:[#allocation2 + $0xb0] sm:$0xff]  ;;  %v4418_v50 = vcombine.high %v322_v43, %v326_v45  ;;  %v330_v51 = vld [vmem:[#allocation2 + $0x98] sm:$0xff]  ;;  %v4417_v57 = vcombine.low %v322_v43, %v326_v45  ;;  %v5100_v2 = vld [vmem:[%s6126_s1 + $0x384] ss:$28 sps:$4 sm:$0xff]  }
  0x9a   : > { %553 = vmatprep.subr.bf16.mxu0 %v4420_v21  ;;  %594 = vmatprep.subr.bf16.mxu1 %v4422_v22  ;;  %v334_v53 = vld [vmem:[#allocation2 + $0xb8] sm:$0xff]  ;;  %v4424_v54 = vcombine.high %v329_v47, %v333_v48  ;;  %v337_v55 = vld [vmem:[#allocation2 + $0xd0] sm:$0xff]  ;;  %v4423_v60 = vcombine.low %v329_v47, %v333_v48  ;;  %v5097_v4 = vld [vmem:[%s6126_s1 + $0x4] ss:$28 sps:$4 sm:$0xff]  }
  0x9b   : > { %v341_v56 = vld [vmem:[#allocation2 + $0xf0] sm:$0xff]  ;;  %v4426_v58 = vcombine.high %v330_v51, %v334_v53  ;;  %v338_v59 = vld [vmem:[#allocation2 + $0xd8] sm:$0xff]  ;;  %v4425_v63 = vcombine.low %v330_v51, %v334_v53  ;;  %v5098_v5 = vld [vmem:[%s6126_s1 + $0x380] ss:$28 sps:$4 sm:$0xff]  }
  0x9c   : > { %v342_v61 = vld [vmem:[#allocation2 + $0xf8] sm:$0xff]  ;;  %v4432_v62 = vcombine.high %v337_v55, %v341_v56  ;;  %v5106_v6 = vld [vmem:[%s6126_s1 + $0x3bc] ss:$28 sps:$4 sm:$0xff]   ;;  %v5118_v14 = vld [vmem:[%s6126_s1 + $0x42c] ss:$28 sps:$4 sm:$0xff]  }
  0x9d   : > { %554 = vmatpush1.bf16.msra.mxu0 %v4419_v27  ;;  %595 = vmatpush1.bf16.msra.mxu1 %v4421_v28  ;;  %v4434_v1 = vcombine.high %v338_v59, %v342_v61  ;;  %v4433_v3 = vcombine.low %v338_v59, %v342_v61  ;;  %v5095_v7 = vld [vmem:[%s6126_s1] ss:$28 sps:$4 sm:$0xff]   ;;  %v5104_v9 = vld [vmem:[%s6126_s1 + $0x3b8] ss:$28 sps:$4 sm:$0xff]   ;;  %v5110_v13 = vld [vmem:[%s6126_s1 + $0x3f0] ss:$28 sps:$4 sm:$0xff]  }
  0x9e   : > { %555 = vmatprep.subr.bf16.mxu0 %v4428_v29  ;;  %596 = vmatprep.subr.bf16.mxu1 %v4430_v30  ;;  %v5103_v8 = vld [vmem:[%s6126_s1 + $0x3c] ss:$28 sps:$4 sm:$0xff]   ;;  %v5112_v10 = vld [vmem:[%s6126_s1 + $0x3f4] ss:$28 sps:$4 sm:$0xff]   ;;  %v5115_v16 = vld [vmem:[%s6126_s1 + $0xac] ss:$28 sps:$4 sm:$0xff]  }
  0x9f   : > { %v5101_v11 = vld [vmem:[%s6126_s1 + $0x38] ss:$28 sps:$4 sm:$0xff]   ;;  %v5107_v15 = vld [vmem:[%s6126_s1 + $0x70] ss:$28 sps:$4 sm:$0xff]   ;;  %v5116_v17 = vld [vmem:[%s6126_s1 + $0x428] ss:$28 sps:$4 sm:$0xff]  }
  0xa0   : > { %v5109_v12 = vld [vmem:[%s6126_s1 + $0x74] ss:$28 sps:$4 sm:$0xff]   ;;  %v5124_v18 = vld [vmem:[%s6126_s1 + $0x464] ss:$28 sps:$4 sm:$0xff]   ;;  %v5130_v23 = vld [vmem:[%s6126_s1 + $0x49c] ss:$28 sps:$4 sm:$0xff]  }
  0xa1   : > { %556 = vmatpush1.bf16.msra.mxu0 %v4427_v35  ;;  %597 = vmatpush1.bf16.msra.mxu1 %v4429_v37  ;;  %v5113_v19 = vld [vmem:[%s6126_s1 + $0xa8] ss:$28 sps:$4 sm:$0xff]   ;;  %v5119_v21 = vld [vmem:[%s6126_s1 + $0xe0] ss:$28 sps:$4 sm:$0xff]   ;;  %v5128_v25 = vld [vmem:[%s6126_s1 + $0x498] ss:$28 sps:$4 sm:$0xff]  }
  0xa2   : > { %631 = vmatprep.subr.bf16.mxu0 %v4408_v38  ;;  %672 = vmatprep.subr.bf16.mxu1 %v4410_v41  ;;  %v5121_v20 = vld [vmem:[%s6126_s1 + $0xe4] ss:$28 sps:$4 sm:$0xff]   ;;  %v5127_v24 = vld [vmem:[%s6126_s1 + $0x11c] ss:$28 sps:$4 sm:$0xff]   ;;  %v5136_v26 = vld [vmem:[%s6126_s1 + $0x4d4] ss:$28 sps:$4 sm:$0xff]  }
  0xa3   : > { %v5122_v22 = vld [vmem:[%s6126_s1 + $0x460] ss:$28 sps:$4 sm:$0xff]   ;;  %v5125_v27 = vld [vmem:[%s6126_s1 + $0x118] ss:$28 sps:$4 sm:$0xff]   ;;  %v5134_v29 = vld [vmem:[%s6126_s1 + $0x4d0] ss:$28 sps:$4 sm:$0xff]  }
  0xa4   : > { %4435 = vmatmul.mubr.msk.bf16.vlgmr.msra.gmra.mrb[0].mxu0 %vm545_vm0, %v310_v42  ;;  %4436 = vmatmul.mubr.msk.bf16.vlgmr.msra.gmra.mrb[0].mxu1 %vm545_vm0, %v310_v42  ;;  %v5133_v28 = vld [vmem:[%s6126_s1 + $0x154] ss:$28 sps:$4 sm:$0xff]   ;;  %v5142_v30 = vld [vmem:[%s6126_s1 + $0x50c] ss:$28 sps:$4 sm:$0xff]   ;;  %v5148_v34 = vld [vmem:[%s6126_s1 + $0x544] ss:$28 sps:$4 sm:$0xff]  }
  0xa5   : > { %632 = vmatpush1.bf16.msra.mxu0 %v4407_v44  ;;  %663 = vmatprep.mubr.bf16.mxu0 %v5904_v0  ;;  %v5131_v31 = vld [vmem:[%s6126_s1 + $0x150] ss:$28 sps:$4 sm:$0xff]   ;;  %v5140_v33 = vld [vmem:[%s6126_s1 + $0x508] ss:$28 sps:$4 sm:$0xff]   ;;  %v5146_v37 = vld [vmem:[%s6126_s1 + $0x540] ss:$28 sps:$4 sm:$0xff]  }
  0xa6   : > { %633 = vmatprep.subr.bf16.mxu0 %v4416_v46  ;;  %673 = vmatpush1.bf16.msra.mxu1 %v4409_v49  ;;  %v5139_v32 = vld [vmem:[%s6126_s1 + $0x18c] ss:$28 sps:$4 sm:$0xff]   ;;  %v5145_v36 = vld [vmem:[%s6126_s1 + $0x1c4] ss:$28 sps:$4 sm:$0xff]   ;;  %v5154_v38 = vld [vmem:[%s6126_s1 + $0x57c] ss:$28 sps:$4 sm:$0xff]  }
  0xa7   : > { %704 = vmatprep.mubr.bf16.mxu1 %v5904_v0  ;;  %674 = vmatprep.subr.bf16.mxu1 %v4418_v50  ;;  %v4431_v0 = vcombine.low %v337_v55, %v341_v56  ;;  %v5137_v35 = vld [vmem:[%s6126_s1 + $0x188] ss:$28 sps:$4 sm:$0xff]   ;;  %v5143_v39 = vld [vmem:[%s6126_s1 + $0x1c0] ss:$28 sps:$4 sm:$0xff]   ;;  %v5152_v41 = vld [vmem:[%s6126_s1 + $0x578] ss:$28 sps:$4 sm:$0xff]  }
  0xa8   : > { %v5151_v40 = vld [vmem:[%s6126_s1 + $0x1fc] ss:$28 sps:$4 sm:$0xff]   ;;  %v5157_v44 = vld [vmem:[%s6126_s1 + $0x234] ss:$28 sps:$4 sm:$0xff]   ;;  %v5166_v46 = vld [vmem:[%s6126_s1 + $0x5ec] ss:$28 sps:$4 sm:$0xff]  }
  0xa9   : > { %634 = vmatpush1.bf16.msra.mxu0 %v4415_v52  ;;  %v5149_v43 = vld [vmem:[%s6126_s1 + $0x1f8] ss:$28 sps:$4 sm:$0xff]   ;;  %v5158_v45 = vld [vmem:[%s6126_s1 + $0x5b0] ss:$28 sps:$4 sm:$0xff]   ;;  %v5164_v49 = vld [vmem:[%s6126_s1 + $0x5e8] ss:$28 sps:$4 sm:$0xff]  }
  0xaa   : > { %635 = vmatprep.subr.bf16.mxu0 %v4424_v54  ;;  %675 = vmatpush1.bf16.msra.mxu1 %v4417_v57  ;;  %v5155_v47 = vld [vmem:[%s6126_s1 + $0x230] ss:$28 sps:$4 sm:$0xff]   ;;  %v5172_v50 = vld [vmem:[%s6126_s1 + $0x624] ss:$28 sps:$4 sm:$0xff]   ;;  %v5178_v54 = vld [vmem:[%s6126_s1 + $0x65c] ss:$28 sps:$4 sm:$0xff]  }
  0xab   : > { %676 = vmatprep.subr.bf16.mxu1 %v4426_v58  ;;  %v5163_v48 = vld [vmem:[%s6126_s1 + $0x26c] ss:$28 sps:$4 sm:$0xff]   ;;  %v5169_v52 = vld [vmem:[%s6126_s1 + $0x2a4] ss:$28 sps:$4 sm:$0xff]   ;;  %v5175_v56 = vld [vmem:[%s6126_s1 + $0x2dc] ss:$28 sps:$4 sm:$0xff]  }
  0xac   : > { %v5161_v51 = vld [vmem:[%s6126_s1 + $0x268] ss:$28 sps:$4 sm:$0xff]   ;;  %v5170_v53 = vld [vmem:[%s6126_s1 + $0x620] ss:$28 sps:$4 sm:$0xff]   ;;  %v5176_v57 = vld [vmem:[%s6126_s1 + $0x658] ss:$28 sps:$4 sm:$0xff]  }
  0xad   : > { %636 = vmatpush1.bf16.msra.mxu0 %v4423_v60  ;;  %v5167_v55 = vld [vmem:[%s6126_s1 + $0x2a0] ss:$28 sps:$4 sm:$0xff]   ;;  %v5173_v58 = vld [vmem:[%s6126_s1 + $0x2d8] ss:$28 sps:$4 sm:$0xff]   ;;  %v5179_v61 = vld [vmem:[%s6126_s1 + $0x310] ss:$28 sps:$4 sm:$0xff]  }
  0xae   : > { %637 = vmatprep.subr.bf16.mxu0 %v4432_v62  ;;  %677 = vmatpush1.bf16.msra.mxu1 %v4425_v63  ;;  %v5181_v59 = vld [vmem:[%s6126_s1 + $0x314] ss:$28 sps:$4 sm:$0xff]   ;;  %v5187_v63 = vld [vmem:[%s6126_s1 + $0x34c] ss:$28 sps:$4 sm:$0xff]  }
  0xaf   : > { %678 = vmatprep.subr.bf16.mxu1 %v4434_v1  ;;  %v5184_v60 = vld [vmem:[%s6126_s1 + $0x694] ss:$28 sps:$4 sm:$0xff]   ;;  %v5190_v1 = vld [vmem:[%s6126_s1 + $0x6cc] ss:$28 sps:$4 sm:$0xff]  }
  0xb0   : > { %v5182_v62 = vld [vmem:[%s6126_s1 + $0x690] ss:$28 sps:$4 sm:$0xff]  }
  0xb1   : > { %638 = vmatpush1.bf16.msra.mxu0 %v4431_v0  ;;  %v5185_v0 = vld [vmem:[%s6126_s1 + $0x348] ss:$28 sps:$4 sm:$0xff]  }
  0xb2   : > { %3623 = vmatprep.subr.bf16.mxu0 %v5100_v2  ;;  %679 = vmatpush1.bf16.msra.mxu1 %v4433_v3  ;;  %v5188_v2 = vld [vmem:[%s6126_s1 + $0x6c8] ss:$28 sps:$4 sm:$0xff]  }
  0xb3   : > { %3582 = vmatprep.subr.bf16.mxu1 %v5097_v4  ;;  %v5193_v3 = vld [vmem:[%s6126_s1 + $0x704] ss:$28 sps:$4 sm:$0xff]   ;;  %v5196_v4 = vld [vmem:[%s6126_s1 + $0xc] ss:$28 sps:$4 sm:$0xff]  }
  0xb4   : > { %4437 = vmatmul.mubr.msk.bf16.vlgmr.msra.gmra.mrb[4].mxu0 %vm545_vm0, %v310_v42 }
  0xb5   : > { %3624 = vmatpush1.bf16.msra.mxu0 %v5098_v5  ;;  %4438 = vmatmul.mubr.msk.bf16.vlgmr.msra.gmra.mrb[4].mxu1 %vm545_vm0, %v310_v42  ;;  %v5160_v42 = vld [vmem:[%s6126_s1 + $0x5b4] ss:$28 sps:$4 sm:$0xff]   ;;  %v345_v5 = vlaneseq }
  0xb6   : > { %3625 = vmatprep.subr.bf16.mxu0 %v5106_v6  ;;  %3583 = vmatpush1.bf16.msra.mxu1 %v5095_v7  ;;  %v6211_v7 = vld [vmem:[#allocation4] sm:$0xff] }
  0xb7   : > { %3584 = vmatprep.subr.bf16.mxu1 %v5103_v8  ;;  %v6209_v6 = vshrl.u32 %v345_v5, 7  ;;  %v5224_v5 = vld [vmem:[%s6126_s1 + $0x120] ss:$28 sps:$4 sm:$0xff]  }
  0xb9   : > { %3626 = vmatpush1.bf16.msra.mxu0 %v5104_v9  ;;  %v347_v8 = vsub.s32 0, %v6209_v6  ;;  %v355_v9 = vsub.s32 2, %v6209_v6 }
  0xba   : > { %3627 = vmatprep.subr.bf16.mxu0 %v5112_v10  ;;  %3585 = vmatpush1.bf16.msra.mxu1 %v5101_v11  ;;  %v351_v10 = vsub.s32 1, %v6209_v6  ;;  %v359_v11 = vsub.s32 3, %v6209_v6 }
  0xbb   : > { %3586 = vmatprep.subr.bf16.mxu1 %v5109_v12  ;;  %v348_v12 = vrot.slane %v6211_v7, %v347_v8 }
  0xbd   : > { %3628 = vmatpush1.bf16.msra.mxu0 %v5110_v13  ;;  %v356_v13 = vrot.slane %v6211_v7, %v355_v9 }
  0xbe   : > { %3629 = vmatprep.subr.bf16.mxu0 %v5118_v14  ;;  %3587 = vmatpush1.bf16.msra.mxu1 %v5107_v15  ;;  %v352_v14 = vrot.slane %v6211_v7, %v351_v10  ;;  %v360_v15 = vrot.slane %v6211_v7, %v359_v11 }
  0xbf   : > { %3588 = vmatprep.subr.bf16.mxu1 %v5115_v16 }
  0xc1   : > { %3630 = vmatpush1.bf16.msra.mxu0 %v5116_v17 }
  0xc2   : > { %3631 = vmatprep.subr.bf16.mxu0 %v5124_v18  ;;  %3589 = vmatpush1.bf16.msra.mxu1 %v5113_v19 }
  0xc3   : > { %3590 = vmatprep.subr.bf16.mxu1 %v5121_v20 }
  0xc5   : > { %3632 = vmatpush1.bf16.msra.mxu0 %v5122_v22 }
  0xc6   : > { %3633 = vmatprep.subr.bf16.mxu0 %v5130_v23  ;;  %3591 = vmatpush1.bf16.msra.mxu1 %v5119_v21 }
  0xc7   : > { %3592 = vmatprep.subr.bf16.mxu1 %v5127_v24 }
  0xc9   : > { %3634 = vmatpush1.bf16.msra.mxu0 %v5128_v25 }
  0xca   : > { %3635 = vmatprep.subr.bf16.mxu0 %v5136_v26  ;;  %3593 = vmatpush1.bf16.msra.mxu1 %v5125_v27 }
  0xcb   : > { %3594 = vmatprep.subr.bf16.mxu1 %v5133_v28 }
  0xcd   : > { %3636 = vmatpush1.bf16.msra.mxu0 %v5134_v29 }
  0xce   : > { %3637 = vmatprep.subr.bf16.mxu0 %v5142_v30  ;;  %3595 = vmatpush1.bf16.msra.mxu1 %v5131_v31 }
  0xcf   : > { %3596 = vmatprep.subr.bf16.mxu1 %v5139_v32  ;;  %v5191_v32 = vld [vmem:[%s6126_s1 + $0x700] ss:$28 sps:$4 sm:$0xff]  }
  0xd1   : > { %3638 = vmatpush1.bf16.msra.mxu0 %v5140_v33  ;;  %v5194_v33 = vld [vmem:[%s6126_s1 + $0x8] ss:$28 sps:$4 sm:$0xff]  }
  0xd2   : > { %3639 = vmatprep.subr.bf16.mxu0 %v5148_v34  ;;  %3597 = vmatpush1.bf16.msra.mxu1 %v5137_v35  ;;  %v5199_v35 = vld [vmem:[%s6126_s1 + $0x73c] ss:$28 sps:$4 sm:$0xff]  }
  0xd3   : > { %3598 = vmatprep.subr.bf16.mxu1 %v5145_v36 }
  0xd5   : > { %3640 = vmatpush1.bf16.msra.mxu0 %v5146_v37 }
  0xd6   : > { %3641 = vmatprep.subr.bf16.mxu0 %v5154_v38  ;;  %3599 = vmatpush1.bf16.msra.mxu1 %v5143_v39  ;;  %v5200_v39 = vld [vmem:[%s6126_s1 + $0x40] ss:$28 sps:$4 sm:$0xff]  }
  0xd7   : > { %3600 = vmatprep.subr.bf16.mxu1 %v5151_v40  ;;  %v5202_v40 = vld [vmem:[%s6126_s1 + $0x44] ss:$28 sps:$4 sm:$0xff]  }
  0xd9   : > { %3642 = vmatpush1.bf16.msra.mxu0 %v5152_v41  ;;  %v5197_v41 = vld [vmem:[%s6126_s1 + $0x738] ss:$28 sps:$4 sm:$0xff]  }
  0xda   : > { %3643 = vmatprep.subr.bf16.mxu0 %v5160_v42  ;;  %3601 = vmatpush1.bf16.msra.mxu1 %v5149_v43  ;;  %v5208_v42 = vld [vmem:[%s6126_s1 + $0x7c] ss:$28 sps:$4 sm:$0xff]   ;;  %v367_v43 = vsub.s32 5, %v6209_v6 }
  0xdb   : > { %3602 = vmatprep.subr.bf16.mxu1 %v5157_v44  ;;  %v5205_v44 = vld [vmem:[%s6126_s1 + $0x774] ss:$28 sps:$4 sm:$0xff]  }
  0xdd   : > { %3644 = vmatpush1.bf16.msra.mxu0 %v5158_v45  ;;  %v5206_v45 = vld [vmem:[%s6126_s1 + $0x78] ss:$28 sps:$4 sm:$0xff]  }
  0xde   : > { %3645 = vmatprep.subr.bf16.mxu0 %v5166_v46  ;;  %3603 = vmatpush1.bf16.msra.mxu1 %v5155_v47  ;;  %v368_v46 = vrot.slane %v6211_v7, %v367_v43  ;;  %v5203_v47 = vld [vmem:[%s6126_s1 + $0x770] ss:$28 sps:$4 sm:$0xff]  }
  0xdf   : > { %3604 = vmatprep.subr.bf16.mxu1 %v5163_v48  ;;  %v5211_v48 = vld [vmem:[%s6126_s1 + $0x7ac] ss:$28 sps:$4 sm:$0xff]  }
  0xe1   : > { %3646 = vmatpush1.bf16.msra.mxu0 %v5164_v49  ;;  %v5214_v49 = vld [vmem:[%s6126_s1 + $0xb4] ss:$28 sps:$4 sm:$0xff]  }
  0xe2   : > { %3647 = vmatprep.subr.bf16.mxu0 %v5172_v50  ;;  %3605 = vmatpush1.bf16.msra.mxu1 %v5161_v51  ;;  %v5212_v50 = vld [vmem:[%s6126_s1 + $0xb0] ss:$28 sps:$4 sm:$0xff]  }
  0xe3   : > { %3606 = vmatprep.subr.bf16.mxu1 %v5169_v52  ;;  %v5209_v52 = vld [vmem:[%s6126_s1 + $0x7a8] ss:$28 sps:$4 sm:$0xff]  }
  0xe5   : > { %3648 = vmatpush1.bf16.msra.mxu0 %v5170_v53 }
  0xe6   : > { %3649 = vmatprep.subr.bf16.mxu0 %v5178_v54  ;;  %3607 = vmatpush1.bf16.msra.mxu1 %v5167_v55 }
  0xe7   : > { %3608 = vmatprep.subr.bf16.mxu1 %v5175_v56 }
  0xe9   : > { %3650 = vmatpush1.bf16.msra.mxu0 %v5176_v57  ;;  %v5220_v57 = vld [vmem:[%s6126_s1 + $0xec] ss:$28 sps:$4 sm:$0xff]  }
  0xea   : > { %3609 = vmatpush1.bf16.msra.mxu1 %v5173_v58  ;;  %3651 = vmatprep.subr.bf16.mxu0 %v5184_v60  ;;  %v5217_v60 = vld [vmem:[%s6126_s1 + $0x7e4] ss:$28 sps:$4 sm:$0xff]  }
  0xeb   : > { %3610 = vmatprep.subr.bf16.mxu1 %v5181_v59 }
  0xed   : > { %3652 = vmatpush1.bf16.msra.mxu0 %v5182_v62 }
  0xee   : > { %3611 = vmatpush1.bf16.msra.mxu1 %v5179_v61  ;;  %3653 = vmatprep.subr.bf16.mxu0 %v5190_v1 }
  0xef   : > { %3612 = vmatprep.subr.bf16.mxu1 %v5187_v63  ;;  %v5218_v63 = vld [vmem:[%s6126_s1 + $0xe8] ss:$28 sps:$4 sm:$0xff]  }
  0xf1   : > { %3654 = vmatpush1.bf16.msra.mxu0 %v5188_v2  ;;  %v5215_v2 = vld [vmem:[%s6126_s1 + $0x7e0] ss:$28 sps:$4 sm:$0xff]  }
  0xf2   : > { %3613 = vmatpush1.bf16.msra.mxu1 %v5185_v0  ;;  %3664 = vmatprep.subr.bf16.mxu0 %v5193_v3  ;;  %v5226_v3 = vld [vmem:[%s6126_s1 + $0x124] ss:$28 sps:$4 sm:$0xff]  }
  0xf3   : > { %3746 = vmatprep.subr.bf16.mxu1 %v5196_v4  ;;  %v5223_v4 = vld [vmem:[%s6126_s1 + $0x81c] ss:$28 sps:$4 sm:$0xff]  }
 0x177   : > { %v583_v16 = vpop.f32.mrb[0].mxu0  ;;  %v624_v18 = vpop.f32.mrb[0].mxu1 }
 0x178   : > { %v584_v17 = vadd.f32 %v583_v16, %v348_v12  ;;  %v585_v19 = vpop.f32.mrb[1].mxu0  ;;  %v625_v20 = vadd.f32 %v624_v18, %v356_v13  ;;  %v626_v22 = vpop.f32.mrb[1].mxu1  ;;  %v5221_v12 = vld [vmem:[%s6126_s1 + $0x818] ss:$28 sps:$4 sm:$0xff]   ;;  %v5227_v16 = vld [vmem:[%s6126_s1 + $0x850] ss:$28 sps:$4 sm:$0xff]  }
 0x179   : > { %v586_v21 = vadd.f32 %v585_v19, %v352_v14  ;;  %v587_v23 = vpop.f32.mrb[2].mxu0  ;;  %v627_v25 = vadd.f32 %v626_v22, %v360_v15  ;;  %v628_v26 = vpop.f32.mrb[2].mxu1  ;;  %v5232_v13 = vld [vmem:[%s6126_s1 + $0x15c] ss:$28 sps:$4 sm:$0xff]   ;;  %v5229_v14 = vld [vmem:[%s6126_s1 + $0x854] ss:$28 sps:$4 sm:$0xff]  }
 0x17a   : > { %v713_v24 = vmax.f32 %v584_v17, 0.0  ;;  %v588_v27 = vpop.f32.mrb[3].mxu0  ;;  %v715_v28 = vmax.f32 %v625_v20, 0.0  ;;  %v629_v30 = vpop.f32.mrb[3].mxu1  ;;  %v5230_v15 = vld [vmem:[%s6126_s1 + $0x158] ss:$28 sps:$4 sm:$0xff]  }
 0x17b   : > { %v714_v29 = vmax.f32 %v586_v21, 0.0  ;;  %v716_v31 = vmax.f32 %v627_v25, 0.0  ;;  %v5238_v17 = vld [vmem:[%s6126_s1 + $0x194] ss:$28 sps:$4 sm:$0xff]   ;;  %v5235_v18 = vld [vmem:[%s6126_s1 + $0x88c] ss:$28 sps:$4 sm:$0xff]  }
 0x17c   : > { %v6234_v36 = vpack.c.bf16 %v713_v24, %v713_v24  ;;  %v6238_v38 = vpack.c.bf16 %v715_v28, %v715_v28  ;;  %v5236_v19 = vld [vmem:[%s6126_s1 + $0x190] ss:$28 sps:$4 sm:$0xff]   ;;  %v5233_v20 = vld [vmem:[%s6126_s1 + $0x888] ss:$28 sps:$4 sm:$0xff]   ;;  %v5239_v24 = vld [vmem:[%s6126_s1 + $0x8c0] ss:$28 sps:$4 sm:$0xff]  }
 0x17d   : > { %v6231_v34 = vpack.c.bf16 %v714_v29, %v714_v29  ;;  %v6236_v37 = vpack.c.bf16 %v716_v31, %v716_v31  ;;  %v5244_v21 = vld [vmem:[%s6126_s1 + $0x1cc] ss:$28 sps:$4 sm:$0xff]   ;;  %v5241_v22 = vld [vmem:[%s6126_s1 + $0x8c4] ss:$28 sps:$4 sm:$0xff]   ;;  %v5247_v26 = vld [vmem:[%s6126_s1 + $0x8fc] ss:$28 sps:$4 sm:$0xff]  }
 0x17e   : > { %v5242_v23 = vld [vmem:[%s6126_s1 + $0x1c8] ss:$28 sps:$4 sm:$0xff]   ;;  %v5248_v27 = vld [vmem:[%s6126_s1 + $0x200] ss:$28 sps:$4 sm:$0xff]   ;;  %v5245_v28 = vld [vmem:[%s6126_s1 + $0x8f8] ss:$28 sps:$4 sm:$0xff]  }
 0x17f   : > { %3614 = vmatprep.mubr.bf16.mxu1 %v6231_v34  ;;  %3655 = vmatprep.mubr.bf16.mxu0 %v6236_v37  ;;  %v5250_v25 = vld [vmem:[%s6126_s1 + $0x204] ss:$28 sps:$4 sm:$0xff]   ;;  %v5256_v29 = vld [vmem:[%s6126_s1 + $0x23c] ss:$28 sps:$4 sm:$0xff]   ;;  %v5253_v30 = vld [vmem:[%s6126_s1 + $0x934] ss:$28 sps:$4 sm:$0xff]  }
 0x180   : > { %3615 = vmatmul.mubr.bf16.vlgmr.msra.gmra.mrb[8].mxu1 %v6234_v36  ;;  %3656 = vmatmul.mubr.bf16.vlgmr.msra.gmra.mrb[8].mxu0 %v6238_v38  ;;  %v5254_v31 = vld [vmem:[%s6126_s1 + $0x238] ss:$28 sps:$4 sm:$0xff]  }
 0x181   : > { %3747 = vmatpush1.bf16.msra.mxu1 %v5194_v33  ;;  %3665 = vmatpush1.bf16.msra.mxu0 %v5191_v32  ;;  %v5251_v32 = vld [vmem:[%s6126_s1 + $0x930] ss:$28 sps:$4 sm:$0xff]  }
 0x182   : > { %3778 = vmatprep.mubr.bf16.mxu1 %v6231_v34  ;;  %3666 = vmatprep.subr.bf16.mxu0 %v5199_v35  ;;  %v5262_v33 = vld [vmem:[%s6126_s1 + $0x274] ss:$28 sps:$4 sm:$0xff]   ;;  %v5259_v35 = vld [vmem:[%s6126_s1 + $0x96c] ss:$28 sps:$4 sm:$0xff]  }
 0x183   : > { %3748 = vmatprep.subr.bf16.mxu1 %v5202_v40  ;;  %v5257_v40 = vld [vmem:[%s6126_s1 + $0x968] ss:$28 sps:$4 sm:$0xff]  }
 0x185   : > { %3749 = vmatpush1.bf16.msra.mxu1 %v5200_v39  ;;  %3667 = vmatpush1.bf16.msra.mxu0 %v5197_v41  ;;  %v5260_v39 = vld [vmem:[%s6126_s1 + $0x270] ss:$28 sps:$4 sm:$0xff]  }
 0x186   : > { %3750 = vmatprep.subr.bf16.mxu1 %v5208_v42  ;;  %3668 = vmatprep.subr.bf16.mxu0 %v5205_v44  ;;  %v5268_v41 = vld [vmem:[%s6126_s1 + $0x2ac] ss:$28 sps:$4 sm:$0xff]   ;;  %v5265_v42 = vld [vmem:[%s6126_s1 + $0x9a4] ss:$28 sps:$4 sm:$0xff]  }
 0x187   : > { %v6259_v51 = vpop.f32.mrb[4].mxu0  ;;  %v5266_v44 = vld [vmem:[%s6126_s1 + $0x2a8] ss:$28 sps:$4 sm:$0xff]  }
 0x188   : > { %v667_v53 = vpop.f32.mrb[5].mxu0  ;;  %v6262_v56 = vpop.f32.mrb[4].mxu1 }
 0x189   : > { %3751 = vmatpush1.bf16.msra.mxu1 %v5206_v45  ;;  %v668_v54 = vadd.f32 %v667_v53, %v368_v46  ;;  %v669_v55 = vpop.f32.mrb[6].mxu0  ;;  %3669 = vmatpush1.bf16.msra.mxu0 %v5203_v47  ;;  %v6265_v59 = vpop.f32.mrb[5].mxu1  ;;  %v363_v45 = vsub.s32 4, %v6209_v6  ;;  %v5263_v46 = vld [vmem:[%s6126_s1 + $0x9a0] ss:$28 sps:$4 sm:$0xff]  }
 0x18a   : > { %3752 = vmatprep.subr.bf16.mxu1 %v5214_v49  ;;  %v670_v58 = vpop.f32.mrb[7].mxu0  ;;  %3670 = vmatprep.subr.bf16.mxu0 %v5211_v48  ;;  %v710_v62 = vpop.f32.mrb[6].mxu1  ;;  %v5274_v47 = vld [vmem:[%s6126_s1 + $0x2e4] ss:$28 sps:$4 sm:$0xff]   ;;  %v5271_v48 = vld [vmem:[%s6126_s1 + $0x9dc] ss:$28 sps:$4 sm:$0xff]  }
 0x18b   : > { %v718_v61 = vmax.f32 %v668_v54, 0.0  ;;  %v711_v1 = vpop.f32.mrb[7].mxu1  ;;  %v375_v49 = vsub.s32 7, %v6209_v6  ;;  %v5269_v53 = vld [vmem:[%s6126_s1 + $0x9d8] ss:$28 sps:$4 sm:$0xff]  }
 0x18c   : > { %v5280_v54 = vld [vmem:[%s6126_s1 + $0x31c] ss:$28 sps:$4 sm:$0xff]   ;;  %v5277_v55 = vld [vmem:[%s6126_s1 + $0xa14] ss:$28 sps:$4 sm:$0xff]  }
 0x18d   : > { %3753 = vmatpush1.bf16.msra.mxu1 %v5212_v50  ;;  %v6269_v0 = vpack.c.bf16 %v718_v61, %v718_v61  ;;  %3671 = vmatpush1.bf16.msra.mxu0 %v5209_v52  ;;  %v5272_v50 = vld [vmem:[%s6126_s1 + $0x2e0] ss:$28 sps:$4 sm:$0xff]   ;;  %v364_v52 = vrot.slane %v6211_v7, %v363_v45  ;;  %v5275_v61 = vld [vmem:[%s6126_s1 + $0xa10] ss:$28 sps:$4 sm:$0xff]  }
 0x18e   : > { %3754 = vmatprep.subr.bf16.mxu1 %v5220_v57  ;;  %3672 = vmatprep.subr.bf16.mxu0 %v5217_v60  ;;  %v376_v57 = vrot.slane %v6211_v7, %v375_v49  ;;  %v5278_v60 = vld [vmem:[%s6126_s1 + $0x318] ss:$28 sps:$4 sm:$0xff]   ;;  %v5329_v49 = vld [vmem:[%s6126_s1 + $0xc08] ss:$28 sps:$4 sm:$0xff]  }
 0x18f   : > { %3696 = vmatprep.mubr.bf16.mxu0 %v6269_v0  ;;  %v666_v58 = vadd.f32 %v6259_v51, %v364_v52  ;;  %v5286_v62 = vld [vmem:[%s6126_s1 + $0x354] ss:$28 sps:$4 sm:$0xff]   ;;  %v5281_v51 = vld [vmem:[%s6126_s1 + $0xa48] ss:$28 sps:$4 sm:$0xff]  }
 0x190   : > { %v709_v1 = vadd.f32 %v6265_v59, %v376_v57  ;;  %v5287_v59 = vld [vmem:[%s6126_s1 + $0xa80] ss:$28 sps:$4 sm:$0xff]  }
 0x191   : > { %3755 = vmatpush1.bf16.msra.mxu1 %v5218_v63  ;;  %3673 = vmatpush1.bf16.msra.mxu0 %v5215_v2  ;;  %v5283_v63 = vld [vmem:[%s6126_s1 + $0xa4c] ss:$28 sps:$4 sm:$0xff]   ;;  %v717_v2 = vmax.f32 %v666_v58, 0.0  ;;  %v5337_v52 = vld [vmem:[%s6126_s1 + $0xc44] ss:$28 sps:$4 sm:$0xff]  }
 0x192   : > { %3756 = vmatprep.subr.bf16.mxu1 %v5226_v3  ;;  %3674 = vmatprep.subr.bf16.mxu0 %v5223_v4  ;;  %v5284_v3 = vld [vmem:[%s6126_s1 + $0x350] ss:$28 sps:$4 sm:$0xff]   ;;  %v5343_v57 = vld [vmem:[%s6126_s1 + $0xc7c] ss:$28 sps:$4 sm:$0xff]  }
 0x193   : > { %v5292_v4 = vld [vmem:[%s6126_s1 + $0x38c] ss:$28 sps:$4 sm:$0xff]   ;;  %v5344_v58 = vld [vmem:[%s6126_s1 + $0x580] ss:$28 sps:$4 sm:$0xff]  }
 0x195   : > { %3757 = vmatpush1.bf16.msra.mxu1 %v5224_v5  ;;  %3675 = vmatpush1.bf16.msra.mxu0 %v5221_v12  ;;  %v5289_v5 = vld [vmem:[%s6126_s1 + $0xa84] ss:$28 sps:$4 sm:$0xff]   ;;  %v720_v12 = vmax.f32 %v709_v1, 0.0  ;;  %v5347_v1 = vld [vmem:[%s6126_s1 + $0xcb0] ss:$28 sps:$4 sm:$0xff]  }
 0x196   : > { %3758 = vmatprep.subr.bf16.mxu1 %v5232_v13  ;;  %3676 = vmatprep.subr.bf16.mxu0 %v5229_v14  ;;  %v6327_v13 = vpack.c.bf16 %v717_v2, %v717_v2  ;;  %v5290_v14 = vld [vmem:[%s6126_s1 + $0x388] ss:$28 sps:$4 sm:$0xff]   ;;  %v5358_v2 = vld [vmem:[%s6126_s1 + $0x5f4] ss:$28 sps:$4 sm:$0xff]  }
 0x199   : > { %3759 = vmatpush1.bf16.msra.mxu1 %v5230_v15  ;;  %3677 = vmatpush1.bf16.msra.mxu0 %v5227_v16  ;;  %v5295_v15 = vld [vmem:[%s6126_s1 + $0xabc] ss:$28 sps:$4 sm:$0xff]   ;;  %v5298_v16 = vld [vmem:[%s6126_s1 + $0x3c4] ss:$28 sps:$4 sm:$0xff]  }
 0x19a   : > { %3760 = vmatprep.subr.bf16.mxu1 %v5238_v17  ;;  %3678 = vmatprep.subr.bf16.mxu0 %v5235_v18  ;;  %v6334_v17 = vpack.c.bf16 %v720_v12, %v720_v12  ;;  %v5296_v18 = vld [vmem:[%s6126_s1 + $0x3c0] ss:$28 sps:$4 sm:$0xff]  }
 0x19b   : > { %v5361_v12 = vld [vmem:[%s6126_s1 + $0xd24] ss:$28 sps:$4 sm:$0xff]  }
 0x19d   : > { %3761 = vmatpush1.bf16.msra.mxu1 %v5236_v19  ;;  %3679 = vmatpush1.bf16.msra.mxu0 %v5233_v20  ;;  %v5293_v19 = vld [vmem:[%s6126_s1 + $0xab8] ss:$28 sps:$4 sm:$0xff]  }
 0x19e   : > { %3762 = vmatprep.subr.bf16.mxu1 %v5244_v21  ;;  %3680 = vmatprep.subr.bf16.mxu0 %v5241_v22  ;;  %v5304_v20 = vld [vmem:[%s6126_s1 + $0x3fc] ss:$28 sps:$4 sm:$0xff]   ;;  %v5301_v21 = vld [vmem:[%s6126_s1 + $0xaf4] ss:$28 sps:$4 sm:$0xff]  }
 0x19f   : > { %v5302_v22 = vld [vmem:[%s6126_s1 + $0x3f8] ss:$28 sps:$4 sm:$0xff]  }
 0x1a1   : > { %3763 = vmatpush1.bf16.msra.mxu1 %v5242_v23  ;;  %3681 = vmatpush1.bf16.msra.mxu0 %v5239_v24  ;;  %v5299_v23 = vld [vmem:[%s6126_s1 + $0xaf0] ss:$28 sps:$4 sm:$0xff]  }
 0x1a2   : > { %3764 = vmatprep.subr.bf16.mxu1 %v5250_v25  ;;  %3682 = vmatprep.subr.bf16.mxu0 %v5247_v26  ;;  %v5310_v24 = vld [vmem:[%s6126_s1 + $0x434] ss:$28 sps:$4 sm:$0xff]   ;;  %v5307_v25 = vld [vmem:[%s6126_s1 + $0xb2c] ss:$28 sps:$4 sm:$0xff]  }
 0x1a3   : > { %v5308_v26 = vld [vmem:[%s6126_s1 + $0x430] ss:$28 sps:$4 sm:$0xff]  }
 0x1a5   : > { %3765 = vmatpush1.bf16.msra.mxu1 %v5248_v27  ;;  %3683 = vmatpush1.bf16.msra.mxu0 %v5245_v28  ;;  %v5305_v27 = vld [vmem:[%s6126_s1 + $0xb28] ss:$28 sps:$4 sm:$0xff]  }
 0x1a6   : > { %3766 = vmatprep.subr.bf16.mxu1 %v5256_v29  ;;  %3684 = vmatprep.subr.bf16.mxu0 %v5253_v30  ;;  %v5316_v28 = vld [vmem:[%s6126_s1 + $0x46c] ss:$28 sps:$4 sm:$0xff]   ;;  %v5313_v29 = vld [vmem:[%s6126_s1 + $0xb64] ss:$28 sps:$4 sm:$0xff]  }
 0x1a7   : > { %v5314_v30 = vld [vmem:[%s6126_s1 + $0x468] ss:$28 sps:$4 sm:$0xff]  }
 0x1a9   : > { %3767 = vmatpush1.bf16.msra.mxu1 %v5254_v31  ;;  %3685 = vmatpush1.bf16.msra.mxu0 %v5251_v32  ;;  %v5311_v31 = vld [vmem:[%s6126_s1 + $0xb60] ss:$28 sps:$4 sm:$0xff]  }
 0x1aa   : > { %3768 = vmatprep.subr.bf16.mxu1 %v5262_v33  ;;  %3686 = vmatprep.subr.bf16.mxu0 %v5259_v35  ;;  %v5322_v32 = vld [vmem:[%s6126_s1 + $0x4a4] ss:$28 sps:$4 sm:$0xff]   ;;  %v5319_v33 = vld [vmem:[%s6126_s1 + $0xb9c] ss:$28 sps:$4 sm:$0xff]  }
 0x1ab   : > { %v5320_v35 = vld [vmem:[%s6126_s1 + $0x4a0] ss:$28 sps:$4 sm:$0xff]  }
 0x1ad   : > { %3769 = vmatpush1.bf16.msra.mxu1 %v5260_v39  ;;  %3687 = vmatpush1.bf16.msra.mxu0 %v5257_v40  ;;  %v5317_v39 = vld [vmem:[%s6126_s1 + $0xb98] ss:$28 sps:$4 sm:$0xff]  }
 0x1ae   : > { %3770 = vmatprep.subr.bf16.mxu1 %v5268_v41  ;;  %3688 = vmatprep.subr.bf16.mxu0 %v5265_v42  ;;  %v5328_v40 = vld [vmem:[%s6126_s1 + $0x4dc] ss:$28 sps:$4 sm:$0xff]   ;;  %v5325_v41 = vld [vmem:[%s6126_s1 + $0xbd4] ss:$28 sps:$4 sm:$0xff]  }
 0x1af   : > { %v5326_v42 = vld [vmem:[%s6126_s1 + $0x4d8] ss:$28 sps:$4 sm:$0xff]  }
 0x1b1   : > { %3771 = vmatpush1.bf16.msra.mxu1 %v5266_v44  ;;  %3689 = vmatpush1.bf16.msra.mxu0 %v5263_v46  ;;  %v5323_v44 = vld [vmem:[%s6126_s1 + $0xbd0] ss:$28 sps:$4 sm:$0xff]  }
 0x1b2   : > { %3772 = vmatprep.subr.bf16.mxu1 %v5274_v47  ;;  %3690 = vmatprep.subr.bf16.mxu0 %v5271_v48  ;;  %v5334_v46 = vld [vmem:[%s6126_s1 + $0x514] ss:$28 sps:$4 sm:$0xff]   ;;  %v5331_v47 = vld [vmem:[%s6126_s1 + $0xc0c] ss:$28 sps:$4 sm:$0xff]  }
 0x1b3   : > { %v5332_v48 = vld [vmem:[%s6126_s1 + $0x510] ss:$28 sps:$4 sm:$0xff]  }
 0x1b5   : > { %3773 = vmatpush1.bf16.msra.mxu1 %v5272_v50  ;;  %3691 = vmatpush1.bf16.msra.mxu0 %v5269_v53  ;;  %v5340_v50 = vld [vmem:[%s6126_s1 + $0x54c] ss:$28 sps:$4 sm:$0xff]  }
 0x1b6   : > { %3774 = vmatprep.subr.bf16.mxu1 %v5280_v54  ;;  %3692 = vmatprep.subr.bf16.mxu0 %v5277_v55  ;;  %v5338_v53 = vld [vmem:[%s6126_s1 + $0x548] ss:$28 sps:$4 sm:$0xff]   ;;  %v5335_v54 = vld [vmem:[%s6126_s1 + $0xc40] ss:$28 sps:$4 sm:$0xff]  }
 0x1b7   : > { %v5346_v55 = vld [vmem:[%s6126_s1 + $0x584] ss:$28 sps:$4 sm:$0xff]  }
 0x1b9   : > { %3775 = vmatpush1.bf16.msra.mxu1 %v5278_v60  ;;  %3693 = vmatpush1.bf16.msra.mxu0 %v5275_v61  ;;  %v5341_v60 = vld [vmem:[%s6126_s1 + $0xc78] ss:$28 sps:$4 sm:$0xff]  }
 0x1ba   : > { %3776 = vmatprep.subr.bf16.mxu1 %v5286_v62  ;;  %3694 = vmatprep.subr.bf16.mxu0 %v5283_v63  ;;  %v5352_v61 = vld [vmem:[%s6126_s1 + $0x5bc] ss:$28 sps:$4 sm:$0xff]   ;;  %v5349_v62 = vld [vmem:[%s6126_s1 + $0xcb4] ss:$28 sps:$4 sm:$0xff]  }
 0x1bb   : > { %v5350_v63 = vld [vmem:[%s6126_s1 + $0x5b8] ss:$28 sps:$4 sm:$0xff]  }
 0x1bd   : > { %3777 = vmatpush1.bf16.msra.mxu1 %v5284_v3  ;;  %3695 = vmatpush1.bf16.msra.mxu0 %v5281_v51  ;;  %v5355_v3 = vld [vmem:[%s6126_s1 + $0xcec] ss:$28 sps:$4 sm:$0xff]  }
 0x1be   : > { %3787 = vmatprep.subr.bf16.mxu1 %v5292_v4  ;;  %3705 = vmatprep.subr.bf16.mxu0 %v5289_v5  ;;  %v5356_v51 = vld [vmem:[%s6126_s1 + $0x5f0] ss:$28 sps:$4 sm:$0xff]   ;;  %v5353_v4 = vld [vmem:[%s6126_s1 + $0xce8] ss:$28 sps:$4 sm:$0xff]  }
 0x1bf   : > { %v5364_v5 = vld [vmem:[%s6126_s1 + $0x62c] ss:$28 sps:$4 sm:$0xff]  }
 0x1c0   : > { %3779 = vmatmul.mubr.bf16.vlgmr.msra.gmra.mrb[12].mxu1 %v6234_v36  ;;  %3697 = vmatmul.mubr.bf16.vlgmr.msra.gmra.mrb[8].mxu0 %v6327_v13 }
 0x1c1   : > { %3788 = vmatpush1.bf16.msra.mxu1 %v5290_v14  ;;  %3706 = vmatpush1.bf16.msra.mxu0 %v5287_v59  ;;  %v5362_v14 = vld [vmem:[%s6126_s1 + $0x628] ss:$28 sps:$4 sm:$0xff]   ;;  %v371_v59 = vsub.s32 6, %v6209_v6 }
 0x1c2   : > { %3819 = vmatprep.mubr.bf16.mxu1 %v6236_v37  ;;  %3707 = vmatprep.subr.bf16.mxu0 %v5295_v15  ;;  %v5359_v15 = vld [vmem:[%s6126_s1 + $0xd20] ss:$28 sps:$4 sm:$0xff]  }
 0x1c3   : > { %3789 = vmatprep.subr.bf16.mxu1 %v5298_v16  ;;  %3737 = vmatprep.mubr.bf16.mxu0 %v6334_v17  ;;  %v5370_v16 = vld [vmem:[%s6126_s1 + $0x664] ss:$28 sps:$4 sm:$0xff]  }
 0x1c5   : > { %3790 = vmatpush1.bf16.msra.mxu1 %v5296_v18  ;;  %3708 = vmatpush1.bf16.msra.mxu0 %v5293_v19  ;;  %v5367_v18 = vld [vmem:[%s6126_s1 + $0xd5c] ss:$28 sps:$4 sm:$0xff]  }
 0x1c6   : > { %3791 = vmatprep.subr.bf16.mxu1 %v5304_v20  ;;  %3709 = vmatprep.subr.bf16.mxu0 %v5301_v21  ;;  %v5368_v19 = vld [vmem:[%s6126_s1 + $0x660] ss:$28 sps:$4 sm:$0xff]   ;;  %v372_v20 = vrot.slane %v6211_v7, %v371_v59  ;;  %v5365_v21 = vld [vmem:[%s6126_s1 + $0xd58] ss:$28 sps:$4 sm:$0xff]   ;;  %v5379_v7 = vld [vmem:[%s6126_s1 + $0xdcc] ss:$28 sps:$4 sm:$0xff]  }
 0x1c9   : > { %3792 = vmatpush1.bf16.msra.mxu1 %v5302_v22  ;;  %3710 = vmatpush1.bf16.msra.mxu0 %v5299_v23  ;;  %v5376_v22 = vld [vmem:[%s6126_s1 + $0x69c] ss:$28 sps:$4 sm:$0xff]   ;;  %v5373_v23 = vld [vmem:[%s6126_s1 + $0xd94] ss:$28 sps:$4 sm:$0xff]  }
 0x1ca   : > { %3793 = vmatprep.subr.bf16.mxu1 %v5310_v24  ;;  %3711 = vmatprep.subr.bf16.mxu0 %v5307_v25  ;;  %v707_v24 = vadd.f32 %v6262_v56, %v372_v20  ;;  %v5374_v25 = vld [vmem:[%s6126_s1 + $0x698] ss:$28 sps:$4 sm:$0xff]   ;;  %v5385_v56 = vld [vmem:[%s6126_s1 + $0x70c] ss:$28 sps:$4 sm:$0xff]   ;;  %v5439_v20 = vld [vmem:[%s6126_s1 + $0x904] ss:$28 sps:$4 sm:$0xff]  }
 0x1cd   : > { %3794 = vmatpush1.bf16.msra.mxu1 %v5308_v26  ;;  %3712 = vmatpush1.bf16.msra.mxu0 %v5305_v27  ;;  %v5371_v26 = vld [vmem:[%s6126_s1 + $0xd90] ss:$28 sps:$4 sm:$0xff]  }
 0x1ce   : > { %3795 = vmatprep.subr.bf16.mxu1 %v5316_v28  ;;  %3713 = vmatprep.subr.bf16.mxu0 %v5313_v29  ;;  %v5382_v27 = vld [vmem:[%s6126_s1 + $0x6d4] ss:$28 sps:$4 sm:$0xff]   ;;  %v719_v28 = vmax.f32 %v707_v24, 0.0  ;;  %v5445_v24 = vld [vmem:[%s6126_s1 + $0x93c] ss:$28 sps:$4 sm:$0xff]  }
 0x1cf   : > { %v5380_v29 = vld [vmem:[%s6126_s1 + $0x6d0] ss:$28 sps:$4 sm:$0xff]  }
 0x1d1   : > { %3796 = vmatpush1.bf16.msra.mxu1 %v5314_v30  ;;  %3714 = vmatpush1.bf16.msra.mxu0 %v5311_v31  ;;  %v5377_v30 = vld [vmem:[%s6126_s1 + $0xdc8] ss:$28 sps:$4 sm:$0xff]   ;;  %v5388_v31 = vld [vmem:[%s6126_s1 + $0x14] ss:$28 sps:$4 sm:$0xff]  }
 0x1d2   : > { %3797 = vmatprep.subr.bf16.mxu1 %v5322_v32  ;;  %3715 = vmatprep.subr.bf16.mxu0 %v5319_v33  ;;  %v6404_v32 = vpack.c.bf16 %v719_v28, %v719_v28  ;;  %v5383_v33 = vld [vmem:[%s6126_s1 + $0x708] ss:$28 sps:$4 sm:$0xff]   ;;  %v5454_v28 = vld [vmem:[%s6126_s1 + $0x27c] ss:$28 sps:$4 sm:$0xff]  }
 0x1d5   : > { %3798 = vmatpush1.bf16.msra.mxu1 %v5320_v35  ;;  %3716 = vmatpush1.bf16.msra.mxu0 %v5317_v39  ;;  %v5386_v35 = vld [vmem:[%s6126_s1 + $0x10] ss:$28 sps:$4 sm:$0xff]   ;;  %v5391_v39 = vld [vmem:[%s6126_s1 + $0x744] ss:$28 sps:$4 sm:$0xff]  }
 0x1d6   : > { %3799 = vmatprep.subr.bf16.mxu1 %v5328_v40  ;;  %3717 = vmatprep.subr.bf16.mxu0 %v5325_v41  ;;  %v5394_v40 = vld [vmem:[%s6126_s1 + $0x4c] ss:$28 sps:$4 sm:$0xff]   ;;  %v5389_v41 = vld [vmem:[%s6126_s1 + $0x740] ss:$28 sps:$4 sm:$0xff]  }
 0x1d9   : > { %3800 = vmatpush1.bf16.msra.mxu1 %v5326_v42  ;;  %3718 = vmatpush1.bf16.msra.mxu0 %v5323_v44  ;;  %v5392_v42 = vld [vmem:[%s6126_s1 + $0x48] ss:$28 sps:$4 sm:$0xff]   ;;  %v5397_v44 = vld [vmem:[%s6126_s1 + $0x77c] ss:$28 sps:$4 sm:$0xff]  }
 0x1da   : > { %3801 = vmatprep.subr.bf16.mxu1 %v5334_v46  ;;  %3719 = vmatprep.subr.bf16.mxu0 %v5331_v47  ;;  %v5400_v46 = vld [vmem:[%s6126_s1 + $0x84] ss:$28 sps:$4 sm:$0xff]   ;;  %v5395_v47 = vld [vmem:[%s6126_s1 + $0x778] ss:$28 sps:$4 sm:$0xff]  }
 0x1dd   : > { %3802 = vmatpush1.bf16.msra.mxu1 %v5332_v48  ;;  %3720 = vmatpush1.bf16.msra.mxu0 %v5329_v49  ;;  %v5398_v48 = vld [vmem:[%s6126_s1 + $0x80] ss:$28 sps:$4 sm:$0xff]   ;;  %v5403_v49 = vld [vmem:[%s6126_s1 + $0x7b4] ss:$28 sps:$4 sm:$0xff]  }
 0x1de   : > { %3803 = vmatprep.subr.bf16.mxu1 %v5340_v50  ;;  %3721 = vmatprep.subr.bf16.mxu0 %v5337_v52  ;;  %v5406_v50 = vld [vmem:[%s6126_s1 + $0xbc] ss:$28 sps:$4 sm:$0xff]   ;;  %v5401_v52 = vld [vmem:[%s6126_s1 + $0x7b0] ss:$28 sps:$4 sm:$0xff]  }
 0x1e1   : > { %3804 = vmatpush1.bf16.msra.mxu1 %v5338_v53  ;;  %3722 = vmatpush1.bf16.msra.mxu0 %v5335_v54  ;;  %v5404_v53 = vld [vmem:[%s6126_s1 + $0xb8] ss:$28 sps:$4 sm:$0xff]   ;;  %v5409_v54 = vld [vmem:[%s6126_s1 + $0x7ec] ss:$28 sps:$4 sm:$0xff]  }
 0x1e2   : > { %3805 = vmatprep.subr.bf16.mxu1 %v5346_v55  ;;  %3723 = vmatprep.subr.bf16.mxu0 %v5343_v57  ;;  %v5412_v55 = vld [vmem:[%s6126_s1 + $0xf4] ss:$28 sps:$4 sm:$0xff]   ;;  %v5407_v57 = vld [vmem:[%s6126_s1 + $0x7e8] ss:$28 sps:$4 sm:$0xff]  }
 0x1e5   : > { %3806 = vmatpush1.bf16.msra.mxu1 %v5344_v58  ;;  %3724 = vmatpush1.bf16.msra.mxu0 %v5341_v60  ;;  %v5410_v58 = vld [vmem:[%s6126_s1 + $0xf0] ss:$28 sps:$4 sm:$0xff]   ;;  %v5415_v60 = vld [vmem:[%s6126_s1 + $0x824] ss:$28 sps:$4 sm:$0xff]  }
 0x1e6   : > { %3807 = vmatprep.subr.bf16.mxu1 %v5352_v61  ;;  %3725 = vmatprep.subr.bf16.mxu0 %v5349_v62  ;;  %v5418_v61 = vld [vmem:[%s6126_s1 + $0x12c] ss:$28 sps:$4 sm:$0xff]   ;;  %v5413_v62 = vld [vmem:[%s6126_s1 + $0x820] ss:$28 sps:$4 sm:$0xff]  }
 0x1e9   : > { %3808 = vmatpush1.bf16.msra.mxu1 %v5350_v63  ;;  %3726 = vmatpush1.bf16.msra.mxu0 %v5347_v1  ;;  %v5416_v63 = vld [vmem:[%s6126_s1 + $0x128] ss:$28 sps:$4 sm:$0xff]   ;;  %v5421_v1 = vld [vmem:[%s6126_s1 + $0x85c] ss:$28 sps:$4 sm:$0xff]  }
 0x1ea   : > { %3809 = vmatprep.subr.bf16.mxu1 %v5358_v2  ;;  %3727 = vmatprep.subr.bf16.mxu0 %v5355_v3  ;;  %v5424_v2 = vld [vmem:[%s6126_s1 + $0x164] ss:$28 sps:$4 sm:$0xff]   ;;  %v5419_v3 = vld [vmem:[%s6126_s1 + $0x858] ss:$28 sps:$4 sm:$0xff]  }
 0x1ed   : > { %3810 = vmatpush1.bf16.msra.mxu1 %v5356_v51  ;;  %3728 = vmatpush1.bf16.msra.mxu0 %v5353_v4  ;;  %v5422_v51 = vld [vmem:[%s6126_s1 + $0x160] ss:$28 sps:$4 sm:$0xff]   ;;  %v5427_v4 = vld [vmem:[%s6126_s1 + $0x894] ss:$28 sps:$4 sm:$0xff]  }
 0x1ee   : > { %3811 = vmatprep.subr.bf16.mxu1 %v5364_v5  ;;  %3729 = vmatprep.subr.bf16.mxu0 %v5361_v12  ;;  %v5430_v5 = vld [vmem:[%s6126_s1 + $0x19c] ss:$28 sps:$4 sm:$0xff]   ;;  %v5425_v12 = vld [vmem:[%s6126_s1 + $0x890] ss:$28 sps:$4 sm:$0xff]  }
 0x1f1   : > { %3812 = vmatpush1.bf16.msra.mxu1 %v5362_v14  ;;  %3730 = vmatpush1.bf16.msra.mxu0 %v5359_v15  ;;  %v5428_v14 = vld [vmem:[%s6126_s1 + $0x198] ss:$28 sps:$4 sm:$0xff]   ;;  %v5433_v15 = vld [vmem:[%s6126_s1 + $0x8cc] ss:$28 sps:$4 sm:$0xff]  }
 0x1f2   : > { %3813 = vmatprep.subr.bf16.mxu1 %v5370_v16  ;;  %3731 = vmatprep.subr.bf16.mxu0 %v5367_v18  ;;  %v5436_v16 = vld [vmem:[%s6126_s1 + $0x1d4] ss:$28 sps:$4 sm:$0xff]   ;;  %v5431_v18 = vld [vmem:[%s6126_s1 + $0x8c8] ss:$28 sps:$4 sm:$0xff]  }
 0x1f5   : > { %3814 = vmatpush1.bf16.msra.mxu1 %v5368_v19  ;;  %3732 = vmatpush1.bf16.msra.mxu0 %v5365_v21  ;;  %v5434_v19 = vld [vmem:[%s6126_s1 + $0x1d0] ss:$28 sps:$4 sm:$0xff]  }
 0x1f6   : > { %3815 = vmatprep.subr.bf16.mxu1 %v5376_v22  ;;  %3733 = vmatprep.subr.bf16.mxu0 %v5373_v23  ;;  %v5442_v21 = vld [vmem:[%s6126_s1 + $0x20c] ss:$28 sps:$4 sm:$0xff]   ;;  %v5437_v22 = vld [vmem:[%s6126_s1 + $0x900] ss:$28 sps:$4 sm:$0xff]  }
 0x1f7   : > { %v5440_v23 = vld [vmem:[%s6126_s1 + $0x208] ss:$28 sps:$4 sm:$0xff]  }
 0x1f9   : > { %3816 = vmatpush1.bf16.msra.mxu1 %v5374_v25  ;;  %3734 = vmatpush1.bf16.msra.mxu0 %v5371_v26  ;;  %v5448_v25 = vld [vmem:[%s6126_s1 + $0x244] ss:$28 sps:$4 sm:$0xff]   ;;  %v5443_v26 = vld [vmem:[%s6126_s1 + $0x938] ss:$28 sps:$4 sm:$0xff]  }
 0x1fa   : > { %3817 = vmatprep.subr.bf16.mxu1 %v5382_v27  ;;  %3735 = vmatprep.subr.bf16.mxu0 %v5379_v7  ;;  %v5446_v27 = vld [vmem:[%s6126_s1 + $0x240] ss:$28 sps:$4 sm:$0xff]   ;;  %v5451_v7 = vld [vmem:[%s6126_s1 + $0x974] ss:$28 sps:$4 sm:$0xff]  }
 0x1fd   : > { %3818 = vmatpush1.bf16.msra.mxu1 %v5380_v29  ;;  %3736 = vmatpush1.bf16.msra.mxu0 %v5377_v30  ;;  %v5449_v29 = vld [vmem:[%s6126_s1 + $0x970] ss:$28 sps:$4 sm:$0xff]   ;;  %v5452_v30 = vld [vmem:[%s6126_s1 + $0x278] ss:$28 sps:$4 sm:$0xff]  }
 0x1fe   : > { %3828 = vmatprep.subr.bf16.mxu1 %v5385_v56  ;;  %3910 = vmatprep.subr.bf16.mxu0 %v5388_v31  ;;  %v5457_v56 = vld [vmem:[%s6126_s1 + $0x9ac] ss:$28 sps:$4 sm:$0xff]   ;;  %v5460_v31 = vld [vmem:[%s6126_s1 + $0x2b4] ss:$28 sps:$4 sm:$0xff]  }
 0x200   : > { %3820 = vmatmul.mubr.bf16.vlgmr.msra.gmra.mrb[12].mxu1 %v6238_v38  ;;  %3738 = vmatmul.mubr.bf16.vlgmr.msra.gmra.mrb[8].mxu0 %v6404_v32 }
 0x201   : > { %3829 = vmatpush1.bf16.msra.mxu1 %v5383_v33  ;;  %3860 = vmatprep.mubr.bf16.mxu1 %v6269_v0  ;;  %v5455_v33 = vld [vmem:[%s6126_s1 + $0x9a8] ss:$28 sps:$4 sm:$0xff]  }
 0x202   : > { %3911 = vmatpush1.bf16.msra.mxu0 %v5386_v35  ;;  %3942 = vmatprep.mubr.bf16.mxu0 %v6231_v34  ;;  %v5458_v35 = vld [vmem:[%s6126_s1 + $0x2b0] ss:$28 sps:$4 sm:$0xff]  }
 0x203   : > { %3830 = vmatprep.subr.bf16.mxu1 %v5391_v39  ;;  %3912 = vmatprep.subr.bf16.mxu0 %v5394_v40  ;;  %v5463_v39 = vld [vmem:[%s6126_s1 + $0x9e4] ss:$28 sps:$4 sm:$0xff]   ;;  %v5466_v40 = vld [vmem:[%s6126_s1 + $0x2ec] ss:$28 sps:$4 sm:$0xff]  }
 0x205   : > { %3831 = vmatpush1.bf16.msra.mxu1 %v5389_v41  ;;  %v5461_v41 = vld [vmem:[%s6126_s1 + $0x9e0] ss:$28 sps:$4 sm:$0xff]  }
 0x206   : > { %3913 = vmatpush1.bf16.msra.mxu0 %v5392_v42  ;;  %3832 = vmatprep.subr.bf16.mxu1 %v5397_v44  ;;  %v5464_v42 = vld [vmem:[%s6126_s1 + $0x2e8] ss:$28 sps:$4 sm:$0xff]   ;;  %v5469_v44 = vld [vmem:[%s6126_s1 + $0xa1c] ss:$28 sps:$4 sm:$0xff]  }
 0x207   : > { %3914 = vmatprep.subr.bf16.mxu0 %v5400_v46  ;;  %v5472_v46 = vld [vmem:[%s6126_s1 + $0x324] ss:$28 sps:$4 sm:$0xff]  }
 0x209   : > { %3833 = vmatpush1.bf16.msra.mxu1 %v5395_v47  ;;  %v5467_v47 = vld [vmem:[%s6126_s1 + $0xa18] ss:$28 sps:$4 sm:$0xff]  }
 0x20a   : > { %3915 = vmatpush1.bf16.msra.mxu0 %v5398_v48  ;;  %3834 = vmatprep.subr.bf16.mxu1 %v5403_v49  ;;  %v5470_v48 = vld [vmem:[%s6126_s1 + $0x320] ss:$28 sps:$4 sm:$0xff]   ;;  %v5475_v49 = vld [vmem:[%s6126_s1 + $0xa54] ss:$28 sps:$4 sm:$0xff]  }
 0x20b   : > { %3916 = vmatprep.subr.bf16.mxu0 %v5406_v50  ;;  %v5478_v50 = vld [vmem:[%s6126_s1 + $0x35c] ss:$28 sps:$4 sm:$0xff]  }
 0x20d   : > { %3835 = vmatpush1.bf16.msra.mxu1 %v5401_v52  ;;  %v5473_v52 = vld [vmem:[%s6126_s1 + $0xa50] ss:$28 sps:$4 sm:$0xff]  }
 0x20e   : > { %3917 = vmatpush1.bf16.msra.mxu0 %v5404_v53  ;;  %3836 = vmatprep.subr.bf16.mxu1 %v5409_v54  ;;  %v5476_v53 = vld [vmem:[%s6126_s1 + $0x358] ss:$28 sps:$4 sm:$0xff]   ;;  %v5481_v54 = vld [vmem:[%s6126_s1 + $0xa8c] ss:$28 sps:$4 sm:$0xff]  }
 0x20f   : > { %3918 = vmatprep.subr.bf16.mxu0 %v5412_v55  ;;  %v5484_v55 = vld [vmem:[%s6126_s1 + $0x394] ss:$28 sps:$4 sm:$0xff]  }
 0x211   : > { %3837 = vmatpush1.bf16.msra.mxu1 %v5407_v57  ;;  %v5479_v57 = vld [vmem:[%s6126_s1 + $0xa88] ss:$28 sps:$4 sm:$0xff]  }
 0x212   : > { %3919 = vmatpush1.bf16.msra.mxu0 %v5410_v58  ;;  %3838 = vmatprep.subr.bf16.mxu1 %v5415_v60  ;;  %v5482_v58 = vld [vmem:[%s6126_s1 + $0x390] ss:$28 sps:$4 sm:$0xff]   ;;  %v5487_v60 = vld [vmem:[%s6126_s1 + $0xac4] ss:$28 sps:$4 sm:$0xff]  }
 0x213   : > { %3920 = vmatprep.subr.bf16.mxu0 %v5418_v61  ;;  %v5490_v61 = vld [vmem:[%s6126_s1 + $0x3cc] ss:$28 sps:$4 sm:$0xff]  }
 0x215   : > { %3839 = vmatpush1.bf16.msra.mxu1 %v5413_v62  ;;  %v5485_v62 = vld [vmem:[%s6126_s1 + $0xac0] ss:$28 sps:$4 sm:$0xff]  }
 0x216   : > { %3921 = vmatpush1.bf16.msra.mxu0 %v5416_v63  ;;  %3840 = vmatprep.subr.bf16.mxu1 %v5421_v1  ;;  %v5488_v63 = vld [vmem:[%s6126_s1 + $0x3c8] ss:$28 sps:$4 sm:$0xff]   ;;  %v5493_v1 = vld [vmem:[%s6126_s1 + $0xafc] ss:$28 sps:$4 sm:$0xff]  }
 0x217   : > { %3922 = vmatprep.subr.bf16.mxu0 %v5424_v2  ;;  %v5496_v2 = vld [vmem:[%s6126_s1 + $0x404] ss:$28 sps:$4 sm:$0xff]  }
 0x219   : > { %3841 = vmatpush1.bf16.msra.mxu1 %v5419_v3  ;;  %v5491_v3 = vld [vmem:[%s6126_s1 + $0xaf8] ss:$28 sps:$4 sm:$0xff]  }
 0x21a   : > { %3923 = vmatpush1.bf16.msra.mxu0 %v5422_v51  ;;  %3842 = vmatprep.subr.bf16.mxu1 %v5427_v4  ;;  %v5494_v51 = vld [vmem:[%s6126_s1 + $0x400] ss:$28 sps:$4 sm:$0xff]   ;;  %v5499_v4 = vld [vmem:[%s6126_s1 + $0xb34] ss:$28 sps:$4 sm:$0xff]  }
 0x21b   : > { %3924 = vmatprep.subr.bf16.mxu0 %v5430_v5  ;;  %v5502_v5 = vld [vmem:[%s6126_s1 + $0x43c] ss:$28 sps:$4 sm:$0xff]  }
 0x21d   : > { %3843 = vmatpush1.bf16.msra.mxu1 %v5425_v12  ;;  %v5497_v12 = vld [vmem:[%s6126_s1 + $0xb30] ss:$28 sps:$4 sm:$0xff]  }
 0x21e   : > { %3925 = vmatpush1.bf16.msra.mxu0 %v5428_v14  ;;  %3844 = vmatprep.subr.bf16.mxu1 %v5433_v15  ;;  %v5500_v14 = vld [vmem:[%s6126_s1 + $0x438] ss:$28 sps:$4 sm:$0xff]   ;;  %v5505_v15 = vld [vmem:[%s6126_s1 + $0xb6c] ss:$28 sps:$4 sm:$0xff]  }
 0x21f   : > { %3926 = vmatprep.subr.bf16.mxu0 %v5436_v16  ;;  %v5508_v16 = vld [vmem:[%s6126_s1 + $0x474] ss:$28 sps:$4 sm:$0xff]  }
 0x221   : > { %3845 = vmatpush1.bf16.msra.mxu1 %v5431_v18  ;;  %v5503_v18 = vld [vmem:[%s6126_s1 + $0xb68] ss:$28 sps:$4 sm:$0xff]  }
 0x222   : > { %3927 = vmatpush1.bf16.msra.mxu0 %v5434_v19  ;;  %3846 = vmatprep.subr.bf16.mxu1 %v5439_v20  ;;  %v5506_v19 = vld [vmem:[%s6126_s1 + $0x470] ss:$28 sps:$4 sm:$0xff]   ;;  %v5511_v20 = vld [vmem:[%s6126_s1 + $0xba4] ss:$28 sps:$4 sm:$0xff]  }
 0x223   : > { %3928 = vmatprep.subr.bf16.mxu0 %v5442_v21  ;;  %v5514_v21 = vld [vmem:[%s6126_s1 + $0x4ac] ss:$28 sps:$4 sm:$0xff]  }
 0x225   : > { %3847 = vmatpush1.bf16.msra.mxu1 %v5437_v22  ;;  %v5509_v22 = vld [vmem:[%s6126_s1 + $0xba0] ss:$28 sps:$4 sm:$0xff]  }
 0x226   : > { %3929 = vmatpush1.bf16.msra.mxu0 %v5440_v23  ;;  %3848 = vmatprep.subr.bf16.mxu1 %v5445_v24  ;;  %v5512_v23 = vld [vmem:[%s6126_s1 + $0x4a8] ss:$28 sps:$4 sm:$0xff]   ;;  %v5517_v24 = vld [vmem:[%s6126_s1 + $0xbdc] ss:$28 sps:$4 sm:$0xff]  }
 0x227   : > { %3930 = vmatprep.subr.bf16.mxu0 %v5448_v25 }
 0x229   : > { %3849 = vmatpush1.bf16.msra.mxu1 %v5443_v26  ;;  %v5520_v26 = vld [vmem:[%s6126_s1 + $0x4e4] ss:$28 sps:$4 sm:$0xff]  }
 0x22a   : > { %3931 = vmatpush1.bf16.msra.mxu0 %v5446_v27  ;;  %3850 = vmatprep.subr.bf16.mxu1 %v5451_v7 }
 0x22b   : > { %3932 = vmatprep.subr.bf16.mxu0 %v5454_v28  ;;  %v5515_v28 = vld [vmem:[%s6126_s1 + $0xbd8] ss:$28 sps:$4 sm:$0xff]  }
 0x22d   : > { %3851 = vmatpush1.bf16.msra.mxu1 %v5449_v29 }
 0x22e   : > { %3933 = vmatpush1.bf16.msra.mxu0 %v5452_v30  ;;  %3852 = vmatprep.subr.bf16.mxu1 %v5457_v56  ;;  %v5518_v30 = vld [vmem:[%s6126_s1 + $0x4e0] ss:$28 sps:$4 sm:$0xff]   ;;  %v5523_v56 = vld [vmem:[%s6126_s1 + $0xc14] ss:$28 sps:$4 sm:$0xff]  }
 0x22f   : > { %3934 = vmatprep.subr.bf16.mxu0 %v5460_v31  ;;  %v5526_v31 = vld [vmem:[%s6126_s1 + $0x51c] ss:$28 sps:$4 sm:$0xff]  }
 0x231   : > { %3853 = vmatpush1.bf16.msra.mxu1 %v5455_v33  ;;  %v5521_v33 = vld [vmem:[%s6126_s1 + $0xc10] ss:$28 sps:$4 sm:$0xff]  }
 0x232   : > { %3935 = vmatpush1.bf16.msra.mxu0 %v5458_v35  ;;  %3854 = vmatprep.subr.bf16.mxu1 %v5463_v39  ;;  %v5524_v35 = vld [vmem:[%s6126_s1 + $0x518] ss:$28 sps:$4 sm:$0xff]   ;;  %v5529_v39 = vld [vmem:[%s6126_s1 + $0xc4c] ss:$28 sps:$4 sm:$0xff]  }
 0x233   : > { %3936 = vmatprep.subr.bf16.mxu0 %v5466_v40  ;;  %v5532_v40 = vld [vmem:[%s6126_s1 + $0x554] ss:$28 sps:$4 sm:$0xff]  }
 0x235   : > { %3855 = vmatpush1.bf16.msra.mxu1 %v5461_v41  ;;  %v5527_v41 = vld [vmem:[%s6126_s1 + $0xc48] ss:$28 sps:$4 sm:$0xff]  }
 0x236   : > { %3937 = vmatpush1.bf16.msra.mxu0 %v5464_v42  ;;  %3856 = vmatprep.subr.bf16.mxu1 %v5469_v44  ;;  %v5530_v42 = vld [vmem:[%s6126_s1 + $0x550] ss:$28 sps:$4 sm:$0xff]   ;;  %v5535_v44 = vld [vmem:[%s6126_s1 + $0xc84] ss:$28 sps:$4 sm:$0xff]  }
 0x237   : > { %3938 = vmatprep.subr.bf16.mxu0 %v5472_v46  ;;  %v5538_v46 = vld [vmem:[%s6126_s1 + $0x58c] ss:$28 sps:$4 sm:$0xff]  }
 0x239   : > { %3857 = vmatpush1.bf16.msra.mxu1 %v5467_v47  ;;  %v5533_v47 = vld [vmem:[%s6126_s1 + $0xc80] ss:$28 sps:$4 sm:$0xff]  }
 0x23a   : > { %3939 = vmatpush1.bf16.msra.mxu0 %v5470_v48  ;;  %3858 = vmatprep.subr.bf16.mxu1 %v5475_v49  ;;  %v5536_v48 = vld [vmem:[%s6126_s1 + $0x588] ss:$28 sps:$4 sm:$0xff]   ;;  %v5541_v49 = vld [vmem:[%s6126_s1 + $0xcbc] ss:$28 sps:$4 sm:$0xff]  }
 0x23b   : > { %3940 = vmatprep.subr.bf16.mxu0 %v5478_v50  ;;  %v5544_v50 = vld [vmem:[%s6126_s1 + $0x5c4] ss:$28 sps:$4 sm:$0xff]  }
 0x23d   : > { %3859 = vmatpush1.bf16.msra.mxu1 %v5473_v52  ;;  %v5539_v52 = vld [vmem:[%s6126_s1 + $0xcb8] ss:$28 sps:$4 sm:$0xff]  }
 0x23e   : > { %3941 = vmatpush1.bf16.msra.mxu0 %v5476_v53  ;;  %3869 = vmatprep.subr.bf16.mxu1 %v5481_v54  ;;  %v5542_v53 = vld [vmem:[%s6126_s1 + $0x5c0] ss:$28 sps:$4 sm:$0xff]   ;;  %v5547_v54 = vld [vmem:[%s6126_s1 + $0xcf4] ss:$28 sps:$4 sm:$0xff]  }
 0x23f   : > { %3951 = vmatprep.subr.bf16.mxu0 %v5484_v55  ;;  %v5550_v55 = vld [vmem:[%s6126_s1 + $0x5fc] ss:$28 sps:$4 sm:$0xff]  }
 0x240   : > { %3861 = vmatmul.mubr.bf16.vlgmr.msra.gmra.mrb[12].mxu1 %v6327_v13 }
 0x241   : > { %3943 = vmatmul.mubr.bf16.vlgmr.msra.gmra.mrb[12].mxu0 %v6234_v36  ;;  %3870 = vmatpush1.bf16.msra.mxu1 %v5479_v57  ;;  %v5545_v57 = vld [vmem:[%s6126_s1 + $0xcf0] ss:$28 sps:$4 sm:$0xff]  }
 0x242   : > { %3901 = vmatprep.mubr.bf16.mxu1 %v6334_v17  ;;  %3952 = vmatpush1.bf16.msra.mxu0 %v5482_v58  ;;  %v5548_v58 = vld [vmem:[%s6126_s1 + $0x5f8] ss:$28 sps:$4 sm:$0xff]  }
 0x243   : > { %3983 = vmatprep.mubr.bf16.mxu0 %v6236_v37  ;;  %3871 = vmatprep.subr.bf16.mxu1 %v5487_v60  ;;  %v5553_v60 = vld [vmem:[%s6126_s1 + $0xd2c] ss:$28 sps:$4 sm:$0xff]  }
 0x244   : > { %3953 = vmatprep.subr.bf16.mxu0 %v5490_v61  ;;  %v5556_v61 = vld [vmem:[%s6126_s1 + $0x634] ss:$28 sps:$4 sm:$0xff]  }
 0x245   : > { %3872 = vmatpush1.bf16.msra.mxu1 %v5485_v62  ;;  %v5551_v62 = vld [vmem:[%s6126_s1 + $0xd28] ss:$28 sps:$4 sm:$0xff]  }
 0x246   : > { %3954 = vmatpush1.bf16.msra.mxu0 %v5488_v63  ;;  %3873 = vmatprep.subr.bf16.mxu1 %v5493_v1  ;;  %v5554_v63 = vld [vmem:[%s6126_s1 + $0x630] ss:$28 sps:$4 sm:$0xff]   ;;  %v5559_v1 = vld [vmem:[%s6126_s1 + $0xd64] ss:$28 sps:$4 sm:$0xff]  }
 0x247   : > { %3955 = vmatprep.subr.bf16.mxu0 %v5496_v2  ;;  %v5562_v2 = vld [vmem:[%s6126_s1 + $0x66c] ss:$28 sps:$4 sm:$0xff]  }
 0x249   : > { %3874 = vmatpush1.bf16.msra.mxu1 %v5491_v3  ;;  %v5557_v3 = vld [vmem:[%s6126_s1 + $0xd60] ss:$28 sps:$4 sm:$0xff]  }
 0x24a   : > { %3956 = vmatpush1.bf16.msra.mxu0 %v5494_v51  ;;  %3875 = vmatprep.subr.bf16.mxu1 %v5499_v4  ;;  %v5560_v51 = vld [vmem:[%s6126_s1 + $0x668] ss:$28 sps:$4 sm:$0xff]   ;;  %v5565_v4 = vld [vmem:[%s6126_s1 + $0xd9c] ss:$28 sps:$4 sm:$0xff]  }
 0x24b   : > { %3957 = vmatprep.subr.bf16.mxu0 %v5502_v5  ;;  %v5568_v5 = vld [vmem:[%s6126_s1 + $0x6a4] ss:$28 sps:$4 sm:$0xff]  }
 0x24d   : > { %3876 = vmatpush1.bf16.msra.mxu1 %v5497_v12  ;;  %v5563_v12 = vld [vmem:[%s6126_s1 + $0xd98] ss:$28 sps:$4 sm:$0xff]  }
 0x24e   : > { %3958 = vmatpush1.bf16.msra.mxu0 %v5500_v14  ;;  %3877 = vmatprep.subr.bf16.mxu1 %v5505_v15  ;;  %v5566_v14 = vld [vmem:[%s6126_s1 + $0x6a0] ss:$28 sps:$4 sm:$0xff]   ;;  %v5571_v15 = vld [vmem:[%s6126_s1 + $0xdd4] ss:$28 sps:$4 sm:$0xff]  }
 0x24f   : > { %3959 = vmatprep.subr.bf16.mxu0 %v5508_v16  ;;  %v5574_v16 = vld [vmem:[%s6126_s1 + $0x6dc] ss:$28 sps:$4 sm:$0xff]  }
 0x251   : > { %3878 = vmatpush1.bf16.msra.mxu1 %v5503_v18  ;;  %v5569_v18 = vld [vmem:[%s6126_s1 + $0xdd0] ss:$28 sps:$4 sm:$0xff]  }
 0x252   : > { %3960 = vmatpush1.bf16.msra.mxu0 %v5506_v19  ;;  %3879 = vmatprep.subr.bf16.mxu1 %v5511_v20  ;;  %v5572_v19 = vld [vmem:[%s6126_s1 + $0x6d8] ss:$28 sps:$4 sm:$0xff]  }
 0x253   : > { %v6501_v25 = vpop.f32.mrb[8].mxu1  ;;  %3961 = vmatprep.subr.bf16.mxu0 %v5514_v21  ;;  %v5578_v20 = vld [vmem:[%s6126_s1 + $0x1d8] ss:$28 sps:$4 sm:$0xff]  }
 0x254   : > { %v6504_v27 = vpop.f32.mrb[9].mxu1  ;;  %v5577_v21 = vld [vmem:[%s6126_s1 + $0x714] ss:$28 sps:$4 sm:$0xff]  }
 0x255   : > { %3880 = vmatpush1.bf16.msra.mxu1 %v5509_v22  ;;  %v3620_v7 = vpop.f32.mrb[10].mxu1  ;;  %v5579_v22 = vld [vmem:[%s6126_s1 + $0x18] ss:$28 sps:$4 sm:$0xff]  }
 0x256   : > { %3962 = vmatpush1.bf16.msra.mxu0 %v5512_v23  ;;  %v3621_v29 = vpop.f32.mrb[11].mxu1  ;;  %3881 = vmatprep.subr.bf16.mxu1 %v5517_v24  ;;  %v5575_v23 = vld [vmem:[%s6126_s1 + $0x710] ss:$28 sps:$4 sm:$0xff]  }
 0x257   : > { %3963 = vmatprep.subr.bf16.mxu0 %v5520_v26  ;;  %v5582_v24 = vld [vmem:[%s6126_s1 + $0x74c] ss:$28 sps:$4 sm:$0xff]  }
 0x258   : > { %v5583_v26 = vld [vmem:[%s6126_s1 + $0x210] ss:$28 sps:$4 sm:$0xff]   ;;  %v5588_v29 = vld [vmem:[%s6126_s1 + $0x248] ss:$28 sps:$4 sm:$0xff]  }
 0x259   : > { %3882 = vmatpush1.bf16.msra.mxu1 %v5515_v28  ;;  %v5584_v7 = vld [vmem:[%s6126_s1 + $0x50] ss:$28 sps:$4 sm:$0xff]   ;;  %v5580_v28 = vld [vmem:[%s6126_s1 + $0x748] ss:$28 sps:$4 sm:$0xff]  }
 0x25a   : > { %3964 = vmatpush1.bf16.msra.mxu0 %v5518_v30  ;;  %3883 = vmatprep.subr.bf16.mxu1 %v5523_v56  ;;  %v5587_v30 = vld [vmem:[%s6126_s1 + $0x784] ss:$28 sps:$4 sm:$0xff]  }
 0x25b   : > { %3965 = vmatprep.subr.bf16.mxu0 %v5526_v31  ;;  %v5589_v56 = vld [vmem:[%s6126_s1 + $0x88] ss:$28 sps:$4 sm:$0xff]   ;;  %v5585_v31 = vld [vmem:[%s6126_s1 + $0x780] ss:$28 sps:$4 sm:$0xff]  }
 0x25d   : > { %3884 = vmatpush1.bf16.msra.mxu1 %v5521_v33  ;;  %v5593_v33 = vld [vmem:[%s6126_s1 + $0x280] ss:$28 sps:$4 sm:$0xff]  }
 0x25e   : > { %3966 = vmatpush1.bf16.msra.mxu0 %v5524_v35  ;;  %3885 = vmatprep.subr.bf16.mxu1 %v5529_v39  ;;  %v5592_v35 = vld [vmem:[%s6126_s1 + $0x7bc] ss:$28 sps:$4 sm:$0xff]  }
 0x25f   : > { %3967 = vmatprep.subr.bf16.mxu0 %v5532_v40  ;;  %v5594_v39 = vld [vmem:[%s6126_s1 + $0xc0] ss:$28 sps:$4 sm:$0xff]   ;;  %v5598_v40 = vld [vmem:[%s6126_s1 + $0x2b8] ss:$28 sps:$4 sm:$0xff]  }
 0x261   : > { %3886 = vmatpush1.bf16.msra.mxu1 %v5527_v41  ;;  %v5597_v41 = vld [vmem:[%s6126_s1 + $0x7f4] ss:$28 sps:$4 sm:$0xff]  }
 0x262   : > { %3968 = vmatpush1.bf16.msra.mxu0 %v5530_v42  ;;  %3887 = vmatprep.subr.bf16.mxu1 %v5535_v44  ;;  %v5599_v42 = vld [vmem:[%s6126_s1 + $0xf8] ss:$28 sps:$4 sm:$0xff]   ;;  %v5595_v44 = vld [vmem:[%s6126_s1 + $0x7f0] ss:$28 sps:$4 sm:$0xff]  }
 0x263   : > { %3969 = vmatprep.subr.bf16.mxu0 %v5538_v46  ;;  %v5603_v46 = vld [vmem:[%s6126_s1 + $0x2f0] ss:$28 sps:$4 sm:$0xff]  }
 0x265   : > { %3888 = vmatpush1.bf16.msra.mxu1 %v5533_v47  ;;  %v5602_v47 = vld [vmem:[%s6126_s1 + $0x82c] ss:$28 sps:$4 sm:$0xff]  }
 0x266   : > { %3970 = vmatpush1.bf16.msra.mxu0 %v5536_v48  ;;  %3889 = vmatprep.subr.bf16.mxu1 %v5541_v49  ;;  %v5604_v48 = vld [vmem:[%s6126_s1 + $0x130] ss:$28 sps:$4 sm:$0xff]   ;;  %v5600_v49 = vld [vmem:[%s6126_s1 + $0x828] ss:$28 sps:$4 sm:$0xff]  }
 0x267   : > { %3971 = vmatprep.subr.bf16.mxu0 %v5544_v50  ;;  %v5608_v50 = vld [vmem:[%s6126_s1 + $0x328] ss:$28 sps:$4 sm:$0xff]  }
 0x269   : > { %3890 = vmatpush1.bf16.msra.mxu1 %v5539_v52  ;;  %v5607_v52 = vld [vmem:[%s6126_s1 + $0x864] ss:$28 sps:$4 sm:$0xff]  }
 0x26a   : > { %3972 = vmatpush1.bf16.msra.mxu0 %v5542_v53  ;;  %3891 = vmatprep.subr.bf16.mxu1 %v5547_v54  ;;  %v5609_v53 = vld [vmem:[%s6126_s1 + $0x168] ss:$28 sps:$4 sm:$0xff]   ;;  %v5605_v54 = vld [vmem:[%s6126_s1 + $0x860] ss:$28 sps:$4 sm:$0xff]  }
 0x26b   : > { %3973 = vmatprep.subr.bf16.mxu0 %v5550_v55  ;;  %v5613_v55 = vld [vmem:[%s6126_s1 + $0x360] ss:$28 sps:$4 sm:$0xff]  }
 0x26d   : > { %3892 = vmatpush1.bf16.msra.mxu1 %v5545_v57  ;;  %v5612_v57 = vld [vmem:[%s6126_s1 + $0x89c] ss:$28 sps:$4 sm:$0xff]  }
 0x26e   : > { %3974 = vmatpush1.bf16.msra.mxu0 %v5548_v58  ;;  %3893 = vmatprep.subr.bf16.mxu1 %v5553_v60  ;;  %v5614_v58 = vld [vmem:[%s6126_s1 + $0x1a0] ss:$28 sps:$4 sm:$0xff]   ;;  %v5610_v60 = vld [vmem:[%s6126_s1 + $0x898] ss:$28 sps:$4 sm:$0xff]  }
 0x26f   : > { %3975 = vmatprep.subr.bf16.mxu0 %v5556_v61  ;;  %v5618_v61 = vld [vmem:[%s6126_s1 + $0x558] ss:$28 sps:$4 sm:$0xff]  }
 0x271   : > { %3894 = vmatpush1.bf16.msra.mxu1 %v5551_v62  ;;  %v5617_v62 = vld [vmem:[%s6126_s1 + $0x8d4] ss:$28 sps:$4 sm:$0xff]  }
 0x272   : > { %3976 = vmatpush1.bf16.msra.mxu0 %v5554_v63  ;;  %3895 = vmatprep.subr.bf16.mxu1 %v5559_v1  ;;  %v5619_v63 = vld [vmem:[%s6126_s1 + $0x398] ss:$28 sps:$4 sm:$0xff]   ;;  %v5615_v1 = vld [vmem:[%s6126_s1 + $0x8d0] ss:$28 sps:$4 sm:$0xff]  }
 0x273   : > { %3977 = vmatprep.subr.bf16.mxu0 %v5562_v2  ;;  %v5623_v2 = vld [vmem:[%s6126_s1 + $0x590] ss:$28 sps:$4 sm:$0xff]  }
 0x275   : > { %3896 = vmatpush1.bf16.msra.mxu1 %v5557_v3  ;;  %v5622_v3 = vld [vmem:[%s6126_s1 + $0x90c] ss:$28 sps:$4 sm:$0xff]  }
 0x276   : > { %3978 = vmatpush1.bf16.msra.mxu0 %v5560_v51  ;;  %3897 = vmatprep.subr.bf16.mxu1 %v5565_v4  ;;  %v5624_v51 = vld [vmem:[%s6126_s1 + $0x3d0] ss:$28 sps:$4 sm:$0xff]   ;;  %v5620_v4 = vld [vmem:[%s6126_s1 + $0x908] ss:$28 sps:$4 sm:$0xff]  }
 0x277   : > { %3979 = vmatprep.subr.bf16.mxu0 %v5568_v5  ;;  %v5628_v5 = vld [vmem:[%s6126_s1 + $0x5c8] ss:$28 sps:$4 sm:$0xff]  }
 0x279   : > { %3898 = vmatpush1.bf16.msra.mxu1 %v5563_v12  ;;  %v5627_v12 = vld [vmem:[%s6126_s1 + $0x944] ss:$28 sps:$4 sm:$0xff]  }
 0x27a   : > { %3980 = vmatpush1.bf16.msra.mxu0 %v5566_v14  ;;  %3899 = vmatprep.subr.bf16.mxu1 %v5571_v15  ;;  %v5629_v14 = vld [vmem:[%s6126_s1 + $0x408] ss:$28 sps:$4 sm:$0xff]   ;;  %v5633_v15 = vld [vmem:[%s6126_s1 + $0x600] ss:$28 sps:$4 sm:$0xff]  }
 0x27b   : > { %3981 = vmatprep.subr.bf16.mxu0 %v5574_v16  ;;  %v5634_v16 = vld [vmem:[%s6126_s1 + $0x440] ss:$28 sps:$4 sm:$0xff]  }
 0x27d   : > { %3900 = vmatpush1.bf16.msra.mxu1 %v5569_v18  ;;  %v5630_v18 = vld [vmem:[%s6126_s1 + $0x978] ss:$28 sps:$4 sm:$0xff]  }
 0x27e   : > { %3982 = vmatpush1.bf16.msra.mxu0 %v5572_v19  ;;  %4891 = vmatprep.subr.bf16.mxu1 %v5578_v20  ;;  %v5638_v19 = vld [vmem:[%s6126_s1 + $0x638] ss:$28 sps:$4 sm:$0xff]  }
 0x27f   : > { %3992 = vmatprep.subr.bf16.mxu0 %v5577_v21  ;;  %v5637_v20 = vld [vmem:[%s6126_s1 + $0x9b4] ss:$28 sps:$4 sm:$0xff]  }
 0x280   : > { %3902 = vmatmul.mubr.bf16.vlgmr.msra.gmra.mrb[12].mxu1 %v6404_v32  ;;  %v5639_v21 = vld [vmem:[%s6126_s1 + $0x478] ss:$28 sps:$4 sm:$0xff]  }
 0x281   : > { %3984 = vmatmul.mubr.bf16.vlgmr.msra.gmra.mrb[12].mxu0 %v6238_v38  ;;  %4892 = vmatpush3.bf16.msra.mxu1 %v5579_v22  ;;  %v5635_v22 = vld [vmem:[%s6126_s1 + $0x9b0] ss:$28 sps:$4 sm:$0xff]  }
 0x282   : > { %3993 = vmatpush1.bf16.msra.mxu0 %v5575_v23  ;;  %4024 = vmatprep.mubr.bf16.mxu0 %v6269_v0  ;;  %v5643_v23 = vld [vmem:[%s6126_s1 + $0x670] ss:$28 sps:$4 sm:$0xff]  }
 0x283   : > { %4106 = vmatprep.mubr.bf16.mxu1 %v6231_v34  ;;  %3994 = vmatprep.subr.bf16.mxu0 %v5582_v24  ;;  %v5590_v34 = vld [vmem:[%s6126_s1 + $0x7b8] ss:$28 sps:$4 sm:$0xff]   ;;  %v5642_v24 = vld [vmem:[%s6126_s1 + $0x9ec] ss:$28 sps:$4 sm:$0xff]  }
 0x284   : > { %4893 = vmatprep.subr.bf16.mxu1 %v5583_v26  ;;  %v5644_v26 = vld [vmem:[%s6126_s1 + $0x4b0] ss:$28 sps:$4 sm:$0xff]  }
 0x285   : > { %4894 = vmatpush3.bf16.msra.mxu1 %v5584_v7  ;;  %v5640_v7 = vld [vmem:[%s6126_s1 + $0x9e8] ss:$28 sps:$4 sm:$0xff]  }
 0x286   : > { %3995 = vmatpush1.bf16.msra.mxu0 %v5580_v28  ;;  %4895 = vmatprep.subr.bf16.mxu1 %v5588_v29  ;;  %v5648_v28 = vld [vmem:[%s6126_s1 + $0x6a8] ss:$28 sps:$4 sm:$0xff]  }
 0x287   : > { %3996 = vmatprep.subr.bf16.mxu0 %v5587_v30  ;;  %v5647_v29 = vld [vmem:[%s6126_s1 + $0xa24] ss:$28 sps:$4 sm:$0xff]  }
 0x288   : > { %v5649_v30 = vld [vmem:[%s6126_s1 + $0x4e8] ss:$28 sps:$4 sm:$0xff]  }
 0x289   : > { %4896 = vmatpush3.bf16.msra.mxu1 %v5589_v56  ;;  %v5645_v56 = vld [vmem:[%s6126_s1 + $0xa20] ss:$28 sps:$4 sm:$0xff]  }
 0x28a   : > { %3997 = vmatpush1.bf16.msra.mxu0 %v5585_v31  ;;  %4897 = vmatprep.subr.bf16.mxu1 %v5593_v33  ;;  %v5653_v31 = vld [vmem:[%s6126_s1 + $0x6e0] ss:$28 sps:$4 sm:$0xff]  }
 0x28b   : > { %3998 = vmatprep.subr.bf16.mxu0 %v5592_v35  ;;  %v5652_v33 = vld [vmem:[%s6126_s1 + $0xa5c] ss:$28 sps:$4 sm:$0xff]  }
 0x28c   : > { %v5654_v35 = vld [vmem:[%s6126_s1 + $0x520] ss:$28 sps:$4 sm:$0xff]  }
 0x28d   : > { %4898 = vmatpush3.bf16.msra.mxu1 %v5594_v39  ;;  %v5650_v39 = vld [vmem:[%s6126_s1 + $0xa58] ss:$28 sps:$4 sm:$0xff]  }
 0x28e   : > { %3999 = vmatpush1.bf16.msra.mxu0 %v5590_v34  ;;  %4899 = vmatprep.subr.bf16.mxu1 %v5598_v40  ;;  %v5658_v34 = vld [vmem:[%s6126_s1 + $0x8d8] ss:$28 sps:$4 sm:$0xff]  }
 0x28f   : > { %4000 = vmatprep.subr.bf16.mxu0 %v5597_v41  ;;  %v5657_v40 = vld [vmem:[%s6126_s1 + $0xa94] ss:$28 sps:$4 sm:$0xff]  }
 0x290   : > { %v5659_v41 = vld [vmem:[%s6126_s1 + $0x718] ss:$28 sps:$4 sm:$0xff]  }
 0x291   : > { %4900 = vmatpush3.bf16.msra.mxu1 %v5599_v42  ;;  %v5655_v42 = vld [vmem:[%s6126_s1 + $0xa90] ss:$28 sps:$4 sm:$0xff]  }
 0x292   : > { %4001 = vmatpush1.bf16.msra.mxu0 %v5595_v44  ;;  %4901 = vmatprep.subr.bf16.mxu1 %v5603_v46  ;;  %v5662_v44 = vld [vmem:[%s6126_s1 + $0xacc] ss:$28 sps:$4 sm:$0xff]  }
 0x293   : > { %4002 = vmatprep.subr.bf16.mxu0 %v5602_v47  ;;  %v5663_v46 = vld [vmem:[%s6126_s1 + $0x910] ss:$28 sps:$4 sm:$0xff]  }
 0x294   : > { %v5664_v47 = vld [vmem:[%s6126_s1 + $0x750] ss:$28 sps:$4 sm:$0xff]  }
 0x295   : > { %4902 = vmatpush3.bf16.msra.mxu1 %v5604_v48  ;;  %v5660_v48 = vld [vmem:[%s6126_s1 + $0xac8] ss:$28 sps:$4 sm:$0xff]  }
 0x296   : > { %4003 = vmatpush1.bf16.msra.mxu0 %v5600_v49  ;;  %4903 = vmatprep.subr.bf16.mxu1 %v5608_v50  ;;  %v5668_v49 = vld [vmem:[%s6126_s1 + $0x948] ss:$28 sps:$4 sm:$0xff]  }
 0x297   : > { %4004 = vmatprep.subr.bf16.mxu0 %v5607_v52  ;;  %v5667_v50 = vld [vmem:[%s6126_s1 + $0xb04] ss:$28 sps:$4 sm:$0xff]  }
 0x298   : > { %v5665_v52 = vld [vmem:[%s6126_s1 + $0xb00] ss:$28 sps:$4 sm:$0xff]  }
 0x299   : > { %4904 = vmatpush3.bf16.msra.mxu1 %v5609_v53  ;;  %v5673_v53 = vld [vmem:[%s6126_s1 + $0x980] ss:$28 sps:$4 sm:$0xff]  }
 0x29a   : > { %4005 = vmatpush1.bf16.msra.mxu0 %v5605_v54  ;;  %4905 = vmatprep.subr.bf16.mxu1 %v5613_v55  ;;  %v5672_v54 = vld [vmem:[%s6126_s1 + $0xb3c] ss:$28 sps:$4 sm:$0xff]  }
 0x29b   : > { %4006 = vmatprep.subr.bf16.mxu0 %v5612_v57  ;;  %v5670_v55 = vld [vmem:[%s6126_s1 + $0xb38] ss:$28 sps:$4 sm:$0xff]  }
 0x29c   : > { %v5678_v57 = vld [vmem:[%s6126_s1 + $0x9b8] ss:$28 sps:$4 sm:$0xff]  }
 0x29d   : > { %4906 = vmatpush3.bf16.msra.mxu1 %v5614_v58  ;;  %v5677_v58 = vld [vmem:[%s6126_s1 + $0xb74] ss:$28 sps:$4 sm:$0xff]  }
 0x29e   : > { %4007 = vmatpush1.bf16.msra.mxu0 %v5610_v60  ;;  %4913 = vmatprep.subr.bf16.mxu1 %v5618_v61  ;;  %v6638_v60 = vld [vmem:[%s268_s17] sm:$0xff]  ;;  %v5679_v61 = vld [vmem:[%s6126_s1 + $0x7f8] ss:$28 sps:$4 sm:$0xff]  }
 0x29f   : > { %4008 = vmatprep.subr.bf16.mxu0 %v5617_v62  ;;  %v5675_v62 = vld [vmem:[%s6126_s1 + $0xb70] ss:$28 sps:$4 sm:$0xff]  }
 0x2a0   : > { %4107 = vmatmul.mubr.bf16.vlgmr.msra.gmra.mrb[16].mxu1 %v6234_v36  ;;  %v5625_v36 = vld [vmem:[%s6126_s1 + $0x940] ss:$28 sps:$4 sm:$0xff]  }
 0x2a1   : > { %4914 = vmatpush3.bf16.msra.mxu1 %v5619_v63  ;;  %4146 = vmatprep.mubr.bf16.mxu1 %v6236_v37  ;;  %v5632_v37 = vld [vmem:[%s6126_s1 + $0x97c] ss:$28 sps:$4 sm:$0xff]   ;;  %v5683_v63 = vld [vmem:[%s6126_s1 + $0x9f0] ss:$28 sps:$4 sm:$0xff]  }
 0x2a2   : > { %4009 = vmatpush1.bf16.msra.mxu0 %v5615_v1  ;;  %4915 = vmatprep.subr.bf16.mxu1 %v5623_v2  ;;  %v1246_v1 = vrot.slane %v6638_v60, %v347_v8  ;;  %v5682_v2 = vld [vmem:[%s6126_s1 + $0xbac] ss:$28 sps:$4 sm:$0xff]  }
 0x2a3   : > { %4010 = vmatprep.subr.bf16.mxu0 %v5622_v3  ;;  %v1250_v3 = vrot.slane %v6638_v60, %v351_v10  ;;  %v5689_v10 = vld [vmem:[%s6126_s1 + $0x868] ss:$28 sps:$4 sm:$0xff]  }
 0x2a5   : > { %4916 = vmatpush3.bf16.msra.mxu1 %v5624_v51  ;;  %v5684_v51 = vld [vmem:[%s6126_s1 + $0x830] ss:$28 sps:$4 sm:$0xff]   ;;  %v3619_v8 = vadd.f32 %v6504_v27, %v1250_v3  ;;  %v5692_v27 = vld [vmem:[%s6126_s1 + $0xc1c] ss:$28 sps:$4 sm:$0xff]   ;;  %v1254_v3 = vrot.slane %v6638_v60, %v355_v9 }
 0x2a6   : > { %4011 = vmatpush1.bf16.msra.mxu0 %v5620_v4  ;;  %4917 = vmatprep.subr.bf16.mxu1 %v5628_v5  ;;  %v5680_v4 = vld [vmem:[%s6126_s1 + $0xba8] ss:$28 sps:$4 sm:$0xff]  }
 0x2a7   : > { %4012 = vmatprep.subr.bf16.mxu0 %v5627_v12  ;;  %v5688_v5 = vld [vmem:[%s6126_s1 + $0xa28] ss:$28 sps:$4 sm:$0xff]   ;;  %v3617_v12 = vadd.f32 %v6501_v25, %v1246_v1  ;;  %v5693_v25 = vld [vmem:[%s6126_s1 + $0xa60] ss:$28 sps:$4 sm:$0xff]   ;;  %v5905_v1 = vmov 1983009808  }
 0x2a9   : > { %4918 = vmatpush3.bf16.msra.mxu1 %v5629_v14  ;;  %v5687_v14 = vld [vmem:[%s6126_s1 + $0xbe4] ss:$28 sps:$4 sm:$0xff]  }
 0x2aa   : > { %4013 = vmatpush1.bf16.msra.mxu0 %v5625_v36  ;;  %4919 = vmatprep.subr.bf16.mxu1 %v5633_v15 }
 0x2ab   : > { %4014 = vmatprep.subr.bf16.mxu0 %v5632_v37 }
 0x2ad   : > { %4920 = vmatpush3.bf16.msra.mxu1 %v5634_v16 }
 0x2ae   : > { %4015 = vmatpush1.bf16.msra.mxu0 %v5630_v18  ;;  %4921 = vmatprep.subr.bf16.mxu1 %v5638_v19  ;;  %v5685_v19 = vld [vmem:[%s6126_s1 + $0xbe0] ss:$28 sps:$4 sm:$0xff]  }
 0x2af   : > { %4016 = vmatprep.subr.bf16.mxu0 %v5637_v20 }
 0x2b1   : > { %4922 = vmatpush3.bf16.msra.mxu1 %v5639_v21 }
 0x2b2   : > { %4017 = vmatpush1.bf16.msra.mxu0 %v5635_v22  ;;  %4923 = vmatprep.subr.bf16.mxu1 %v5643_v23  ;;  %v5694_v23 = vld [vmem:[%s6126_s1 + $0x8a0] ss:$28 sps:$4 sm:$0xff]  }
 0x2b3   : > { %4018 = vmatprep.subr.bf16.mxu0 %v5642_v24 }
 0x2b5   : > { %4924 = vmatpush3.bf16.msra.mxu1 %v5644_v26  ;;  %v5690_v26 = vld [vmem:[%s6126_s1 + $0xc18] ss:$28 sps:$4 sm:$0xff]  }
 0x2b6   : > { %4019 = vmatpush1.bf16.msra.mxu0 %v5640_v7  ;;  %4925 = vmatprep.subr.bf16.mxu1 %v5648_v28  ;;  %v5698_v7 = vld [vmem:[%s6126_s1 + $0xc58] ss:$28 sps:$4 sm:$0xff]  }
 0x2b7   : > { %4020 = vmatprep.subr.bf16.mxu0 %v5647_v29  ;;  %v5697_v28 = vld [vmem:[%s6126_s1 + $0xc54] ss:$28 sps:$4 sm:$0xff]  }
 0x2b8   : > { %v5699_v29 = vld [vmem:[%s6126_s1 + $0xa98] ss:$28 sps:$4 sm:$0xff]  }
 0x2b9   : > { %4926 = vmatpush3.bf16.msra.mxu1 %v5649_v30  ;;  %v5695_v30 = vld [vmem:[%s6126_s1 + $0xc50] ss:$28 sps:$4 sm:$0xff]  }
 0x2ba   : > { %4021 = vmatpush1.bf16.msra.mxu0 %v5645_v56  ;;  %4927 = vmatprep.subr.bf16.mxu1 %v5653_v31  ;;  %v5703_v56 = vld [vmem:[%s6126_s1 + $0xc90] ss:$28 sps:$4 sm:$0xff]  }
 0x2bb   : > { %4022 = vmatprep.subr.bf16.mxu0 %v5652_v33  ;;  %v5702_v31 = vld [vmem:[%s6126_s1 + $0xc8c] ss:$28 sps:$4 sm:$0xff]  }
 0x2bc   : > { %v5704_v33 = vld [vmem:[%s6126_s1 + $0xad0] ss:$28 sps:$4 sm:$0xff]  }
 0x2bd   : > { %4928 = vmatpush3.bf16.msra.mxu1 %v5654_v35  ;;  %v5700_v35 = vld [vmem:[%s6126_s1 + $0xc88] ss:$28 sps:$4 sm:$0xff]  }
 0x2be   : > { %4023 = vmatpush1.bf16.msra.mxu0 %v5650_v39  ;;  %4935 = vmatprep.subr.bf16.mxu1 %v5658_v34  ;;  %v5708_v39 = vld [vmem:[%s6126_s1 + $0xcc8] ss:$28 sps:$4 sm:$0xff]  }
 0x2bf   : > { %4033 = vmatprep.subr.bf16.mxu0 %v5657_v40  ;;  %v5707_v34 = vld [vmem:[%s6126_s1 + $0xcc4] ss:$28 sps:$4 sm:$0xff]  }
 0x2c0   : > { %4147 = vmatmul.mubr.bf16.vlgmr.msra.gmra.mrb[20].mxu1 %v6238_v38  ;;  %v5669_v38 = vld [vmem:[%s6126_s1 + $0x788] ss:$28 sps:$4 sm:$0xff]  }
 0x2c1   : > { %4025 = vmatmul.mubr.bf16.vlgmr.msra.gmra.mrb[12].mxu0 %v6327_v13  ;;  %4936 = vmatpush3.bf16.msra.mxu1 %v5659_v41  ;;  %v5709_v40 = vld [vmem:[%s6126_s1 + $0xb08] ss:$28 sps:$4 sm:$0xff]   ;;  %v5713_v41 = vld [vmem:[%s6126_s1 + $0xd00] ss:$28 sps:$4 sm:$0xff]  }
 0x2c2   : > { %4034 = vmatpush1.bf16.msra.mxu0 %v5655_v42  ;;  %4065 = vmatprep.mubr.bf16.mxu0 %v6334_v17  ;;  %v5714_v42 = vld [vmem:[%s6126_s1 + $0xb40] ss:$28 sps:$4 sm:$0xff]  }
 0x2c3   : > { %4186 = vmatprep.mubr.bf16.mxu1 %v6269_v0  ;;  %4035 = vmatprep.subr.bf16.mxu0 %v5662_v44  ;;  %v5674_v0 = vld [vmem:[%s6126_s1 + $0x7c0] ss:$28 sps:$4 sm:$0xff]   ;;  %v5710_v44 = vld [vmem:[%s6126_s1 + $0xcf8] ss:$28 sps:$4 sm:$0xff]  }
 0x2c4   : > { %4937 = vmatprep.subr.bf16.mxu1 %v5663_v46  ;;  %v5718_v46 = vld [vmem:[%s6126_s1 + $0xd38] ss:$28 sps:$4 sm:$0xff]  }
 0x2c5   : > { %4938 = vmatpush3.bf16.msra.mxu1 %v5664_v47  ;;  %v5717_v47 = vld [vmem:[%s6126_s1 + $0xd34] ss:$28 sps:$4 sm:$0xff]  }
 0x2c6   : > { %4036 = vmatpush1.bf16.msra.mxu0 %v5660_v48  ;;  %4939 = vmatprep.subr.bf16.mxu1 %v5668_v49  ;;  %v5719_v48 = vld [vmem:[%s6126_s1 + $0xb78] ss:$28 sps:$4 sm:$0xff]   ;;  %v5715_v49 = vld [vmem:[%s6126_s1 + $0xd30] ss:$28 sps:$4 sm:$0xff]  }
 0x2c7   : > { %4037 = vmatprep.subr.bf16.mxu0 %v5667_v50  ;;  %v5723_v50 = vld [vmem:[%s6126_s1 + $0xd70] ss:$28 sps:$4 sm:$0xff]  }
 0x2c9   : > { %4940 = vmatpush3.bf16.msra.mxu1 %v5669_v38  ;;  %v5722_v38 = vld [vmem:[%s6126_s1 + $0xd6c] ss:$28 sps:$4 sm:$0xff]  }
 0x2ca   : > { %4038 = vmatpush1.bf16.msra.mxu0 %v5665_v52  ;;  %4941 = vmatprep.subr.bf16.mxu1 %v5673_v53  ;;  %v5724_v52 = vld [vmem:[%s6126_s1 + $0xbb0] ss:$28 sps:$4 sm:$0xff]   ;;  %v5720_v53 = vld [vmem:[%s6126_s1 + $0xd68] ss:$28 sps:$4 sm:$0xff]  }
 0x2cb   : > { %4039 = vmatprep.subr.bf16.mxu0 %v5672_v54  ;;  %v5728_v54 = vld [vmem:[%s6126_s1 + $0xda8] ss:$28 sps:$4 sm:$0xff]  }
 0x2cd   : > { %4942 = vmatpush3.bf16.msra.mxu1 %v5674_v0  ;;  %v5727_v0 = vld [vmem:[%s6126_s1 + $0xda4] ss:$28 sps:$4 sm:$0xff]  }
 0x2ce   : > { %4040 = vmatpush1.bf16.msra.mxu0 %v5670_v55  ;;  %4943 = vmatprep.subr.bf16.mxu1 %v5678_v57  ;;  %v5729_v55 = vld [vmem:[%s6126_s1 + $0xbe8] ss:$28 sps:$4 sm:$0xff]   ;;  %v5725_v57 = vld [vmem:[%s6126_s1 + $0xda0] ss:$28 sps:$4 sm:$0xff]  }
 0x2cf   : > { %4041 = vmatprep.subr.bf16.mxu0 %v5677_v58  ;;  %v5733_v58 = vld [vmem:[%s6126_s1 + $0xde0] ss:$28 sps:$4 sm:$0xff]  }
 0x2d1   : > { %4944 = vmatpush3.bf16.msra.mxu1 %v5679_v61  ;;  %v5732_v61 = vld [vmem:[%s6126_s1 + $0xddc] ss:$28 sps:$4 sm:$0xff]  }
 0x2d2   : > { %4042 = vmatpush1.bf16.msra.mxu0 %v5675_v62  ;;  %4945 = vmatprep.subr.bf16.mxu1 %v5683_v63  ;;  %v5734_v62 = vld [vmem:[%s6126_s1 + $0xc20] ss:$28 sps:$4 sm:$0xff]   ;;  %v5730_v63 = vld [vmem:[%s6126_s1 + $0xdd8] ss:$28 sps:$4 sm:$0xff]  }
 0x2d3   : > { %4043 = vmatprep.subr.bf16.mxu0 %v5682_v2  ;;  %v3739_v36 = vpop.f32.mrb[8].mxu0  ;;  %v4251_v2 = vunpack.c.l.s4 %v5905_v1 }
 0x2d4   : > { %v4980_v15 = vadd.f32 %v3739_v36, %v3617_v12  ;;  %v3741_v37 = vpop.f32.mrb[9].mxu0 }
 0x2d5   : > { %4946 = vmatpush3.bf16.msra.mxu1 %v5684_v51  ;;  %v4982_v16 = vadd.f32 %v3741_v37, %v3619_v8  ;;  %v3743_v18 = vpop.f32.mrb[10].mxu0  ;;  %v1258_v51 = vrot.slane %v6638_v60, %v359_v11 }
 0x2d6   : > { %4044 = vmatpush1.bf16.msra.mxu0 %v5680_v4  ;;  %4947 = vmatprep.subr.bf16.mxu1 %v5688_v5  ;;  %v4234_v20 = vmax.f32 %v4980_v15, 0.0  ;;  %v3744_v21 = vpop.f32.mrb[11].mxu0  ;;  %v4252_v4 = vunpack.c.0.s8 %v4251_v2 }
 0x2d7   : > { %4045 = vmatprep.subr.bf16.mxu0 %v5687_v14  ;;  %v4235_v22 = vmax.f32 %v4982_v16, 0.0 }
 0x2d8   : > { %v4255_v37 = vsub.s32 %v4252_v4, %v6209_v6 }
 0x2d9   : > { %4948 = vmatpush3.bf16.msra.mxu1 %v5689_v10  ;;  %v6661_v24 = vcombine.low %v4234_v20, %v4235_v22  ;;  %v1270_v22 = vrot.slane %v6638_v60, %v371_v59  ;;  %v1266_v59 = vrot.slane %v6638_v60, %v367_v43 }
 0x2da   : > { %4046 = vmatpush1.bf16.msra.mxu0 %v5685_v19  ;;  %4949 = vmatprep.subr.bf16.mxu1 %v5693_v25 }
 0x2db   : > { %4047 = vmatprep.subr.bf16.mxu0 %v5692_v27  ;;  %v4256_v9 = vrot.slane %v6661_v24, %v4255_v37 }
 0x2dd   : > { %4950 = vmatpush3.bf16.msra.mxu1 %v5694_v23 }
 0x2de   : > { %4048 = vmatpush1.bf16.msra.mxu0 %v5690_v26  ;;  %4957 = vmatprep.subr.bf16.mxu1 %v5698_v7 }
 0x2df   : > { %4049 = vmatprep.subr.bf16.mxu0 %v5697_v28 }
 0x2e0   : > { %4187 = vmatmul.mubr.bf16.vlgmr.msra.gmra.mrb[24].mxu1 %v6327_v13  ;;  %v5705_v13 = vld [vmem:[%s6126_s1 + $0xcc0] ss:$28 sps:$4 sm:$0xff]  }
 0x2e1   : > { %4958 = vmatpush3.bf16.msra.mxu1 %v5699_v29  ;;  %4226 = vmatprep.mubr.bf16.mxu1 %v6334_v17  ;;  %v5712_v17 = vld [vmem:[%s6126_s1 + $0xcfc] ss:$28 sps:$4 sm:$0xff]  }
 0x2e2   : > { %4050 = vmatpush1.bf16.msra.mxu0 %v5695_v30  ;;  %4959 = vmatprep.subr.bf16.mxu1 %v5703_v56 }
 0x2e3   : > { %4051 = vmatprep.subr.bf16.mxu0 %v5702_v31 }
 0x2e5   : > { %4960 = vmatpush3.bf16.msra.mxu1 %v5704_v33 }
 0x2e6   : > { %4052 = vmatpush1.bf16.msra.mxu0 %v5700_v35  ;;  %4961 = vmatprep.subr.bf16.mxu1 %v5708_v39 }
 0x2e7   : > { %4053 = vmatprep.subr.bf16.mxu0 %v5707_v34 }
 0x2e9   : > { %4962 = vmatpush3.bf16.msra.mxu1 %v5709_v40  ;;  %v1262_v40 = vrot.slane %v6638_v60, %v363_v45 }
 0x2ea   : > { %4054 = vmatpush1.bf16.msra.mxu0 %v5705_v13  ;;  %4963 = vmatprep.subr.bf16.mxu1 %v5713_v41 }
 0x2eb   : > { %4055 = vmatprep.subr.bf16.mxu0 %v5712_v17 }
 0x2ed   : > { %4964 = vmatpush3.bf16.msra.mxu1 %v5714_v42 }
 0x2ee   : > { %4056 = vmatpush1.bf16.msra.mxu0 %v5710_v44  ;;  %4965 = vmatprep.subr.bf16.mxu1 %v5718_v46 }
 0x2ef   : > { %4057 = vmatprep.subr.bf16.mxu0 %v5717_v47 }
 0x2f1   : > { %4966 = vmatpush3.bf16.msra.mxu1 %v5719_v48 }
 0x2f2   : > { %4058 = vmatpush1.bf16.msra.mxu0 %v5715_v49  ;;  %4967 = vmatprep.subr.bf16.mxu1 %v5723_v50 }
 0x2f3   : > { %4059 = vmatprep.subr.bf16.mxu0 %v5722_v38 }
 0x2f5   : > { %4968 = vmatpush3.bf16.msra.mxu1 %v5724_v52 }
 0x2f6   : > { %4060 = vmatpush1.bf16.msra.mxu0 %v5720_v53  ;;  %4969 = vmatprep.subr.bf16.mxu1 %v5728_v54 }
 0x2f7   : > { %4061 = vmatprep.subr.bf16.mxu0 %v5727_v0 }
 0x2f9   : > { %4970 = vmatpush3.bf16.msra.mxu1 %v5729_v55 }
 0x2fa   : > { %4062 = vmatpush1.bf16.msra.mxu0 %v5725_v57  ;;  %4971 = vmatprep.subr.bf16.mxu1 %v5733_v58 }
 0x2fb   : > { %4063 = vmatprep.subr.bf16.mxu0 %v5732_v61 }
 0x2fd   : > { %4972 = vmatpush3.bf16.msra.mxu1 %v5734_v62 }
 0x2fe   : > { %4064 = vmatpush1.bf16.msra.mxu0 %v5730_v63 }
 0x300   : > { %4227 = vmatmul.mubr.bf16.vlgmr.msra.gmra.mrb[28].mxu1 %v6404_v32 }
 0x301   : > { %4066 = vmatmul.mubr.bf16.vlgmr.msra.gmra.mrb[12].mxu0 %v6404_v32 }
 0x353   : > { %v3903_v5 = vpop.f32.mrb[12].mxu1 }
 0x354   : > { %v4983_v12 = vadd.f32 %v3903_v5, %v1254_v3  ;;  %v3905_v14 = vpop.f32.mrb[13].mxu1 }
 0x355   : > { %v4984_v8 = vadd.f32 %v3905_v14, %v1258_v51  ;;  %v3907_v36 = vpop.f32.mrb[14].mxu1 }
 0x356   : > { %v4236_v32 = vmax.f32 %v4983_v12, 0.0  ;;  %v3908_v15 = vpop.f32.mrb[15].mxu1 }
 0x357   : > { %v4237_v10 = vmax.f32 %v4984_v8, 0.0 }
 0x359   : > { %v4249_v16 = vcombine.low %v4236_v32, %v4237_v10 }
 0x35b   : > { %v4263_v18 = vrot.slane %v4249_v16, %v4255_v37 }
 0x35d   : > { %v4264_v11 = vcombine.low %v4256_v9, %v4263_v18 }
 0x35f   : > { %4283 = vst [vmem:[%s6712_s24] sm:$0xff] %v4264_v11 }
 0x373   : > { %v4907_v19 = vpop.f32.mrb[16].mxu1 }
 0x374   : > { %v4908_v25 = vpop.f32.mrb[17].mxu1 }
 0x375   : > { %v4909_v20 = vadd.f32 %v4908_v25, %v4907_v19  ;;  %v4910_v21 = vpop.f32.mrb[18].mxu1 }
 0x376   : > { %v4911_v27 = vpop.f32.mrb[19].mxu1 }
 0x377   : > { %v4109_v26 = vadd.f32 %v4909_v20, %v1270_v22 }
 0x393   : > { %v4929_v23 = vpop.f32.mrb[20].mxu1 }
 0x394   : > { %v4930_v24 = vpop.f32.mrb[21].mxu1 }
 0x395   : > { %v4931_v7 = vadd.f32 %v4930_v24, %v4929_v23  ;;  %v4932_v28 = vpop.f32.mrb[22].mxu1 }
 0x396   : > { %v4933_v29 = vpop.f32.mrb[23].mxu1 }
 0x397   : > { %v4149_v30 = vadd.f32 %v4931_v7, %v4109_v26 }
 0x3b3   : > { %v4951_v56 = vpop.f32.mrb[24].mxu1 }
 0x3b4   : > { %v4952_v31 = vpop.f32.mrb[25].mxu1 }
 0x3b5   : > { %v4953_v33 = vadd.f32 %v4952_v31, %v4951_v56  ;;  %v4954_v35 = vpop.f32.mrb[26].mxu1 }
 0x3b6   : > { %v4955_v39 = vpop.f32.mrb[27].mxu1 }
 0x3b7   : > { %v4189_v34 = vadd.f32 %v4953_v33, %v4149_v30 }
 0x3d3   : > { %v4973_v13 = vpop.f32.mrb[28].mxu1 }
 0x3d4   : > { %v4067_v41 = vpop.f32.mrb[12].mxu0  ;;  %v4974_v17 = vpop.f32.mrb[29].mxu1 }
 0x3d5   : > { %v4985_v42 = vadd.f32 %v4067_v41, %v1262_v40  ;;  %v4069_v44 = vpop.f32.mrb[13].mxu0  ;;  %v4975_v46 = vadd.f32 %v4974_v17, %v4973_v13  ;;  %v4976_v47 = vpop.f32.mrb[30].mxu1 }
 0x3d6   : > { %v4986_v48 = vadd.f32 %v4069_v44, %v1266_v59  ;;  %v4071_v49 = vpop.f32.mrb[14].mxu0  ;;  %v4977_v50 = vpop.f32.mrb[31].mxu1 }
 0x3d7   : > { %v4238_v38 = vmax.f32 %v4985_v42, 0.0  ;;  %v4229_v52 = vadd.f32 %v4975_v46, %v4189_v34  ;;  %v4072_v53 = vpop.f32.mrb[15].mxu0 }
 0x3d8   : > { %v4239_v54 = vmax.f32 %v4986_v48, 0.0 }
 0x3d9   : > { %v4240_v45 = vmax.f32 %v4229_v52, 0.0 }
 0x3da   : > { %v4265_v0 = vcombine.low %v4238_v38, %v4239_v54 }
 0x3db   : > { %v4279_v6 = vrot.slane %v4240_v45, %v4255_v37 }
 0x3dc   : > { %v4272_v55 = vrot.slane %v4265_v0, %v4255_v37 }
 0x3de   : > { %v4280_v43 = vcombine.low %v4272_v55, %v4279_v6 }
 0x3e0   : > { %4284 = vst [vmem:[%s6712_s24 + $0x8] sm:$0x3f] %v4280_v43 }
 0x3e1 PF: > { %p14_p4 = scmp.ge.s32.totalorder %s5958_s23, 9   ;;  %s6772_s18 = smov %s5885_s19 }
 0x3e2   : > { %s6773_s19 = smov %s5889_s20  ;;  %s6774_s20 = smov %s5968_s26 }
 0x3e3   : > { %s6775_s21 = smov %s5958_s23  ;;  %16 = sbr.rel (!%p14_p4) target bundleno = 6 (0x6), region = 98 }
 0x3ea   :  { %4307 = vsyncpa [#allocation3], 1 }
 0x3eb   :  { %4309 = vsyncpa [#allocation3 + $0x1], 1 }
 0x3ec   :  { %4310 = vsyncpa [#allocation5], 1 }

// kernel: generator_forward.5
= control target key start
LH: loop header
LB: loop body
LE: loop exit
PB: predicated region body
PF: predicated region fallthrough
CT: control target
= control target key end

     0   :  { %vm248_vm0 = vcmask 523264   ;;  %vm2655_vm1 = vcmask 31744   ;;  %s5156_s1 = inlined_call_operand.vmem [shape: bf16[4,64,4], index: 1, kind: input, shape index: {}]   ;;  %s5157_s0 = inlined_call_operand.vmem [shape: f32[2,17,17,64], index: 0, kind: input, shape index: {}]   ;;  %s5158_s2 = inlined_call_operand.vmem [shape: f32[1,4], index: 2, kind: input, shape index: {}]   ;;  %s5159_s3 = inlined_call_operand.vmem [shape: f32[512,4], index: 3, kind: output, shape index: {}]  }
   0x1   :  { %v3709_v0 = vld [vmem:[%s5156_s1 + $0x20] sm:$0xff]   ;;  %v3711_v2 = vld [vmem:[%s5156_s1 + $0x28] sm:$0xff]   ;;  %v3713_v4 = vld [vmem:[%s5156_s1 + $0x30] sm:$0xff]  }
   0x2   :  { %v3710_v1 = vld [vmem:[%s5156_s1 + $0x40] sm:$0xff]   ;;  %3229 = vmatprep.subr.bf16.mxu1 %v3709_v0  ;;  %v3712_v3 = vld [vmem:[%s5156_s1 + $0x48] sm:$0xff]   ;;  %v3714_v5 = vld [vmem:[%s5156_s1 + $0x50] sm:$0xff]  }
   0x3   :  { %3373 = vmatprep.subr.bf16.mxu0 %v3710_v1  ;;  %3230 = vmatpush3.bf16.msra.mxu1 %v3709_v0  ;;  %v3715_v6 = vld [vmem:[%s5156_s1 + $0x38] sm:$0xff]   ;;  %v119_v7 = vld [vmem:[%s5157_s0 + $0x1] sm:$0xff]  ;;  %v120_v8 = vld [vmem:[%s5157_s0 + $0x9] sm:$0xff] }
   0x4   :  { %3374 = vmatpush3.bf16.msra.mxu0 %v3710_v1  ;;  %3231 = vmatprep.subr.bf16.mxu1 %v3711_v2  ;;  %v2804_v9 = vld [vmem:[%s5157_s0 + $0x18] sm:$0xff]  ;;  %v183_v11 = vpack.c.bf16 %v120_v8, %v119_v7  ;;  %v2805_v12 = vld [vmem:[%s5157_s0 + $0x20] sm:$0xff]  ;;  %v2806_v17 = vld [vmem:[%s5157_s0 + $0x30] sm:$0xff] }
   0x5   :  { %3375 = vmatprep.subr.bf16.mxu0 %v3712_v3  ;;  %v3716_v10 = vld [vmem:[%s5156_s1 + $0x58] sm:$0xff]   ;;  %v4038_v13 = vpack.c.bf16 %v2805_v12, %v2804_v9  ;;  %v122_v15 = vld [vmem:[%s5157_s0 + $0x21] sm:$0xff]  ;;  %v2809_v24 = vld [vmem:[%s5157_s0 + $0x50] sm:$0xff] }
   0x6   :  { %v121_v14 = vld [vmem:[%s5157_s0 + $0x19] sm:$0xff]  ;;  %3237 = vmatprep.mubr.msk.bf16.mxu1 %vm248_vm0, %v183_v11  ;;  %v123_v20 = vld [vmem:[%s5157_s0 + $0x31] sm:$0xff]  ;;  %v2808_v23 = vld [vmem:[%s5157_s0 + $0x48] sm:$0xff] }
   0x7   :  { %3232 = vmatpush3.bf16.msra.mxu1 %v3711_v2  ;;  %v3717_v16 = vld [vmem:[%s5156_s1] sm:$0xff]   ;;  %v2807_v18 = vld [vmem:[%s5157_s0 + $0x38] sm:$0xff]  ;;  %3381 = vmatprep.mubr.msk.bf16.mxu0 %vm248_vm0, %v4038_v13  ;;  %v4067_v22 = vpack.c.bf16 %v122_v15, %v121_v14  ;;  %v4079_v27 = vpack.c.bf16 %v2809_v24, %v2808_v23  ;;  %v125_v28 = vld [vmem:[%s5157_s0 + $0x49] sm:$0xff] }
   0x8   :  { %3376 = vmatpush3.bf16.msra.mxu0 %v3712_v3  ;;  %3233 = vmatprep.subr.bf16.mxu1 %v3713_v4  ;;  %v3718_v19 = vld [vmem:[%s5156_s1 + $0x60] sm:$0xff]   ;;  %v4075_v25 = vpack.c.bf16 %v2807_v18, %v2806_v17  ;;  %v126_v29 = vld [vmem:[%s5157_s0 + $0x51] sm:$0xff]  ;;  %v2811_v31 = vld [vmem:[%s5157_s0 + $0x68] sm:$0xff] }
   0x9   :  { %3377 = vmatprep.subr.bf16.mxu0 %v3714_v5  ;;  %v124_v21 = vld [vmem:[%s5157_s0 + $0x39] sm:$0xff]  ;;  %v127_v32 = vld [vmem:[%s5157_s0 + $0x61] sm:$0xff]  ;;  %v128_v33 = vld [vmem:[%s5157_s0 + $0x69] sm:$0xff]  ;;  %v4113_v36 = vpack.c.bf16 %v126_v29, %v125_v28 }
   0xa   :  { %v4077_v26 = vpack.c.bf16 %v124_v21, %v123_v20  ;;  %v2810_v30 = vld [vmem:[%s5157_s0 + $0x60] sm:$0xff]  ;;  %v2812_v34 = vld [vmem:[%s5157_s0 + $0x78] sm:$0xff]  ;;  %v4117_v38 = vpack.c.bf16 %v128_v33, %v127_v32  ;;  %v3719_v39 = vld [vmem:[%s5156_s1 + $0x8] sm:$0xff]  }
   0xb   :  { %3234 = vmatpush3.bf16.msra.mxu1 %v3713_v4  ;;  %v2813_v35 = vld [vmem:[%s5157_s0 + $0x80] sm:$0xff]  ;;  %v4115_v37 = vpack.c.bf16 %v2811_v31, %v2810_v30  ;;  %v3720_v41 = vld [vmem:[%s5156_s1 + $0x68] sm:$0xff]   ;;  %v2814_v44 = vld [vmem:[%s5157_s0 + $0x90] sm:$0xff] }
   0xc   :  { %3378 = vmatpush3.bf16.msra.mxu0 %v3714_v5  ;;  %3235 = vmatprep.subr.bf16.mxu1 %v3715_v6  ;;  %v4122_v40 = vpack.c.bf16 %v2813_v35, %v2812_v34  ;;  %v129_v42 = vld [vmem:[%s5157_s0 + $0x79] sm:$0xff]  ;;  %v130_v43 = vld [vmem:[%s5157_s0 + $0x81] sm:$0xff]  ;;  %v131_v46 = vld [vmem:[%s5157_s0 + $0x91] sm:$0xff] }
   0xd   :  { %3379 = vmatprep.subr.bf16.mxu0 %v3716_v10  ;;  %v2815_v45 = vld [vmem:[%s5157_s0 + $0x98] sm:$0xff]  ;;  %v2816_v48 = vld [vmem:[%s5157_s0 + $0xa8] sm:$0xff]  ;;  %v2817_v49 = vld [vmem:[%s5157_s0 + $0xb0] sm:$0xff]  ;;  %v4159_v50 = vpack.c.bf16 %v130_v43, %v129_v42 }
   0xe   :  { %v132_v47 = vld [vmem:[%s5157_s0 + $0x99] sm:$0xff]  ;;  %v4161_v51 = vpack.c.bf16 %v2815_v45, %v2814_v44  ;;  %v4165_v53 = vpack.c.bf16 %v2817_v49, %v2816_v48  ;;  %v133_v54 = vld [vmem:[%s5157_s0 + $0xa9] sm:$0xff]  ;;  %v134_v55 = vld [vmem:[%s5157_s0 + $0xb1] sm:$0xff] }
   0xf   :  { %3236 = vmatpush3.bf16.msra.mxu1 %v3715_v6  ;;  %v4163_v52 = vpack.c.bf16 %v132_v47, %v131_v46  ;;  %v2818_v56 = vld [vmem:[%s5157_s0 + $0xc0] sm:$0xff]  ;;  %v2819_v57 = vld [vmem:[%s5157_s0 + $0xc8] sm:$0xff]  ;;  %v2820_v60 = vld [vmem:[%s5157_s0 + $0xd8] sm:$0xff]  ;;  %v4205_v0 = vpack.c.bf16 %v134_v55, %v133_v54 }
  0x10   :  { %3380 = vmatpush3.bf16.msra.mxu0 %v3716_v10  ;;  %3301 = vmatprep.subr.bf16.mxu1 %v3717_v16  ;;  %v135_v58 = vld [vmem:[%s5157_s0 + $0xc1] sm:$0xff]  ;;  %v136_v59 = vld [vmem:[%s5157_s0 + $0xc9] sm:$0xff]  ;;  %v4207_v1 = vpack.c.bf16 %v2819_v57, %v2818_v56  ;;  %v137_v4 = vld [vmem:[%s5157_s0 + $0xd9] sm:$0xff] }
  0x11   :  { %3445 = vmatprep.subr.bf16.mxu0 %v3718_v19  ;;  %v2821_v61 = vld [vmem:[%s5157_s0 + $0xe0] sm:$0xff]  ;;  %v3721_v62 = vld [vmem:[%s5156_s1 + $0x10] sm:$0xff]   ;;  %v4209_v2 = vpack.c.bf16 %v136_v59, %v135_v58  ;;  %v2823_v7 = vld [vmem:[%s5157_s0 + $0xf8] sm:$0xff] }
  0x12   :  { %3238 = vmatmul.mubr.msk.bf16.vlgmr.msra.gmra.mrb[0].mxu1 %vm248_vm0, %v4067_v22  ;;  %v3722_v63 = vld [vmem:[%s5156_s1 + $0x70] sm:$0xff]   ;;  %v4211_v3 = vpack.c.bf16 %v2821_v61, %v2820_v60  ;;  %v138_v5 = vld [vmem:[%s5157_s0 + $0xe1] sm:$0xff]  ;;  %v140_v9 = vld [vmem:[%s5157_s0 + $0xf9] sm:$0xff] }
  0x13   :  { %3382 = vmatmul.mubr.msk.bf16.vlgmr.msra.gmra.mrb[0].mxu0 %vm248_vm0, %v4075_v25  ;;  %3302 = vmatpush3.bf16.msra.mxu1 %v3717_v16  ;;  %v2822_v6 = vld [vmem:[%s5157_s0 + $0xf0] sm:$0xff]  ;;  %v2824_v10 = vld [vmem:[%s5157_s0 + $0x108] sm:$0xff]  ;;  %v4245_v12 = vpack.c.bf16 %v138_v5, %v137_v4  ;;  %v3723_v17 = vld [vmem:[%s5156_s1 + $0x18] sm:$0xff]  }
  0x14   :  { %3446 = vmatpush3.bf16.msra.mxu0 %v3718_v19  ;;  %3241 = vmatprep.mubr.msk.bf16.mxu1 %vm248_vm0, %v4077_v26  ;;  %v139_v8 = vld [vmem:[%s5157_s0 + $0xf1] sm:$0xff]  ;;  %v4247_v14 = vpack.c.bf16 %v2823_v7, %v2822_v6  ;;  %v141_v19 = vld [vmem:[%s5157_s0 + $0x109] sm:$0xff]  ;;  %v2826_v21 = vld [vmem:[%s5157_s0 + $0x120] sm:$0xff] }
  0x15   :  { %3385 = vmatprep.mubr.msk.bf16.mxu0 %vm248_vm0, %v4079_v27  ;;  %3303 = vmatprep.subr.bf16.mxu1 %v3719_v39  ;;  %v2825_v11 = vld [vmem:[%s5157_s0 + $0x110] sm:$0xff]  ;;  %v4249_v15 = vpack.c.bf16 %v140_v9, %v139_v8  ;;  %v3724_v18 = vld [vmem:[%s5156_s1 + $0x78] sm:$0xff]   ;;  %v2827_v23 = vld [vmem:[%s5157_s0 + $0x128] sm:$0xff] }
  0x16   :  { %3447 = vmatprep.subr.bf16.mxu0 %v3720_v41  ;;  %v4251_v16 = vpack.c.bf16 %v2825_v11, %v2824_v10  ;;  %v142_v20 = vld [vmem:[%s5157_s0 + $0x111] sm:$0xff]  ;;  %v143_v24 = vld [vmem:[%s5157_s0 + $0x121] sm:$0xff]  ;;  %v144_v28 = vld [vmem:[%s5157_s0 + $0x129] sm:$0xff]  ;;  %v4293_v32 = vpack.c.bf16 %v2827_v23, %v2826_v21 }
  0x17   :  { %3304 = vmatpush3.bf16.msra.mxu1 %v3719_v39  ;;  %v2828_v29 = vld [vmem:[%s5157_s0 + $0x138] sm:$0xff]  ;;  %v2829_v30 = vld [vmem:[%s5157_s0 + $0x140] sm:$0xff]  ;;  %v4291_v31 = vpack.c.bf16 %v142_v20, %v141_v19  ;;  %v4295_v33 = vpack.c.bf16 %v144_v28, %v143_v24  ;;  %v2832_v45 = vld [vmem:[%s5157_s0 + $0x168] sm:$0xff] }
  0x18   :  { %3448 = vmatpush3.bf16.msra.mxu0 %v3720_v41  ;;  %3305 = vmatprep.subr.bf16.mxu1 %v3721_v62  ;;  %v4297_v34 = vpack.c.bf16 %v2829_v30, %v2828_v29  ;;  %v145_v35 = vld [vmem:[%s5157_s0 + $0x139] sm:$0xff]  ;;  %v146_v39 = vld [vmem:[%s5157_s0 + $0x141] sm:$0xff]  ;;  %v2830_v41 = vld [vmem:[%s5157_s0 + $0x150] sm:$0xff] }
  0x19   :  { %3449 = vmatprep.subr.bf16.mxu0 %v3722_v63  ;;  %v2831_v42 = vld [vmem:[%s5157_s0 + $0x158] sm:$0xff]  ;;  %v2833_v46 = vld [vmem:[%s5157_s0 + $0x170] sm:$0xff]  ;;  %v4331_v47 = vpack.c.bf16 %v146_v39, %v145_v35  ;;  %v2834_v57 = vld [vmem:[%s5157_s0 + $0x180] sm:$0xff] }
  0x1a   :  { %3242 = vmatmul.mubr.msk.bf16.gmra.mrb[4].mxu1 %vm248_vm0, %v4113_v36  ;;  %v147_v43 = vld [vmem:[%s5157_s0 + $0x151] sm:$0xff]  ;;  %v148_v44 = vld [vmem:[%s5157_s0 + $0x159] sm:$0xff]  ;;  %v4333_v48 = vpack.c.bf16 %v2831_v42, %v2830_v41  ;;  %v4337_v54 = vpack.c.bf16 %v2833_v46, %v2832_v45  ;;  %v149_v55 = vld [vmem:[%s5157_s0 + $0x169] sm:$0xff] }
  0x1b   :  { %3386 = vmatmul.mubr.msk.bf16.gmra.mrb[4].mxu0 %vm248_vm0, %v4115_v37  ;;  %3245 = vmatprep.mubr.msk.bf16.mxu1 %vm248_vm0, %v4117_v38  ;;  %v4335_v49 = vpack.c.bf16 %v148_v44, %v147_v43  ;;  %v150_v56 = vld [vmem:[%s5157_s0 + $0x171] sm:$0xff]  ;;  %v2835_v58 = vld [vmem:[%s5157_s0 + $0x188] sm:$0xff]  ;;  %v151_v59 = vld [vmem:[%s5157_s0 + $0x199] sm:$0xff] }
  0x1c   :  { %3389 = vmatprep.mubr.msk.bf16.mxu0 %vm248_vm0, %v4122_v40  ;;  %3306 = vmatpush3.bf16.msra.mxu1 %v3721_v62  ;;  %v152_v60 = vld [vmem:[%s5157_s0 + $0x1a1] sm:$0xff]  ;;  %v2836_v61 = vld [vmem:[%s5157_s0 + $0x1b0] sm:$0xff]  ;;  %v2837_v62 = vld [vmem:[%s5157_s0 + $0x1b8] sm:$0xff]  ;;  %v1123_v4 = vpack.c.bf16 %v2835_v58, %v2834_v57 }
  0x1d   :  { %3450 = vmatpush3.bf16.msra.mxu0 %v3722_v63  ;;  %3307 = vmatprep.subr.bf16.mxu1 %v3723_v17  ;;  %v4371_v63 = vpack.c.bf16 %v150_v56, %v149_v55  ;;  %v199_v5 = vpack.c.bf16 %v152_v60, %v151_v59  ;;  %v4373_v6 = vpack.c.bf16 %v2837_v62, %v2836_v61  ;;  %v153_v7 = vld [vmem:[%s5157_s0 + $0x1b1] sm:$0xff]  ;;  %v154_v8 = vld [vmem:[%s5157_s0 + $0x1b9] sm:$0xff]  ;;  %v2838_v9 = vld [vmem:[%s5157_s0 + $0x1c8] sm:$0xff] }
  0x1e   :  { %3451 = vmatprep.subr.bf16.mxu0 %v3724_v18  ;;  %v2839_v10 = vld [vmem:[%s5157_s0 + $0x1d0] sm:$0xff]  ;;  %v2841_v19 = vld [vmem:[%s5157_s0 + $0x1e8] sm:$0xff]  ;;  %v4405_v20 = vpack.c.bf16 %v154_v8, %v153_v7  ;;  %v2842_v30 = vld [vmem:[%s5157_s0 + $0x1f8] sm:$0xff] }
  0x1f   :  { %v155_v11 = vld [vmem:[%s5157_s0 + $0x1c9] sm:$0xff]  ;;  %v4407_v21 = vpack.c.bf16 %v2839_v10, %v2838_v9  ;;  %v157_v28 = vld [vmem:[%s5157_s0 + $0x1e1] sm:$0xff]  ;;  %v159_v39 = vld [vmem:[%s5157_s0 + $0x1f9] sm:$0xff] }
  0x20   :  { %3308 = vmatpush3.bf16.msra.mxu1 %v3723_v17  ;;  %v156_v17 = vld [vmem:[%s5157_s0 + $0x1d1] sm:$0xff]  ;;  %v158_v29 = vld [vmem:[%s5157_s0 + $0x1e9] sm:$0xff]  ;;  %v2843_v35 = vld [vmem:[%s5157_s0 + $0x200] sm:$0xff] }
  0x21   :  { %3452 = vmatpush3.bf16.msra.mxu0 %v3724_v18  ;;  %v2840_v18 = vld [vmem:[%s5157_s0 + $0x1e0] sm:$0xff]  ;;  %v4409_v23 = vpack.c.bf16 %v156_v17, %v155_v11  ;;  %v2844_v42 = vld [vmem:[%s5157_s0 + $0x210] sm:$0xff]  ;;  %v2845_v43 = vld [vmem:[%s5157_s0 + $0x218] sm:$0xff]  ;;  %v4445_v44 = vpack.c.bf16 %v158_v29, %v157_v28  ;;  %v4447_v45 = vpack.c.bf16 %v2843_v35, %v2842_v30 }
  0x22   :  { %3246 = vmatmul.mubr.msk.bf16.gmra.mrb[8].mxu1 %vm248_vm0, %v4159_v50  ;;  %v4411_v24 = vpack.c.bf16 %v2841_v19, %v2840_v18  ;;  %v160_v41 = vld [vmem:[%s5157_s0 + $0x201] sm:$0xff]  ;;  %v4451_v55 = vpack.c.bf16 %v2845_v43, %v2844_v42  ;;  %v161_v56 = vld [vmem:[%s5157_s0 + $0x211] sm:$0xff]  ;;  %v162_v57 = vld [vmem:[%s5157_s0 + $0x219] sm:$0xff] }
  0x23   :  { %3390 = vmatmul.mubr.msk.bf16.gmra.mrb[8].mxu0 %vm248_vm0, %v4161_v51  ;;  %3249 = vmatprep.mubr.msk.bf16.mxu1 %vm248_vm0, %v4163_v52  ;;  %v4449_v46 = vpack.c.bf16 %v160_v41, %v159_v39  ;;  %v2846_v58 = vld [vmem:[%s5157_s0 + $0x228] sm:$0xff]  ;;  %v2847_v59 = vld [vmem:[%s5157_s0 + $0x230] sm:$0xff]  ;;  %v2848_v62 = vld [vmem:[%s5157_s0 + $0x240] sm:$0xff] }
  0x24   :  { %3393 = vmatprep.mubr.msk.bf16.mxu0 %vm248_vm0, %v4165_v53  ;;  %v163_v60 = vld [vmem:[%s5157_s0 + $0x229] sm:$0xff]  ;;  %v164_v61 = vld [vmem:[%s5157_s0 + $0x231] sm:$0xff]  ;;  %v4487_v7 = vpack.c.bf16 %v2847_v59, %v2846_v58  ;;  %v165_v10 = vld [vmem:[%s5157_s0 + $0x241] sm:$0xff] }
  0x25   :  { %v4489_v8 = vpack.c.bf16 %v164_v61, %v163_v60  ;;  %v166_v11 = vld [vmem:[%s5157_s0 + $0x249] sm:$0xff]  ;;  %v2850_v17 = vld [vmem:[%s5157_s0 + $0x258] sm:$0xff]  ;;  %v2851_v18 = vld [vmem:[%s5157_s0 + $0x260] sm:$0xff] }
  0x26   :  { %v167_v19 = vld [vmem:[%s5157_s0 + $0x259] sm:$0xff]  ;;  %v168_v28 = vld [vmem:[%s5157_s0 + $0x261] sm:$0xff]  ;;  %v2852_v29 = vld [vmem:[%s5157_s0 + $0x270] sm:$0xff]  ;;  %v4525_v35 = vpack.c.bf16 %v166_v11, %v165_v10  ;;  %v4527_v39 = vpack.c.bf16 %v2851_v18, %v2850_v17 }
  0x27   :  { %v2853_v30 = vld [vmem:[%s5157_s0 + $0x278] sm:$0xff]  ;;  %v4529_v41 = vpack.c.bf16 %v168_v28, %v167_v19  ;;  %v2855_v58 = vld [vmem:[%s5157_s0 + $0x290] sm:$0xff]  ;;  %v2856_v61 = vld [vmem:[%s5157_s0 + $0x2a0] sm:$0xff] }
  0x28   :  { %v4531_v42 = vpack.c.bf16 %v2853_v30, %v2852_v29  ;;  %v169_v43 = vld [vmem:[%s5157_s0 + $0x271] sm:$0xff]  ;;  %v171_v59 = vld [vmem:[%s5157_s0 + $0x289] sm:$0xff]  ;;  %v173_v18 = vld [vmem:[%s5157_s0 + $0x2a1] sm:$0xff] }
  0x29   :  { %v172_v60 = vld [vmem:[%s5157_s0 + $0x291] sm:$0xff]  ;;  %v174_v19 = vld [vmem:[%s5157_s0 + $0x2a9] sm:$0xff]  ;;  %v2859_v29 = vld [vmem:[%s5157_s0 + $0x2c0] sm:$0xff] }
  0x2a   :  { %3250 = vmatmul.mubr.msk.bf16.gmra.mrb[12].mxu1 %vm248_vm0, %v4205_v0  ;;  %v4569_v11 = vpack.c.bf16 %v172_v60, %v171_v59  ;;  %v2858_v28 = vld [vmem:[%s5157_s0 + $0x2b8] sm:$0xff] }
  0x2b   :  { %3394 = vmatmul.mubr.msk.bf16.gmra.mrb[12].mxu0 %vm248_vm0, %v4207_v1  ;;  %3253 = vmatprep.mubr.msk.bf16.mxu1 %vm248_vm0, %v4209_v2  ;;  %v175_v30 = vld [vmem:[%s5157_s0 + $0x2b9] sm:$0xff]  ;;  %v4607_v59 = vpack.c.bf16 %v2859_v29, %v2858_v28  ;;  %v2863_v28 = vld [vmem:[%s5157_s0 + $0x2f0] sm:$0xff] }
  0x2c   :  { %3397 = vmatprep.mubr.msk.bf16.mxu0 %vm248_vm0, %v4211_v3  ;;  %v179_v29 = vld [vmem:[%s5157_s0 + $0x2e9] sm:$0xff] }
  0x2d   :  { %5164 = vst [vmem:[#allocation2_spill] sm:$0xff] %v4607_v59 }
  0x32   :  { %3254 = vmatmul.mubr.msk.bf16.gmra.mrb[16].mxu1 %vm248_vm0, %v4245_v12 }
  0x33   :  { %3398 = vmatmul.mubr.msk.bf16.gmra.mrb[16].mxu0 %vm248_vm0, %v4247_v14  ;;  %3257 = vmatprep.mubr.msk.bf16.mxu1 %vm248_vm0, %v4249_v15 }
  0x34   :  { %3401 = vmatprep.mubr.msk.bf16.mxu0 %vm248_vm0, %v4251_v16 }
  0x3a   :  { %3258 = vmatmul.mubr.msk.bf16.gmra.mrb[20].mxu1 %vm248_vm0, %v4291_v31 }
  0x3b   :  { %3402 = vmatmul.mubr.msk.bf16.gmra.mrb[20].mxu0 %vm248_vm0, %v4293_v32  ;;  %3261 = vmatprep.mubr.msk.bf16.mxu1 %vm248_vm0, %v4295_v33 }
  0x3c   :  { %3405 = vmatprep.mubr.msk.bf16.mxu0 %vm248_vm0, %v4297_v34 }
  0x42   :  { %3262 = vmatmul.mubr.msk.bf16.gmra.mrb[24].mxu1 %vm248_vm0, %v4331_v47 }
  0x43   :  { %3406 = vmatmul.mubr.msk.bf16.gmra.mrb[24].mxu0 %vm248_vm0, %v4333_v48  ;;  %3265 = vmatprep.mubr.msk.bf16.mxu1 %vm248_vm0, %v4335_v49 }
  0x44   :  { %3409 = vmatprep.mubr.msk.bf16.mxu0 %vm248_vm0, %v4337_v54 }
  0x4a   :  { %3266 = vmatmul.mubr.msk.bf16.gmra.mrb[28].mxu1 %vm248_vm0, %v4371_v63 }
  0x4b   :  { %3410 = vmatmul.mubr.msk.bf16.gmra.mrb[28].mxu0 %vm248_vm0, %v1123_v4  ;;  %3269 = vmatprep.mubr.msk.bf16.mxu1 %vm248_vm0, %v199_v5  ;;  %v2849_v4 = vld [vmem:[%s5157_s0 + $0x248] sm:$0xff]  ;;  %v4485_v5 = vpack.c.bf16 %v162_v57, %v161_v56  ;;  %v170_v56 = vld [vmem:[%s5157_s0 + $0x279] sm:$0xff] }
  0x4c   :  { %3413 = vmatprep.mubr.msk.bf16.mxu0 %vm248_vm0, %v4373_v6  ;;  %v4491_v9 = vpack.c.bf16 %v2849_v4, %v2848_v62  ;;  %v2854_v57 = vld [vmem:[%s5157_s0 + $0x288] sm:$0xff]  ;;  %v4565_v4 = vpack.c.bf16 %v170_v56, %v169_v43  ;;  %v2860_v56 = vld [vmem:[%s5157_s0 + $0x2d0] sm:$0xff] }
  0x4d   :  { %v2857_v62 = vld [vmem:[%s5157_s0 + $0x2a8] sm:$0xff]  ;;  %v4567_v10 = vpack.c.bf16 %v2855_v58, %v2854_v57  ;;  %v2861_v57 = vld [vmem:[%s5157_s0 + $0x2d8] sm:$0xff]  ;;  %v4605_v58 = vpack.c.bf16 %v174_v19, %v173_v18 }
  0x4e   :  { %v4571_v17 = vpack.c.bf16 %v2857_v62, %v2856_v61  ;;  %v176_v43 = vld [vmem:[%s5157_s0 + $0x2c1] sm:$0xff]  ;;  %v4611_v61 = vpack.c.bf16 %v2861_v57, %v2860_v56  ;;  %v177_v62 = vld [vmem:[%s5157_s0 + $0x2d1] sm:$0xff]  ;;  %v178_v18 = vld [vmem:[%s5157_s0 + $0x2d9] sm:$0xff] }
  0x4f   :  { %v4609_v60 = vpack.c.bf16 %v176_v43, %v175_v30  ;;  %v2862_v19 = vld [vmem:[%s5157_s0 + $0x2e8] sm:$0xff]  ;;  %v180_v30 = vld [vmem:[%s5157_s0 + $0x2f1] sm:$0xff]  ;;  %v2864_v43 = vld [vmem:[%s5157_s0 + $0x300] sm:$0xff]  ;;  %v4645_v57 = vpack.c.bf16 %v178_v18, %v177_v62 }
  0x50   :  { %5166 = vst [vmem:[#allocation4_spill] sm:$0xff] %v4611_v61  ;;  %v2865_v56 = vld [vmem:[%s5157_s0 + $0x308] sm:$0xff] }
  0x51   :  { %5165 = vst [vmem:[#allocation3_spill] sm:$0xff] %v4609_v60  ;;  %v181_v62 = vld [vmem:[%s5157_s0 + $0x301] sm:$0xff]  ;;  %v182_v18 = vld [vmem:[%s5157_s0 + $0x309] sm:$0xff] }
  0x52   :  { %3270 = vmatmul.mubr.msk.bf16.gmra.mrb[32].mxu1 %vm248_vm0, %v4405_v20 }
  0x53   :  { %3414 = vmatmul.mubr.msk.bf16.gmra.mrb[32].mxu0 %vm248_vm0, %v4407_v21  ;;  %3273 = vmatprep.mubr.msk.bf16.mxu1 %vm248_vm0, %v4409_v23 }
  0x54   :  { %3417 = vmatprep.mubr.msk.bf16.mxu0 %vm248_vm0, %v4411_v24 }
  0x5a   :  { %3274 = vmatmul.mubr.msk.bf16.gmra.mrb[36].mxu1 %vm248_vm0, %v4445_v44 }
  0x5b   :  { %3418 = vmatmul.mubr.msk.bf16.gmra.mrb[36].mxu0 %vm248_vm0, %v4447_v45  ;;  %3277 = vmatprep.mubr.msk.bf16.mxu1 %vm248_vm0, %v4449_v46 }
  0x5c   :  { %3421 = vmatprep.mubr.msk.bf16.mxu0 %vm248_vm0, %v4451_v55 }
  0x62   :  { %3278 = vmatmul.mubr.msk.bf16.gmra.mrb[40].mxu1 %vm248_vm0, %v4485_v5 }
  0x63   :  { %3422 = vmatmul.mubr.msk.bf16.gmra.mrb[40].mxu0 %vm248_vm0, %v4487_v7  ;;  %3281 = vmatprep.mubr.msk.bf16.mxu1 %vm248_vm0, %v4489_v8 }
  0x64   :  { %3425 = vmatprep.mubr.msk.bf16.mxu0 %vm248_vm0, %v4491_v9 }
  0x6a   :  { %3282 = vmatmul.mubr.msk.bf16.gmra.mrb[44].mxu1 %vm248_vm0, %v4525_v35 }
  0x6b   :  { %3426 = vmatmul.mubr.msk.bf16.gmra.mrb[44].mxu0 %vm248_vm0, %v4527_v39  ;;  %3285 = vmatprep.mubr.msk.bf16.mxu1 %vm248_vm0, %v4529_v41 }
  0x6c   :  { %3429 = vmatprep.mubr.msk.bf16.mxu0 %vm248_vm0, %v4531_v42 }
  0x72   :  { %3286 = vmatmul.mubr.msk.bf16.gmra.mrb[48].mxu1 %vm248_vm0, %v4565_v4 }
  0x73   :  { %3430 = vmatmul.mubr.msk.bf16.gmra.mrb[48].mxu0 %vm248_vm0, %v4567_v10  ;;  %3289 = vmatprep.mubr.msk.bf16.mxu1 %vm248_vm0, %v4569_v11 }
  0x74   :  { %3433 = vmatprep.mubr.msk.bf16.mxu0 %vm248_vm0, %v4571_v17 }
  0x7a   :  { %3290 = vmatmul.mubr.msk.bf16.gmra.mrb[52].mxu1 %vm248_vm0, %v4605_v58 }
  0x7b   :  { %3434 = vmatmul.mubr.msk.bf16.gmra.mrb[52].mxu0 %vm248_vm0, %v4607_v59  ;;  %3293 = vmatprep.mubr.msk.bf16.mxu1 %vm248_vm0, %v4609_v60  ;;  %v4649_v59 = vpack.c.bf16 %v180_v30, %v179_v29  ;;  %v4651_v60 = vpack.c.bf16 %v2865_v56, %v2864_v43  ;;  %v15_v29 = vld [vmem:[%s5157_s0] sm:$0xff]  ;;  %v16_v30 = vld [vmem:[%s5157_s0 + $0x8] sm:$0xff]  ;;  %v4679_v43 = vpack.c.bf16 %v182_v18, %v181_v62 }
  0x7c   :  { %3437 = vmatprep.mubr.msk.bf16.mxu0 %vm248_vm0, %v4611_v61  ;;  %v4647_v61 = vpack.c.bf16 %v2863_v28, %v2862_v19  ;;  %v2866_v19 = vld [vmem:[%s5157_s0 + $0x318] sm:$0xff]  ;;  %v2867_v28 = vld [vmem:[%s5157_s0 + $0x320] sm:$0xff] }
  0x7d   :  { %v1139_v56 = vpack.c.bf16 %v2867_v28, %v2866_v19 }
  0x7e   :  { %5167 = vst [vmem:[#allocation5_spill] sm:$0xff] %v4647_v61 }
  0x82   :  { %3294 = vmatmul.mubr.msk.bf16.gmra.mrb[56].mxu1 %vm248_vm0, %v4645_v57 }
  0x83   :  { %3438 = vmatmul.mubr.msk.bf16.gmra.mrb[56].mxu0 %vm248_vm0, %v4647_v61  ;;  %3297 = vmatprep.mubr.msk.bf16.mxu1 %vm248_vm0, %v4649_v59  ;;  %v79_v61 = vpack.c.bf16 %v16_v30, %v15_v29 }
  0x84   :  { %3441 = vmatprep.mubr.msk.bf16.mxu0 %vm248_vm0, %v4651_v60 }
  0x8a   :  { %3298 = vmatmul.mubr.msk.bf16.gmra.mrb[60].mxu1 %vm248_vm0, %v4679_v43 }
  0x8b   :  { %3442 = vmatmul.mubr.msk.bf16.gmra.mrb[60].mxu0 %vm248_vm0, %v1139_v56  ;;  %3309 = vmatprep.mubr.msk.bf16.mxu1 %vm248_vm0, %v79_v61 }
  0x8c   :  { %3453 = vmatprep.mubr.msk.bf16.mxu0 %vm248_vm0, %v4067_v22  ;;  %v2943_v22 = vld [vmem:[%s5157_s0 + $0x189] sm:$0xff] }
  0x92   :  { %3310 = vmatmul.mubr.msk.bf16.vlgmr.msra.gmra.mrb[0].mxu1 %vm248_vm0, %v4038_v13  ;;  %v2942_v13 = vld [vmem:[%s5157_s0 + $0x181] sm:$0xff] }
  0x93   :  { %3454 = vmatmul.mubr.msk.bf16.vlgmr.msra.gmra.mrb[0].mxu0 %vm248_vm0, %v4077_v26  ;;  %3313 = vmatprep.mubr.msk.bf16.mxu1 %vm248_vm0, %v4075_v25  ;;  %v47_v25 = vld [vmem:[%s5157_s0 + $0x198] sm:$0xff]  ;;  %v48_v26 = vld [vmem:[%s5157_s0 + $0x1a0] sm:$0xff] }
  0x94   :  { %3457 = vmatprep.mubr.msk.bf16.mxu0 %vm248_vm0, %v4113_v36  ;;  %v95_v36 = vpack.c.bf16 %v48_v26, %v47_v25 }
  0x9a   :  { %3314 = vmatmul.mubr.msk.bf16.gmra.mrb[4].mxu1 %vm248_vm0, %v4079_v27  ;;  %v1701_v27 = vpack.c.bf16 %v2943_v22, %v2942_v13 }
  0x9b   :  { %3458 = vmatmul.mubr.msk.bf16.gmra.mrb[4].mxu0 %vm248_vm0, %v4117_v38  ;;  %3317 = vmatprep.mubr.msk.bf16.mxu1 %vm248_vm0, %v4115_v37  ;;  %v5168_v37 = vld [vmem:[#allocation3_spill] sm:$0xff]  ;;  %v5169_v38 = vld [vmem:[#allocation2_spill] sm:$0xff] }
  0x9c   :  { %3461 = vmatprep.mubr.msk.bf16.mxu0 %vm248_vm0, %v4159_v50  ;;  %v5171_v50 = vld [vmem:[#allocation5_spill] sm:$0xff] }
  0xa2   :  { %3318 = vmatmul.mubr.msk.bf16.gmra.mrb[8].mxu1 %vm248_vm0, %v4122_v40  ;;  %v5170_v40 = vld [vmem:[#allocation4_spill] sm:$0xff] }
  0xa3   :  { %3462 = vmatmul.mubr.msk.bf16.gmra.mrb[8].mxu0 %vm248_vm0, %v4163_v52  ;;  %3321 = vmatprep.mubr.msk.bf16.mxu1 %vm248_vm0, %v4161_v51  ;;  %v2974_v51 = vld [vmem:[%s5157_s0 + $0x319] sm:$0xff]  ;;  %v2975_v52 = vld [vmem:[%s5157_s0 + $0x321] sm:$0xff] }
  0xa4   :  { %3465 = vmatprep.mubr.msk.bf16.mxu0 %vm248_vm0, %v4205_v0 }
  0xaa   :  { %3322 = vmatmul.mubr.msk.bf16.gmra.mrb[12].mxu1 %vm248_vm0, %v4165_v53  ;;  %v1717_v53 = vpack.c.bf16 %v2975_v52, %v2974_v51 }
  0xab   :  { %3466 = vmatmul.mubr.msk.bf16.gmra.mrb[12].mxu0 %vm248_vm0, %v4209_v2  ;;  %3325 = vmatprep.mubr.msk.bf16.mxu1 %vm248_vm0, %v4207_v1  ;;  %v4829_v2 = vld [vmem:[%s5158_s2] ss:$0 sm:$0xff] }
  0xac   :  { %3469 = vmatprep.mubr.msk.bf16.mxu0 %vm248_vm0, %v4245_v12 }
  0xb2   :  { %3326 = vmatmul.mubr.msk.bf16.gmra.mrb[16].mxu1 %vm248_vm0, %v4211_v3 }
  0xb3   :  { %3470 = vmatmul.mubr.msk.bf16.gmra.mrb[16].mxu0 %vm248_vm0, %v4249_v15  ;;  %3329 = vmatprep.mubr.msk.bf16.mxu1 %vm248_vm0, %v4247_v14 }
  0xb4   :  { %3473 = vmatprep.mubr.msk.bf16.mxu0 %vm248_vm0, %v4291_v31 }
  0xba   :  { %3330 = vmatmul.mubr.msk.bf16.gmra.mrb[20].mxu1 %vm248_vm0, %v4251_v16 }
  0xbb   :  { %3474 = vmatmul.mubr.msk.bf16.gmra.mrb[20].mxu0 %vm248_vm0, %v4295_v33  ;;  %3333 = vmatprep.mubr.msk.bf16.mxu1 %vm248_vm0, %v4293_v32 }
  0xbc   :  { %3477 = vmatprep.mubr.msk.bf16.mxu0 %vm248_vm0, %v4331_v47 }
  0xc2   :  { %3334 = vmatmul.mubr.msk.bf16.gmra.mrb[24].mxu1 %vm248_vm0, %v4297_v34 }
  0xc3   :  { %3478 = vmatmul.mubr.msk.bf16.gmra.mrb[24].mxu0 %vm248_vm0, %v4335_v49  ;;  %3337 = vmatprep.mubr.msk.bf16.mxu1 %vm248_vm0, %v4333_v48 }
  0xc4   :  { %3481 = vmatprep.mubr.msk.bf16.mxu0 %vm248_vm0, %v4371_v63 }
  0xca   :  { %3338 = vmatmul.mubr.msk.bf16.gmra.mrb[28].mxu1 %vm248_vm0, %v4337_v54 }
  0xcb   :  { %3482 = vmatmul.mubr.msk.bf16.gmra.mrb[28].mxu0 %vm248_vm0, %v1701_v27  ;;  %3341 = vmatprep.mubr.msk.bf16.mxu1 %vm248_vm0, %v95_v36 }
  0xcc   :  { %3485 = vmatprep.mubr.msk.bf16.mxu0 %vm248_vm0, %v4405_v20 }
  0xd2   :  { %3342 = vmatmul.mubr.msk.bf16.gmra.mrb[32].mxu1 %vm248_vm0, %v4373_v6 }
  0xd3   :  { %3486 = vmatmul.mubr.msk.bf16.gmra.mrb[32].mxu0 %vm248_vm0, %v4409_v23  ;;  %3345 = vmatprep.mubr.msk.bf16.mxu1 %vm248_vm0, %v4407_v21 }
  0xd4   :  { %3489 = vmatprep.mubr.msk.bf16.mxu0 %vm248_vm0, %v4445_v44 }
  0xda   :  { %3346 = vmatmul.mubr.msk.bf16.gmra.mrb[36].mxu1 %vm248_vm0, %v4411_v24 }
  0xdb   :  { %3490 = vmatmul.mubr.msk.bf16.gmra.mrb[36].mxu0 %vm248_vm0, %v4449_v46  ;;  %3349 = vmatprep.mubr.msk.bf16.mxu1 %vm248_vm0, %v4447_v45 }
  0xdc   :  { %3493 = vmatprep.mubr.msk.bf16.mxu0 %vm248_vm0, %v4485_v5 }
  0xe2   :  { %3350 = vmatmul.mubr.msk.bf16.gmra.mrb[40].mxu1 %vm248_vm0, %v4451_v55 }
  0xe3   :  { %3494 = vmatmul.mubr.msk.bf16.gmra.mrb[40].mxu0 %vm248_vm0, %v4489_v8  ;;  %3353 = vmatprep.mubr.msk.bf16.mxu1 %vm248_vm0, %v4487_v7 }
  0xe4   :  { %3497 = vmatprep.mubr.msk.bf16.mxu0 %vm248_vm0, %v4525_v35 }
  0xea   :  { %3354 = vmatmul.mubr.msk.bf16.gmra.mrb[44].mxu1 %vm248_vm0, %v4491_v9 }
  0xeb   :  { %3498 = vmatmul.mubr.msk.bf16.gmra.mrb[44].mxu0 %vm248_vm0, %v4529_v41  ;;  %3357 = vmatprep.mubr.msk.bf16.mxu1 %vm248_vm0, %v4527_v39 }
  0xec   :  { %3501 = vmatprep.mubr.msk.bf16.mxu0 %vm248_vm0, %v4565_v4 }
  0xf2   :  { %3358 = vmatmul.mubr.msk.bf16.gmra.mrb[48].mxu1 %vm248_vm0, %v4531_v42 }
  0xf3   :  { %3502 = vmatmul.mubr.msk.bf16.gmra.mrb[48].mxu0 %vm248_vm0, %v4569_v11  ;;  %3361 = vmatprep.mubr.msk.bf16.mxu1 %vm248_vm0, %v4567_v10 }
  0xf4   :  { %3505 = vmatprep.mubr.msk.bf16.mxu0 %vm248_vm0, %v4605_v58 }
  0xfa   :  { %3362 = vmatmul.mubr.msk.bf16.gmra.mrb[52].mxu1 %vm248_vm0, %v4571_v17 }
  0xfb   :  { %3506 = vmatmul.mubr.msk.bf16.gmra.mrb[52].mxu0 %vm248_vm0, %v5168_v37  ;;  %3365 = vmatprep.mubr.msk.bf16.mxu1 %vm248_vm0, %v5169_v38 }
  0xfc   :  { %3509 = vmatprep.mubr.msk.bf16.mxu0 %vm248_vm0, %v4645_v57 }
 0x102   :  { %3366 = vmatmul.mubr.msk.bf16.gmra.mrb[56].mxu1 %vm248_vm0, %v5170_v40 }
 0x103   :  { %3510 = vmatmul.mubr.msk.bf16.gmra.mrb[56].mxu0 %vm248_vm0, %v4649_v59  ;;  %3369 = vmatprep.mubr.msk.bf16.mxu1 %vm248_vm0, %v5171_v50 }
 0x104   :  { %3513 = vmatprep.mubr.msk.bf16.mxu0 %vm248_vm0, %v4679_v43 }
 0x10a   :  { %3370 = vmatmul.mubr.msk.bf16.gmra.mrb[60].mxu1 %vm248_vm0, %v4651_v60 }
 0x10b   :  { %3514 = vmatmul.mubr.msk.bf16.gmra.mrb[60].mxu0 %vm248_vm0, %v1717_v53 }
 0x165   :  { %v3311_v0 = vpop.f32.mrb[0].mxu1 }
 0x166   :  { %v3455_v1 = vpop.f32.mrb[0].mxu0  ;;  %v788_v3 = vpop.f32.mrb[1].mxu1 }
 0x167   :  { %v3517_v12 = vadd.f32 %v3455_v1, %v3311_v0  ;;  %v1881_v14 = vpop.f32.mrb[1].mxu0  ;;  %v3312_v15 = vpop.f32.mrb[2].mxu1 }
 0x168   :  { %v3518_v16 = vadd.f32 %v1881_v14, %v788_v3  ;;  %v3456_v31 = vpop.f32.mrb[2].mxu0  ;;  %v791_v32 = vpop.f32.mrb[3].mxu1 }
 0x169   :  { %v2209_v33 = vadd.f32 %v3517_v12, %v4829_v2  ;;  %v3519_v34 = vadd.f32 %v3456_v31, %v3312_v15  ;;  %v1884_v47 = vpop.f32.mrb[3].mxu0 }
 0x16a   :  { %v2207_v48 = vadd.f32 %v3518_v16, %v4829_v2  ;;  %v3520_v49 = vadd.f32 %v1884_v47, %v791_v32 }
 0x16b   :  { %v3023_v54 = vmul.f32 -1.442695, %v2209_v33  ;;  %v2210_v63 = vadd.f32 %v3519_v34, %v4829_v2 }
 0x16c   :  { %v3021_v6 = vmul.f32 -1.442695, %v2207_v48  ;;  %v2208_v20 = vadd.f32 %v3520_v49, %v4829_v2 }
 0x16d   :  { %3725 = vpow2.f32 %v3023_v54  ;;  %v3024_v21 = vmul.f32 -1.442695, %v2210_v63  ;;  %v3315_v23 = vpop.f32.mrb[4].mxu1 }
 0x16e   :  { %3727 = vpow2.f32 %v3021_v6  ;;  %v3022_v24 = vmul.f32 -1.442695, %v2208_v20  ;;  %v3459_v44 = vpop.f32.mrb[4].mxu0  ;;  %v804_v45 = vpop.f32.mrb[5].mxu1 }
 0x16f   :  { %3729 = vpow2.f32 %v3024_v21  ;;  %v3521_v46 = vadd.f32 %v3459_v44, %v3315_v23  ;;  %v1897_v55 = vpop.f32.mrb[5].mxu0  ;;  %v3316_v5 = vpop.f32.mrb[6].mxu1 }
 0x170   :  { %3731 = vpow2.f32 %v3022_v24  ;;  %v3522_v7 = vadd.f32 %v1897_v55, %v804_v45  ;;  %v3460_v8 = vpop.f32.mrb[6].mxu0  ;;  %v807_v9 = vpop.f32.mrb[7].mxu1 }
 0x171   :  { %v2213_v35 = vadd.f32 %v3521_v46, %v4829_v2  ;;  %v3523_v39 = vadd.f32 %v3460_v8, %v3316_v5  ;;  %v1900_v41 = vpop.f32.mrb[7].mxu0 }
 0x172   :  { %v2211_v42 = vadd.f32 %v3522_v7, %v4829_v2  ;;  %v3524_v4 = vadd.f32 %v1900_v41, %v807_v9 }
 0x173   :  { %v3027_v10 = vmul.f32 -1.442695, %v2213_v35  ;;  %v2214_v11 = vadd.f32 %v3523_v39, %v4829_v2 }
 0x174   :  { %v3025_v17 = vmul.f32 -1.442695, %v2211_v42  ;;  %v2212_v58 = vadd.f32 %v3524_v4, %v4829_v2 }
 0x175   :  { %3733 = vpow2.f32 %v3027_v10  ;;  %v3028_v59 = vmul.f32 -1.442695, %v2214_v11  ;;  %v3319_v60 = vpop.f32.mrb[8].mxu1 }
 0x176   :  { %3735 = vpow2.f32 %v3025_v17  ;;  %v3026_v61 = vmul.f32 -1.442695, %v2212_v58  ;;  %v3463_v57 = vpop.f32.mrb[8].mxu0  ;;  %v820_v62 = vpop.f32.mrb[9].mxu1 }
 0x177   :  { %v3726_v18 = vpop.eup %3725  ;;  %3737 = vpow2.f32 %v3028_v59  ;;  %v3525_v19 = vadd.f32 %v3463_v57, %v3319_v60  ;;  %v1913_v28 = vpop.f32.mrb[9].mxu0 }
 0x178   :  { %v3320_v29 = vpop.f32.mrb[10].mxu1  ;;  %v3728_v30 = vpop.eup %3727  ;;  %v2465_v43 = vadd.f32 1.0, %v3726_v18  ;;  %3739 = vpow2.f32 %v3026_v61  ;;  %v3526_v56 = vadd.f32 %v1913_v28, %v820_v62 }
 0x179   :  { %v3464_v13 = vpop.f32.mrb[10].mxu0  ;;  %v823_v22 = vpop.f32.mrb[11].mxu1  ;;  %v2463_v26 = vadd.f32 1.0, %v3728_v30  ;;  %v2217_v27 = vadd.f32 %v3525_v19, %v4829_v2 }
 0x17a   :  { %v3730_v25 = vpop.eup %3729  ;;  %v3527_v36 = vadd.f32 %v3464_v13, %v3320_v29  ;;  %v1916_v37 = vpop.f32.mrb[11].mxu0  ;;  %3741 = vrcp.f32 %v2465_v43  ;;  %v2215_v50 = vadd.f32 %v3526_v56, %v4829_v2 }
 0x17b   :  { %v3732_v38 = vpop.eup %3731  ;;  %v2466_v40 = vadd.f32 1.0, %v3730_v25  ;;  %v3528_v51 = vadd.f32 %v1916_v37, %v823_v22  ;;  %3743 = vrcp.f32 %v2463_v26  ;;  %v3031_v53 = vmul.f32 -1.442695, %v2217_v27 }
 0x17c   :  { %v2464_v52 = vadd.f32 1.0, %v3732_v38  ;;  %v2218_v0 = vadd.f32 %v3527_v36, %v4829_v2  ;;  %v3029_v1 = vmul.f32 -1.442695, %v2215_v50 }
 0x17d   :  { %3745 = vrcp.f32 %v2466_v40  ;;  %v2216_v3 = vadd.f32 %v3528_v51, %v4829_v2  ;;  %v3323_v14 = vpop.f32.mrb[12].mxu1 }
 0x17e   :  { %3747 = vrcp.f32 %v2464_v52  ;;  %v3032_v12 = vmul.f32 -1.442695, %v2218_v0  ;;  %v3467_v16 = vpop.f32.mrb[12].mxu0  ;;  %v836_v31 = vpop.f32.mrb[13].mxu1 }
 0x17f   :  { %3749 = vpow2.f32 %v3031_v53  ;;  %v3030_v15 = vmul.f32 -1.442695, %v2216_v3  ;;  %v3734_v32 = vpop.eup %3733  ;;  %v3529_v33 = vadd.f32 %v3467_v16, %v3323_v14  ;;  %v1929_v34 = vpop.f32.mrb[13].mxu0 }
 0x180   :  { %3751 = vpow2.f32 %v3029_v1  ;;  %v3324_v47 = vpop.f32.mrb[14].mxu1  ;;  %v3736_v48 = vpop.eup %3735  ;;  %v2469_v49 = vadd.f32 1.0, %v3734_v32  ;;  %v3530_v54 = vadd.f32 %v1929_v34, %v836_v31 }
 0x181   :  { %3753 = vpow2.f32 %v3032_v12  ;;  %v3468_v63 = vpop.f32.mrb[14].mxu0  ;;  %v839_v6 = vpop.f32.mrb[15].mxu1  ;;  %v2467_v21 = vadd.f32 1.0, %v3736_v48  ;;  %v2221_v23 = vadd.f32 %v3529_v33, %v4829_v2 }
 0x182   :  { %v3738_v20 = vpop.eup %3737  ;;  %3755 = vpow2.f32 %v3030_v15  ;;  %v3531_v24 = vadd.f32 %v3468_v63, %v3324_v47  ;;  %v1932_v44 = vpop.f32.mrb[15].mxu0  ;;  %v2219_v55 = vadd.f32 %v3530_v54, %v4829_v2 }
 0x183   :  { %v3740_v45 = vpop.eup %3739  ;;  %3757 = vrcp.f32 %v2469_v49  ;;  %v2470_v46 = vadd.f32 1.0, %v3738_v20  ;;  %v3532_v5 = vadd.f32 %v1932_v44, %v839_v6  ;;  %v3035_v8 = vmul.f32 -1.442695, %v2221_v23 }
 0x184   :  { %3759 = vrcp.f32 %v2467_v21  ;;  %v2468_v7 = vadd.f32 1.0, %v3740_v45  ;;  %v2222_v9 = vadd.f32 %v3531_v24, %v4829_v2  ;;  %v3742_v35 = vpop.eup %3741  ;;  %v3033_v39 = vmul.f32 -1.442695, %v2219_v55 }
 0x185   :  { %3761 = vrcp.f32 %v2470_v46  ;;  %v2220_v41 = vadd.f32 %v3532_v5, %v4829_v2  ;;  %v3744_v42 = vpop.eup %3743  ;;  %2658 = vst.msk [vmem:[%s5159_s3 + $0x10] sm:$0xff] %vm2655_vm1, %v3742_v35  ;;  %v3327_v10 = vpop.f32.mrb[16].mxu1 }
 0x186   :  { %3763 = vrcp.f32 %v2468_v7  ;;  %v3036_v4 = vmul.f32 -1.442695, %v2222_v9  ;;  %2656 = vst.msk [vmem:[%s5159_s3] sm:$0xff] %vm2655_vm1, %v3744_v42  ;;  %v3471_v58 = vpop.f32.mrb[16].mxu0  ;;  %v852_v59 = vpop.f32.mrb[17].mxu1 }
 0x187   :  { %v3746_v11 = vpop.eup %3745  ;;  %3765 = vpow2.f32 %v3035_v8  ;;  %v3034_v17 = vmul.f32 -1.442695, %v2220_v41  ;;  %v3533_v61 = vadd.f32 %v3471_v58, %v3327_v10  ;;  %v1945_v57 = vpop.f32.mrb[17].mxu0 }
 0x188   :  { %v3748_v60 = vpop.eup %3747  ;;  %2659 = vst.msk [vmem:[%s5159_s3 + $0x18] sm:$0xff] %vm2655_vm1, %v3746_v11  ;;  %3767 = vpow2.f32 %v3033_v39  ;;  %v3328_v62 = vpop.f32.mrb[18].mxu1  ;;  %v3534_v19 = vadd.f32 %v1945_v57, %v852_v59 }
 0x189   :  { %v3750_v18 = vpop.eup %3749  ;;  %2657 = vst.msk [vmem:[%s5159_s3 + $0x8] sm:$0xff] %vm2655_vm1, %v3748_v60  ;;  %3769 = vpow2.f32 %v3036_v4  ;;  %v3472_v28 = vpop.f32.mrb[18].mxu0  ;;  %v2225_v56 = vadd.f32 %v3533_v61, %v4829_v2 }
 0x18a   :  { %v855_v29 = vpop.f32.mrb[19].mxu1  ;;  %v3752_v30 = vpop.eup %3751  ;;  %v2473_v43 = vadd.f32 1.0, %v3750_v18  ;;  %3771 = vpow2.f32 %v3034_v17  ;;  %v3535_v13 = vadd.f32 %v3472_v28, %v3328_v62  ;;  %v2223_v27 = vadd.f32 %v3534_v19, %v4829_v2 }
 0x18b   :  { %v1948_v22 = vpop.f32.mrb[19].mxu0  ;;  %v3754_v25 = vpop.eup %3753  ;;  %v2471_v26 = vadd.f32 1.0, %v3752_v30  ;;  %v3039_v40 = vmul.f32 -1.442695, %v2225_v56 }
 0x18c   :  { %v3536_v36 = vadd.f32 %v1948_v22, %v855_v29  ;;  %v3756_v37 = vpop.eup %3755  ;;  %3773 = vrcp.f32 %v2473_v43  ;;  %v2474_v38 = vadd.f32 1.0, %v3754_v25  ;;  %v2226_v50 = vadd.f32 %v3535_v13, %v4829_v2 }
 0x18d   :  { %v3758_v51 = vpop.eup %3757  ;;  %3775 = vrcp.f32 %v2471_v26  ;;  %v2472_v52 = vadd.f32 1.0, %v3756_v37  ;;  %v3037_v53 = vmul.f32 -1.442695, %v2223_v27  ;;  %v3331_v12 = vpop.f32.mrb[20].mxu1 }
 0x18e   :  { %v2224_v0 = vadd.f32 %v3536_v36, %v4829_v2  ;;  %v3760_v1 = vpop.eup %3759  ;;  %2662 = vst.msk [vmem:[%s5159_s3 + $0x30] sm:$0xff] %vm2655_vm1, %v3758_v51  ;;  %3777 = vrcp.f32 %v2474_v38  ;;  %v3040_v3 = vmul.f32 -1.442695, %v2226_v50  ;;  %v3475_v16 = vpop.f32.mrb[20].mxu0 }
 0x18f   :  { %v3762_v14 = vpop.eup %3761  ;;  %2660 = vst.msk [vmem:[%s5159_s3 + $0x20] sm:$0xff] %vm2655_vm1, %v3760_v1  ;;  %3779 = vrcp.f32 %v2472_v52  ;;  %v868_v31 = vpop.f32.mrb[21].mxu1  ;;  %v3537_v33 = vadd.f32 %v3475_v16, %v3331_v12 }
 0x190   :  { %v3038_v15 = vmul.f32 -1.442695, %v2224_v0  ;;  %v3764_v32 = vpop.eup %3763  ;;  %2663 = vst.msk [vmem:[%s5159_s3 + $0x38] sm:$0xff] %vm2655_vm1, %v3762_v14  ;;  %3781 = vpow2.f32 %v3039_v40  ;;  %v1961_v34 = vpop.f32.mrb[21].mxu0 }
 0x191   :  { %v3332_v47 = vpop.f32.mrb[22].mxu1  ;;  %v3766_v48 = vpop.eup %3765  ;;  %2661 = vst.msk [vmem:[%s5159_s3 + $0x28] sm:$0xff] %vm2655_vm1, %v3764_v32  ;;  %3783 = vpow2.f32 %v3037_v53  ;;  %v3538_v49 = vadd.f32 %v1961_v34, %v868_v31  ;;  %v2229_v21 = vadd.f32 %v3537_v33, %v4829_v2 }
 0x192   :  { %v3476_v54 = vpop.f32.mrb[22].mxu0  ;;  %v871_v63 = vpop.f32.mrb[23].mxu1  ;;  %v2477_v20 = vadd.f32 1.0, %v3766_v48  ;;  %3785 = vpow2.f32 %v3040_v3 }
 0x193   :  { %v3768_v6 = vpop.eup %3767  ;;  %v3539_v23 = vadd.f32 %v3476_v54, %v3332_v47  ;;  %v1964_v24 = vpop.f32.mrb[23].mxu0  ;;  %3787 = vpow2.f32 %v3038_v15  ;;  %v2227_v46 = vadd.f32 %v3538_v49, %v4829_v2  ;;  %v3043_v8 = vmul.f32 -1.442695, %v2229_v21 }
 0x194   :  { %v3770_v44 = vpop.eup %3769  ;;  %v2475_v45 = vadd.f32 1.0, %v3768_v6  ;;  %v3540_v55 = vadd.f32 %v1964_v24, %v871_v63  ;;  %3789 = vrcp.f32 %v2477_v20 }
 0x195   :  { %v3772_v5 = vpop.eup %3771  ;;  %v2478_v7 = vadd.f32 1.0, %v3770_v44  ;;  %v2230_v9 = vadd.f32 %v3539_v23, %v4829_v2  ;;  %v3041_v39 = vmul.f32 -1.442695, %v2227_v46  ;;  %v3335_v10 = vpop.f32.mrb[24].mxu1 }
 0x196   :  { %3791 = vrcp.f32 %v2475_v45  ;;  %v2476_v35 = vadd.f32 1.0, %v3772_v5  ;;  %v2228_v41 = vadd.f32 %v3540_v55, %v4829_v2  ;;  %v3774_v42 = vpop.eup %3773  ;;  %v3479_v58 = vpop.f32.mrb[24].mxu0 }
 0x197   :  { %3793 = vrcp.f32 %v2478_v7  ;;  %v3044_v4 = vmul.f32 -1.442695, %v2230_v9  ;;  %v3776_v11 = vpop.eup %3775  ;;  %2666 = vst.msk [vmem:[%s5159_s3 + $0x50] sm:$0xff] %vm2655_vm1, %v3774_v42  ;;  %v884_v59 = vpop.f32.mrb[25].mxu1  ;;  %v3541_v61 = vadd.f32 %v3479_v58, %v3335_v10 }
 0x198   :  { %3795 = vrcp.f32 %v2476_v35  ;;  %v3042_v17 = vmul.f32 -1.442695, %v2228_v41  ;;  %v3778_v60 = vpop.eup %3777  ;;  %2664 = vst.msk [vmem:[%s5159_s3 + $0x40] sm:$0xff] %vm2655_vm1, %v3776_v11  ;;  %v1977_v57 = vpop.f32.mrb[25].mxu0 }
 0x199   :  { %3797 = vpow2.f32 %v3043_v8  ;;  %v3336_v62 = vpop.f32.mrb[26].mxu1  ;;  %v3780_v18 = vpop.eup %3779  ;;  %2667 = vst.msk [vmem:[%s5159_s3 + $0x58] sm:$0xff] %vm2655_vm1, %v3778_v60  ;;  %v3542_v19 = vadd.f32 %v1977_v57, %v884_v59  ;;  %v2233_v43 = vadd.f32 %v3541_v61, %v4829_v2 }
 0x19a   :  { %3799 = vpow2.f32 %v3041_v39  ;;  %v3480_v28 = vpop.f32.mrb[26].mxu0  ;;  %v887_v29 = vpop.f32.mrb[27].mxu1  ;;  %2665 = vst.msk [vmem:[%s5159_s3 + $0x48] sm:$0xff] %vm2655_vm1, %v3780_v18 }
 0x19b   :  { %v3782_v30 = vpop.eup %3781  ;;  %3801 = vpow2.f32 %v3044_v4  ;;  %v3543_v56 = vadd.f32 %v3480_v28, %v3336_v62  ;;  %v1980_v13 = vpop.f32.mrb[27].mxu0  ;;  %v2231_v26 = vadd.f32 %v3542_v19, %v4829_v2  ;;  %v3047_v51 = vmul.f32 -1.442695, %v2233_v43 }
 0x19c   :  { %v3784_v22 = vpop.eup %3783  ;;  %v2481_v25 = vadd.f32 1.0, %v3782_v30  ;;  %3803 = vpow2.f32 %v3042_v17  ;;  %v3544_v27 = vadd.f32 %v1980_v13, %v887_v29 }
 0x19d   :  { %v3786_v36 = vpop.eup %3785  ;;  %v2479_v37 = vadd.f32 1.0, %v3784_v22  ;;  %v2234_v38 = vadd.f32 %v3543_v56, %v4829_v2  ;;  %v3045_v1 = vmul.f32 -1.442695, %v2231_v26  ;;  %v3339_v3 = vpop.f32.mrb[28].mxu1 }
 0x19e   :  { %v3788_v40 = vpop.eup %3787  ;;  %3805 = vrcp.f32 %v2481_v25  ;;  %v2482_v50 = vadd.f32 1.0, %v3786_v36  ;;  %v2232_v52 = vadd.f32 %v3544_v27, %v4829_v2  ;;  %v3483_v15 = vpop.f32.mrb[28].mxu0 }
 0x19f   :  { %v3790_v53 = vpop.eup %3789  ;;  %3807 = vrcp.f32 %v2479_v37  ;;  %v2480_v0 = vadd.f32 1.0, %v3788_v40  ;;  %v3048_v14 = vmul.f32 -1.442695, %v2234_v38  ;;  %v900_v16 = vpop.f32.mrb[29].mxu1  ;;  %v3545_v33 = vadd.f32 %v3483_v15, %v3339_v3 }
 0x1a0   :  { %v3792_v12 = vpop.eup %3791  ;;  %2670 = vst.msk [vmem:[%s5159_s3 + $0x70] sm:$0xff] %vm2655_vm1, %v3790_v53  ;;  %3809 = vrcp.f32 %v2482_v50  ;;  %v3046_v32 = vmul.f32 -1.442695, %v2232_v52  ;;  %v1993_v34 = vpop.f32.mrb[29].mxu0 }
 0x1a1   :  { %v3794_v31 = vpop.eup %3793  ;;  %2668 = vst.msk [vmem:[%s5159_s3 + $0x60] sm:$0xff] %vm2655_vm1, %v3792_v12  ;;  %3811 = vrcp.f32 %v2480_v0  ;;  %v3340_v47 = vpop.f32.mrb[30].mxu1  ;;  %v3546_v49 = vadd.f32 %v1993_v34, %v900_v16  ;;  %v2237_v20 = vadd.f32 %v3545_v33, %v4829_v2 }
 0x1a2   :  { %v3796_v48 = vpop.eup %3795  ;;  %2671 = vst.msk [vmem:[%s5159_s3 + $0x78] sm:$0xff] %vm2655_vm1, %v3794_v31  ;;  %3813 = vpow2.f32 %v3047_v51  ;;  %v3484_v54 = vpop.f32.mrb[30].mxu0 }
 0x1a3   :  { %v903_v63 = vpop.f32.mrb[31].mxu1  ;;  %v3798_v6 = vpop.eup %3797  ;;  %2669 = vst.msk [vmem:[%s5159_s3 + $0x68] sm:$0xff] %vm2655_vm1, %v3796_v48  ;;  %3815 = vpow2.f32 %v3045_v1  ;;  %v3547_v21 = vadd.f32 %v3484_v54, %v3340_v47  ;;  %v2235_v45 = vadd.f32 %v3546_v49, %v4829_v2  ;;  %v3051_v35 = vmul.f32 -1.442695, %v2237_v20 }
 0x1a4   :  { %v1996_v23 = vpop.f32.mrb[31].mxu0  ;;  %v3800_v24 = vpop.eup %3799  ;;  %v2485_v44 = vadd.f32 1.0, %v3798_v6  ;;  %3817 = vpow2.f32 %v3048_v14 }
 0x1a5   :  { %v3548_v46 = vadd.f32 %v1996_v23, %v903_v63  ;;  %v3802_v55 = vpop.eup %3801  ;;  %v2483_v5 = vadd.f32 1.0, %v3800_v24  ;;  %3819 = vpow2.f32 %v3046_v32  ;;  %v2238_v7 = vadd.f32 %v3547_v21, %v4829_v2  ;;  %v3343_v4 = vpop.f32.mrb[32].mxu1 }
 0x1a6   :  { %v3804_v8 = vpop.eup %3803  ;;  %3821 = vrcp.f32 %v2485_v44  ;;  %v2486_v9 = vadd.f32 1.0, %v3802_v55  ;;  %v3049_v42 = vmul.f32 -1.442695, %v2235_v45  ;;  %v3487_v17 = vpop.f32.mrb[32].mxu0 }
 0x1a7   :  { %v2236_v39 = vadd.f32 %v3548_v46, %v4829_v2  ;;  %3823 = vrcp.f32 %v2483_v5  ;;  %v2484_v41 = vadd.f32 1.0, %v3804_v8  ;;  %v3052_v11 = vmul.f32 -1.442695, %v2238_v7  ;;  %v916_v58 = vpop.f32.mrb[33].mxu1  ;;  %v2009_v57 = vpop.f32.mrb[33].mxu0 }
 0x1a8   :  { %v3806_v10 = vpop.eup %3805  ;;  %3825 = vrcp.f32 %v2486_v9  ;;  %v3549_v61 = vadd.f32 %v3487_v17, %v3343_v4  ;;  %v3344_v62 = vpop.f32.mrb[34].mxu1  ;;  %v3550_v19 = vadd.f32 %v2009_v57, %v916_v58 }
 0x1a9   :  { %v3808_v59 = vpop.eup %3807  ;;  %2674 = vst.msk [vmem:[%s5159_s3 + $0x90] sm:$0xff] %vm2655_vm1, %v3806_v10  ;;  %3827 = vrcp.f32 %v2484_v41  ;;  %v3050_v60 = vmul.f32 -1.442695, %v2236_v39  ;;  %v3488_v28 = vpop.f32.mrb[34].mxu0 }
 0x1aa   :  { %v3810_v18 = vpop.eup %3809  ;;  %2672 = vst.msk [vmem:[%s5159_s3 + $0x80] sm:$0xff] %vm2655_vm1, %v3808_v59  ;;  %3829 = vpow2.f32 %v3051_v35  ;;  %v919_v29 = vpop.f32.mrb[35].mxu1  ;;  %v2241_v43 = vadd.f32 %v3549_v61, %v4829_v2  ;;  %v3551_v56 = vadd.f32 %v3488_v28, %v3344_v62  ;;  %v2239_v25 = vadd.f32 %v3550_v19, %v4829_v2 }
 0x1ab   :  { %v3812_v30 = vpop.eup %3811  ;;  %2675 = vst.msk [vmem:[%s5159_s3 + $0x98] sm:$0xff] %vm2655_vm1, %v3810_v18  ;;  %3831 = vpow2.f32 %v3049_v42  ;;  %v2012_v13 = vpop.f32.mrb[35].mxu0 }
 0x1ac   :  { %v3814_v22 = vpop.eup %3813  ;;  %2673 = vst.msk [vmem:[%s5159_s3 + $0x88] sm:$0xff] %vm2655_vm1, %v3812_v30  ;;  %3833 = vpow2.f32 %v3052_v11  ;;  %v3552_v26 = vadd.f32 %v2012_v13, %v919_v29  ;;  %v2242_v37 = vadd.f32 %v3551_v56, %v4829_v2  ;;  %v3055_v53 = vmul.f32 -1.442695, %v2241_v43 }
 0x1ad   :  { %v3816_v27 = vpop.eup %3815  ;;  %v2489_v36 = vadd.f32 1.0, %v3814_v22  ;;  %3835 = vpow2.f32 %v3050_v60  ;;  %v3347_v0 = vpop.f32.mrb[36].mxu1  ;;  %v3053_v12 = vmul.f32 -1.442695, %v2239_v25 }
 0x1ae   :  { %v3818_v38 = vpop.eup %3817  ;;  %v2487_v40 = vadd.f32 1.0, %v3816_v27  ;;  %v2240_v50 = vadd.f32 %v3552_v26, %v4829_v2  ;;  %v3491_v14 = vpop.f32.mrb[36].mxu0  ;;  %v3056_v31 = vmul.f32 -1.442695, %v2242_v37 }
 0x1af   :  { %v3820_v51 = vpop.eup %3819  ;;  %3837 = vrcp.f32 %v2489_v36  ;;  %v2490_v52 = vadd.f32 1.0, %v3818_v38  ;;  %v932_v15 = vpop.f32.mrb[37].mxu1  ;;  %v3553_v32 = vadd.f32 %v3491_v14, %v3347_v0 }
 0x1b0   :  { %v3822_v1 = vpop.eup %3821  ;;  %3839 = vrcp.f32 %v2487_v40  ;;  %v2488_v3 = vadd.f32 1.0, %v3820_v51  ;;  %v2025_v33 = vpop.f32.mrb[37].mxu0  ;;  %v3054_v48 = vmul.f32 -1.442695, %v2240_v50 }
 0x1b1   :  { %v3824_v16 = vpop.eup %3823  ;;  %2678 = vst.msk [vmem:[%s5159_s3 + $0xb0] sm:$0xff] %vm2655_vm1, %v3822_v1  ;;  %3841 = vrcp.f32 %v2490_v52  ;;  %v3348_v34 = vpop.f32.mrb[38].mxu1  ;;  %v3554_v49 = vadd.f32 %v2025_v33, %v932_v15  ;;  %v2245_v20 = vadd.f32 %v3553_v32, %v4829_v2 }
 0x1b2   :  { %v3826_v47 = vpop.eup %3825  ;;  %2676 = vst.msk [vmem:[%s5159_s3 + $0xa0] sm:$0xff] %vm2655_vm1, %v3824_v16  ;;  %3843 = vrcp.f32 %v2488_v3  ;;  %v3492_v54 = vpop.f32.mrb[38].mxu0 }
 0x1b3   :  { %v935_v63 = vpop.f32.mrb[39].mxu1  ;;  %v3828_v6 = vpop.eup %3827  ;;  %2679 = vst.msk [vmem:[%s5159_s3 + $0xb8] sm:$0xff] %vm2655_vm1, %v3826_v47  ;;  %3845 = vpow2.f32 %v3055_v53  ;;  %v3555_v21 = vadd.f32 %v3492_v54, %v3348_v34  ;;  %v2243_v44 = vadd.f32 %v3554_v49, %v4829_v2  ;;  %v3059_v41 = vmul.f32 -1.442695, %v2245_v20 }
 0x1b4   :  { %v2028_v23 = vpop.f32.mrb[39].mxu0  ;;  %v3830_v24 = vpop.eup %3829  ;;  %2677 = vst.msk [vmem:[%s5159_s3 + $0xa8] sm:$0xff] %vm2655_vm1, %v3828_v6  ;;  %3847 = vpow2.f32 %v3053_v12 }
 0x1b5   :  { %v3556_v45 = vadd.f32 %v2028_v23, %v935_v63  ;;  %v3832_v46 = vpop.eup %3831  ;;  %v2493_v55 = vadd.f32 1.0, %v3830_v24  ;;  %3849 = vpow2.f32 %v3056_v31  ;;  %v2246_v5 = vadd.f32 %v3555_v21, %v4829_v2  ;;  %v3351_v42 = vpop.f32.mrb[40].mxu1 }
 0x1b6   :  { %v3834_v7 = vpop.eup %3833  ;;  %v2491_v8 = vadd.f32 1.0, %v3832_v46  ;;  %3851 = vpow2.f32 %v3054_v48  ;;  %v3057_v10 = vmul.f32 -1.442695, %v2243_v44  ;;  %v3495_v11 = vpop.f32.mrb[40].mxu0 }
 0x1b7   :  { %v2244_v9 = vadd.f32 %v3556_v45, %v4829_v2  ;;  %v3836_v35 = vpop.eup %3835  ;;  %3853 = vrcp.f32 %v2493_v55  ;;  %v2494_v39 = vadd.f32 1.0, %v3834_v7  ;;  %v948_v17 = vpop.f32.mrb[41].mxu1  ;;  %v3060_v59 = vmul.f32 -1.442695, %v2246_v5 }
 0x1b8   :  { %3855 = vrcp.f32 %v2491_v8  ;;  %v2492_v4 = vadd.f32 1.0, %v3836_v35  ;;  %v3557_v60 = vadd.f32 %v3495_v11, %v3351_v42  ;;  %v2041_v61 = vpop.f32.mrb[41].mxu0  ;;  %v3352_v57 = vpop.f32.mrb[42].mxu1 }
 0x1b9   :  { %v3838_v58 = vpop.eup %3837  ;;  %3857 = vrcp.f32 %v2494_v39  ;;  %v3058_v18 = vmul.f32 -1.442695, %v2244_v9  ;;  %v3558_v19 = vadd.f32 %v2041_v61, %v948_v17  ;;  %v3496_v28 = vpop.f32.mrb[42].mxu0 }
 0x1ba   :  { %v3840_v62 = vpop.eup %3839  ;;  %2682 = vst.msk [vmem:[%s5159_s3 + $0xd0] sm:$0xff] %vm2655_vm1, %v3838_v58  ;;  %3859 = vrcp.f32 %v2492_v4  ;;  %v951_v29 = vpop.f32.mrb[43].mxu1  ;;  %v2249_v43 = vadd.f32 %v3557_v60, %v4829_v2  ;;  %v3559_v56 = vadd.f32 %v3496_v28, %v3352_v57 }
 0x1bb   :  { %v3842_v30 = vpop.eup %3841  ;;  %2680 = vst.msk [vmem:[%s5159_s3 + $0xc0] sm:$0xff] %vm2655_vm1, %v3840_v62  ;;  %3861 = vpow2.f32 %v3059_v41  ;;  %v2044_v13 = vpop.f32.mrb[43].mxu0  ;;  %v2247_v25 = vadd.f32 %v3558_v19, %v4829_v2 }
 0x1bc   :  { %v3844_v22 = vpop.eup %3843  ;;  %2683 = vst.msk [vmem:[%s5159_s3 + $0xd8] sm:$0xff] %vm2655_vm1, %v3842_v30  ;;  %3863 = vpow2.f32 %v3057_v10  ;;  %v3560_v26 = vadd.f32 %v2044_v13, %v951_v29  ;;  %v3063_v36 = vmul.f32 -1.442695, %v2249_v43  ;;  %v2250_v37 = vadd.f32 %v3559_v56, %v4829_v2 }
 0x1bd   :  { %v3846_v27 = vpop.eup %3845  ;;  %2681 = vst.msk [vmem:[%s5159_s3 + $0xc8] sm:$0xff] %vm2655_vm1, %v3844_v22  ;;  %3865 = vpow2.f32 %v3060_v59  ;;  %v3355_v53 = vpop.f32.mrb[44].mxu1  ;;  %v3061_v3 = vmul.f32 -1.442695, %v2247_v25 }
 0x1be   :  { %v3848_v38 = vpop.eup %3847  ;;  %v2497_v40 = vadd.f32 1.0, %v3846_v27  ;;  %3867 = vpow2.f32 %v3058_v18  ;;  %v2248_v50 = vadd.f32 %v3560_v26, %v4829_v2  ;;  %v3499_v12 = vpop.f32.mrb[44].mxu0  ;;  %v3064_v31 = vmul.f32 -1.442695, %v2250_v37 }
 0x1bf   :  { %v3850_v51 = vpop.eup %3849  ;;  %v2495_v52 = vadd.f32 1.0, %v3848_v38  ;;  %3869 = vpow2.f32 %v3063_v36  ;;  %v964_v14 = vpop.f32.mrb[45].mxu1  ;;  %v3561_v32 = vadd.f32 %v3499_v12, %v3355_v53 }
 0x1c0   :  { %v3852_v0 = vpop.eup %3851  ;;  %3871 = vrcp.f32 %v2497_v40  ;;  %v2498_v1 = vadd.f32 1.0, %v3850_v51  ;;  %v2057_v33 = vpop.f32.mrb[45].mxu0  ;;  %v3062_v48 = vmul.f32 -1.442695, %v2248_v50 }
 0x1c1   :  { %v3854_v15 = vpop.eup %3853  ;;  %3873 = vrcp.f32 %v2495_v52  ;;  %v2496_v16 = vadd.f32 1.0, %v3852_v0  ;;  %v3356_v34 = vpop.f32.mrb[46].mxu1  ;;  %v3562_v49 = vadd.f32 %v2057_v33, %v964_v14  ;;  %v2253_v20 = vadd.f32 %v3561_v32, %v4829_v2 }
 0x1c2   :  { %v3856_v47 = vpop.eup %3855  ;;  %2686 = vst.msk [vmem:[%s5159_s3 + $0xf0] sm:$0xff] %vm2655_vm1, %v3854_v15  ;;  %3875 = vrcp.f32 %v2498_v1  ;;  %v3500_v54 = vpop.f32.mrb[46].mxu0 }
 0x1c3   :  { %v967_v63 = vpop.f32.mrb[47].mxu1  ;;  %v3858_v6 = vpop.eup %3857  ;;  %2684 = vst.msk [vmem:[%s5159_s3 + $0xe0] sm:$0xff] %vm2655_vm1, %v3856_v47  ;;  %3877 = vrcp.f32 %v2496_v16  ;;  %v3563_v21 = vadd.f32 %v3500_v54, %v3356_v34  ;;  %v3067_v46 = vmul.f32 -1.442695, %v2253_v20  ;;  %v2251_v55 = vadd.f32 %v3562_v49, %v4829_v2 }
 0x1c4   :  { %v2060_v23 = vpop.f32.mrb[47].mxu0  ;;  %v3860_v24 = vpop.eup %3859  ;;  %2687 = vst.msk [vmem:[%s5159_s3 + $0xf8] sm:$0xff] %vm2655_vm1, %v3858_v6  ;;  %3879 = vpow2.f32 %v3061_v3 }
 0x1c5   :  { %v3564_v44 = vadd.f32 %v2060_v23, %v967_v63  ;;  %v3862_v45 = vpop.eup %3861  ;;  %2685 = vst.msk [vmem:[%s5159_s3 + $0xe8] sm:$0xff] %vm2655_vm1, %v3860_v24  ;;  %3881 = vpow2.f32 %v3064_v31  ;;  %v2254_v8 = vadd.f32 %v3563_v21, %v4829_v2  ;;  %v3359_v41 = vpop.f32.mrb[48].mxu1  ;;  %v3065_v59 = vmul.f32 -1.442695, %v2251_v55  ;;  %v5034_v21 = vld [vmem:[%s5158_s2] ss:$0 sm:$0xff] }
 0x1c6   :  { %v3864_v5 = vpop.eup %3863  ;;  %v2501_v7 = vadd.f32 1.0, %v3862_v45  ;;  %3883 = vpow2.f32 %v3062_v48  ;;  %v3503_v10 = vpop.f32.mrb[48].mxu0 }
 0x1c7   :  { %v3866_v9 = vpop.eup %3865  ;;  %v2499_v35 = vadd.f32 1.0, %v3864_v5  ;;  %3885 = vpow2.f32 %v3067_v46  ;;  %v2252_v39 = vadd.f32 %v3564_v44, %v4829_v2  ;;  %v980_v11 = vpop.f32.mrb[49].mxu1  ;;  %v3565_v60 = vadd.f32 %v3503_v10, %v3359_v41 }
 0x1c8   :  { %v3868_v42 = vpop.eup %3867  ;;  %3887 = vrcp.f32 %v2501_v7  ;;  %v2502_v4 = vadd.f32 1.0, %v3866_v9  ;;  %v2073_v61 = vpop.f32.mrb[49].mxu0  ;;  %v3068_v19 = vmul.f32 -1.442695, %v2254_v8 }
 0x1c9   :  { %v3870_v17 = vpop.eup %3869  ;;  %3889 = vrcp.f32 %v2499_v35  ;;  %v2500_v58 = vadd.f32 1.0, %v3868_v42  ;;  %v3360_v57 = vpop.f32.mrb[50].mxu1  ;;  %v3566_v28 = vadd.f32 %v2073_v61, %v980_v11  ;;  %v3066_v56 = vmul.f32 -1.442695, %v2252_v39 }
 0x1ca   :  { %v3872_v62 = vpop.eup %3871  ;;  %3891 = vrcp.f32 %v2502_v4  ;;  %v2505_v18 = vadd.f32 1.0, %v3870_v17  ;;  %v3504_v29 = vpop.f32.mrb[50].mxu0  ;;  %v2257_v13 = vadd.f32 %v3565_v60, %v4829_v2 }
 0x1cb   :  { %v983_v30 = vpop.f32.mrb[51].mxu1  ;;  %v3874_v43 = vpop.eup %3873  ;;  %2690 = vst.msk [vmem:[%s5159_s3 + $0x110] sm:$0xff] %vm2655_vm1, %v3872_v62  ;;  %3893 = vrcp.f32 %v2500_v58  ;;  %v3567_v22 = vadd.f32 %v3504_v29, %v3360_v57  ;;  %v2255_v38 = vadd.f32 %v3566_v28, %v4829_v2 }
 0x1cc   :  { %v2076_v25 = vpop.f32.mrb[51].mxu0  ;;  %v3876_v26 = vpop.eup %3875  ;;  %2688 = vst.msk [vmem:[%s5159_s3 + $0x100] sm:$0xff] %vm2655_vm1, %v3874_v43  ;;  %3895 = vrcp.f32 %v2505_v18  ;;  %v3071_v37 = vmul.f32 -1.442695, %v2257_v13 }
 0x1cd   :  { %v3568_v27 = vadd.f32 %v2076_v25, %v983_v30  ;;  %v3878_v36 = vpop.eup %3877  ;;  %2691 = vst.msk [vmem:[%s5159_s3 + $0x118] sm:$0xff] %vm2655_vm1, %v3876_v26  ;;  %3897 = vpow2.f32 %v3065_v59  ;;  %v2258_v50 = vadd.f32 %v3567_v22, %v4829_v2  ;;  %v3363_v0 = vpop.f32.mrb[52].mxu1  ;;  %v3069_v31 = vmul.f32 -1.442695, %v2255_v38 }
 0x1ce   :  { %v3880_v40 = vpop.eup %3879  ;;  %2689 = vst.msk [vmem:[%s5159_s3 + $0x108] sm:$0xff] %vm2655_vm1, %v3878_v36  ;;  %3899 = vpow2.f32 %v3068_v19  ;;  %v3507_v12 = vpop.f32.mrb[52].mxu0 }
 0x1cf   :  { %v3882_v51 = vpop.eup %3881  ;;  %v2503_v52 = vadd.f32 1.0, %v3880_v40  ;;  %3901 = vpow2.f32 %v3066_v56  ;;  %v2256_v53 = vadd.f32 %v3568_v27, %v4829_v2  ;;  %v996_v14 = vpop.f32.mrb[53].mxu1  ;;  %v3569_v32 = vadd.f32 %v3507_v12, %v3363_v0 }
 0x1d0   :  { %v3884_v1 = vpop.eup %3883  ;;  %v2506_v3 = vadd.f32 1.0, %v3882_v51  ;;  %3903 = vpow2.f32 %v3071_v37  ;;  %v2089_v33 = vpop.f32.mrb[53].mxu0  ;;  %v3072_v49 = vmul.f32 -1.442695, %v2258_v50 }
 0x1d1   :  { %v3886_v15 = vpop.eup %3885  ;;  %3905 = vrcp.f32 %v2503_v52  ;;  %v2504_v16 = vadd.f32 1.0, %v3884_v1  ;;  %v3364_v34 = vpop.f32.mrb[54].mxu1  ;;  %v3570_v54 = vadd.f32 %v2089_v33, %v996_v14  ;;  %v3070_v20 = vmul.f32 -1.442695, %v2256_v53 }
 0x1d2   :  { %v3888_v47 = vpop.eup %3887  ;;  %3907 = vrcp.f32 %v2506_v3  ;;  %v2509_v48 = vadd.f32 1.0, %v3886_v15  ;;  %v3508_v63 = vpop.f32.mrb[54].mxu0  ;;  %v2261_v23 = vadd.f32 %v5034_v21, %v3569_v32 }
 0x1d3   :  { %v999_v2 = vpop.f32.mrb[55].mxu1  ;;  %v3890_v6 = vpop.eup %3889  ;;  %2694 = vst.msk [vmem:[%s5159_s3 + $0x130] sm:$0xff] %vm2655_vm1, %v3888_v47  ;;  %3909 = vrcp.f32 %v2504_v16  ;;  %v3571_v24 = vadd.f32 %v3508_v63, %v3364_v34  ;;  %v2259_v46 = vadd.f32 %v5034_v21, %v3570_v54 }
 0x1d4   :  { %v2092_v44 = vpop.f32.mrb[55].mxu0  ;;  %v3892_v45 = vpop.eup %3891  ;;  %2692 = vst.msk [vmem:[%s5159_s3 + $0x120] sm:$0xff] %vm2655_vm1, %v3890_v6  ;;  %3911 = vrcp.f32 %v2509_v48  ;;  %v3075_v7 = vmul.f32 -1.442695, %v2261_v23 }
 0x1d5   :  { %v3572_v55 = vadd.f32 %v2092_v44, %v999_v2  ;;  %v3894_v5 = vpop.eup %3893  ;;  %2695 = vst.msk [vmem:[%s5159_s3 + $0x138] sm:$0xff] %vm2655_vm1, %v3892_v45  ;;  %3913 = vpow2.f32 %v3069_v31  ;;  %v2262_v8 = vadd.f32 %v5034_v21, %v3571_v24  ;;  %v3073_v35 = vmul.f32 -1.442695, %v2259_v46  ;;  %v3367_v42 = vpop.f32.mrb[56].mxu1 }
 0x1d6   :  { %v3896_v9 = vpop.eup %3895  ;;  %2693 = vst.msk [vmem:[%s5159_s3 + $0x128] sm:$0xff] %vm2655_vm1, %v3894_v5  ;;  %3915 = vpow2.f32 %v3072_v49  ;;  %v3511_v11 = vpop.f32.mrb[56].mxu0 }
 0x1d7   :  { %v2260_v39 = vadd.f32 %v5034_v21, %v3572_v55  ;;  %v3898_v41 = vpop.eup %3897  ;;  %2698 = vst.msk [vmem:[%s5159_s3 + $0x150] sm:$0xff] %vm2655_vm1, %v3896_v9  ;;  %3917 = vpow2.f32 %v3070_v20  ;;  %v1012_v17 = vpop.f32.mrb[57].mxu1  ;;  %v3076_v60 = vmul.f32 -1.442695, %v2262_v8  ;;  %v3573_v61 = vadd.f32 %v3511_v11, %v3367_v42 }
 0x1d8   :  { %v3900_v4 = vpop.eup %3899  ;;  %v2507_v10 = vadd.f32 1.0, %v3898_v41  ;;  %3919 = vpow2.f32 %v3075_v7  ;;  %v2105_v57 = vpop.f32.mrb[57].mxu0 }
 0x1d9   :  { %v3902_v58 = vpop.eup %3901  ;;  %v2510_v59 = vadd.f32 1.0, %v3900_v4  ;;  %3921 = vpow2.f32 %v3073_v35  ;;  %v3368_v62 = vpop.f32.mrb[58].mxu1  ;;  %v3074_v28 = vmul.f32 -1.442695, %v2260_v39  ;;  %v3574_v29 = vadd.f32 %v2105_v57, %v1012_v17 }
 0x1da   :  { %v3904_v18 = vpop.eup %3903  ;;  %3923 = vrcp.f32 %v2507_v10  ;;  %v2508_v19 = vadd.f32 1.0, %v3902_v58  ;;  %v3512_v30 = vpop.f32.mrb[58].mxu0  ;;  %v2265_v22 = vadd.f32 %v5034_v21, %v3573_v61 }
 0x1db   :  { %v1015_v43 = vpop.f32.mrb[59].mxu1  ;;  %v3906_v56 = vpop.eup %3905  ;;  %3925 = vrcp.f32 %v2510_v59  ;;  %v2513_v13 = vadd.f32 1.0, %v3904_v18  ;;  %v3575_v25 = vadd.f32 %v3512_v30, %v3368_v62  ;;  %v2263_v36 = vadd.f32 %v5034_v21, %v3574_v29 }
 0x1dc   :  { %v2108_v26 = vpop.f32.mrb[59].mxu0  ;;  %v3908_v27 = vpop.eup %3907  ;;  %2696 = vst.msk [vmem:[%s5159_s3 + $0x140] sm:$0xff] %vm2655_vm1, %v3906_v56  ;;  %3927 = vrcp.f32 %v2508_v19  ;;  %v3079_v40 = vmul.f32 -1.442695, %v2265_v22 }
 0x1dd   :  { %v3576_v37 = vadd.f32 %v2108_v26, %v1015_v43  ;;  %v3910_v38 = vpop.eup %3909  ;;  %2699 = vst.msk [vmem:[%s5159_s3 + $0x158] sm:$0xff] %vm2655_vm1, %v3908_v27  ;;  %3929 = vrcp.f32 %v2513_v13  ;;  %v2266_v50 = vadd.f32 %v5034_v21, %v3575_v25  ;;  %v3077_v52 = vmul.f32 -1.442695, %v2263_v36  ;;  %v3371_v1 = vpop.f32.mrb[60].mxu1 }
 0x1de   :  { %v3912_v51 = vpop.eup %3911  ;;  %2697 = vst.msk [vmem:[%s5159_s3 + $0x148] sm:$0xff] %vm2655_vm1, %v3910_v38  ;;  %3931 = vpow2.f32 %v3076_v60  ;;  %v3515_v14 = vpop.f32.mrb[60].mxu0 }
 0x1df   :  { %v2264_v53 = vadd.f32 %v5034_v21, %v3576_v37  ;;  %v3914_v0 = vpop.eup %3913  ;;  %2702 = vst.msk [vmem:[%s5159_s3 + $0x170] sm:$0xff] %vm2655_vm1, %v3912_v51  ;;  %3933 = vpow2.f32 %v3074_v28  ;;  %v1028_v15 = vpop.f32.mrb[61].mxu1  ;;  %v3080_v32 = vmul.f32 -1.442695, %v2266_v50  ;;  %v3577_v33 = vadd.f32 %v3515_v14, %v3371_v1 }
 0x1e0   :  { %v3916_v3 = vpop.eup %3915  ;;  %v2511_v12 = vadd.f32 1.0, %v3914_v0  ;;  %3935 = vpow2.f32 %v3079_v40  ;;  %v2121_v34 = vpop.f32.mrb[61].mxu0 }
 0x1e1   :  { %v3918_v16 = vpop.eup %3917  ;;  %v2514_v31 = vadd.f32 1.0, %v3916_v3  ;;  %3937 = vpow2.f32 %v3077_v52  ;;  %v3372_v47 = vpop.f32.mrb[62].mxu1  ;;  %v3078_v54 = vmul.f32 -1.442695, %v2264_v53  ;;  %v3578_v63 = vadd.f32 %v2121_v34, %v1028_v15 }
 0x1e2   :  { %v3920_v48 = vpop.eup %3919  ;;  %3939 = vrcp.f32 %v2511_v12  ;;  %v2512_v49 = vadd.f32 1.0, %v3918_v16  ;;  %v3516_v2 = vpop.f32.mrb[62].mxu0  ;;  %v2269_v24 = vadd.f32 %v5034_v21, %v3577_v33 }
 0x1e3   :  { %v1031_v6 = vpop.f32.mrb[63].mxu1  ;;  %v3922_v20 = vpop.eup %3921  ;;  %3941 = vrcp.f32 %v2514_v31  ;;  %v2517_v23 = vadd.f32 1.0, %v3920_v48  ;;  %v3579_v44 = vadd.f32 %v3516_v2, %v3372_v47  ;;  %v2267_v5 = vadd.f32 %v5034_v21, %v3578_v63 }
 0x1e4   :  { %v2124_v45 = vpop.f32.mrb[63].mxu0  ;;  %v3924_v46 = vpop.eup %3923  ;;  %3943 = vrcp.f32 %v2512_v49  ;;  %v2515_v55 = vadd.f32 1.0, %v3922_v20  ;;  %v3083_v9 = vmul.f32 -1.442695, %v2269_v24 }
 0x1e5   :  { %v3580_v7 = vadd.f32 %v2124_v45, %v1031_v6  ;;  %v3926_v8 = vpop.eup %3925  ;;  %2700 = vst.msk [vmem:[%s5159_s3 + $0x160] sm:$0xff] %vm2655_vm1, %v3924_v46  ;;  %3945 = vrcp.f32 %v2517_v23  ;;  %v3081_v39 = vmul.f32 -1.442695, %v2267_v5  ;;  %v2270_v42 = vadd.f32 %v5034_v21, %v3579_v44 }
 0x1e6   :  { %v3928_v35 = vpop.eup %3927  ;;  %2703 = vst.msk [vmem:[%s5159_s3 + $0x178] sm:$0xff] %vm2655_vm1, %v3926_v8  ;;  %3947 = vrcp.f32 %v2515_v55 }
 0x1e7   :  { %v3930_v41 = vpop.eup %3929  ;;  %2701 = vst.msk [vmem:[%s5159_s3 + $0x168] sm:$0xff] %vm2655_vm1, %v3928_v35  ;;  %3949 = vpow2.f32 %v3080_v32  ;;  %v2268_v10 = vadd.f32 %v5034_v21, %v3580_v7  ;;  %v3084_v57 = vmul.f32 -1.442695, %v2270_v42 }
 0x1e8   :  { %v3932_v4 = vpop.eup %3931  ;;  %2706 = vst.msk [vmem:[%s5159_s3 + $0x190] sm:$0xff] %vm2655_vm1, %v3930_v41  ;;  %3951 = vpow2.f32 %v3078_v54 }
 0x1e9   :  { %v3934_v11 = vpop.eup %3933  ;;  %v2518_v17 = vadd.f32 1.0, %v3932_v4  ;;  %3953 = vpow2.f32 %v3083_v9  ;;  %v3082_v19 = vmul.f32 -1.442695, %v2268_v10 }
 0x1ea   :  { %v3936_v58 = vpop.eup %3935  ;;  %v2516_v59 = vadd.f32 1.0, %v3934_v11  ;;  %3955 = vpow2.f32 %v3081_v39 }
 0x1eb   :  { %v3938_v60 = vpop.eup %3937  ;;  %3957 = vrcp.f32 %v2518_v17  ;;  %v2521_v61 = vadd.f32 1.0, %v3936_v58 }
 0x1ec   :  { %v3940_v62 = vpop.eup %3939  ;;  %3959 = vrcp.f32 %v2516_v59  ;;  %v2519_v18 = vadd.f32 1.0, %v3938_v60 }
 0x1ed   :  { %v3942_v28 = vpop.eup %3941  ;;  %2704 = vst.msk [vmem:[%s5159_s3 + $0x180] sm:$0xff] %vm2655_vm1, %v3940_v62  ;;  %3961 = vrcp.f32 %v2521_v61 }
 0x1ee   :  { %v3944_v21 = vpop.eup %3943  ;;  %2707 = vst.msk [vmem:[%s5159_s3 + $0x198] sm:$0xff] %vm2655_vm1, %v3942_v28  ;;  %3963 = vrcp.f32 %v2519_v18 }
 0x1ef   :  { %v3946_v29 = vpop.eup %3945  ;;  %2705 = vst.msk [vmem:[%s5159_s3 + $0x188] sm:$0xff] %vm2655_vm1, %v3944_v21  ;;  %3965 = vpow2.f32 %v3084_v57 }
 0x1f0   :  { %v3948_v30 = vpop.eup %3947  ;;  %2710 = vst.msk [vmem:[%s5159_s3 + $0x1b0] sm:$0xff] %vm2655_vm1, %v3946_v29  ;;  %3967 = vpow2.f32 %v3082_v19 }
 0x1f1   :  { %v3950_v43 = vpop.eup %3949  ;;  %2708 = vst.msk [vmem:[%s5159_s3 + $0x1a0] sm:$0xff] %vm2655_vm1, %v3948_v30 }
 0x1f2   :  { %v3952_v56 = vpop.eup %3951  ;;  %v2522_v13 = vadd.f32 1.0, %v3950_v43 }
 0x1f3   :  { %v3954_v22 = vpop.eup %3953  ;;  %v2520_v25 = vadd.f32 1.0, %v3952_v56 }
 0x1f4   :  { %v3956_v26 = vpop.eup %3955  ;;  %3969 = vrcp.f32 %v2522_v13  ;;  %v2525_v27 = vadd.f32 1.0, %v3954_v22 }
 0x1f5   :  { %v3958_v36 = vpop.eup %3957  ;;  %3971 = vrcp.f32 %v2520_v25  ;;  %v2523_v37 = vadd.f32 1.0, %v3956_v26 }
 0x1f6   :  { %v3960_v38 = vpop.eup %3959  ;;  %2711 = vst.msk [vmem:[%s5159_s3 + $0x1b8] sm:$0xff] %vm2655_vm1, %v3958_v36  ;;  %3973 = vrcp.f32 %v2525_v27 }
 0x1f7   :  { %v3962_v40 = vpop.eup %3961  ;;  %2709 = vst.msk [vmem:[%s5159_s3 + $0x1a8] sm:$0xff] %vm2655_vm1, %v3960_v38  ;;  %3975 = vrcp.f32 %v2523_v37 }
 0x1f8   :  { %v3964_v50 = vpop.eup %3963  ;;  %2714 = vst.msk [vmem:[%s5159_s3 + $0x1d0] sm:$0xff] %vm2655_vm1, %v3962_v40 }
 0x1f9   :  { %v3966_v51 = vpop.eup %3965  ;;  %2712 = vst.msk [vmem:[%s5159_s3 + $0x1c0] sm:$0xff] %vm2655_vm1, %v3964_v50 }
 0x1fa   :  { %v3968_v52 = vpop.eup %3967  ;;  %v2526_v53 = vadd.f32 1.0, %v3966_v51 }
 0x1fb   :  { %v2524_v0 = vadd.f32 1.0, %v3968_v52 }
 0x1fc   :  { %3977 = vrcp.f32 %v2526_v53 }
 0x1fd   :  { %3979 = vrcp.f32 %v2524_v0 }
 0x1fe   :  { %v3970_v1 = vpop.eup %3969 }
 0x1ff   :  { %v3972_v3 = vpop.eup %3971  ;;  %2715 = vst.msk [vmem:[%s5159_s3 + $0x1d8] sm:$0xff] %vm2655_vm1, %v3970_v1 }
 0x200   :  { %v3974_v12 = vpop.eup %3973  ;;  %2713 = vst.msk [vmem:[%s5159_s3 + $0x1c8] sm:$0xff] %vm2655_vm1, %v3972_v3 }
 0x201   :  { %v3976_v14 = vpop.eup %3975  ;;  %2718 = vst.msk [vmem:[%s5159_s3 + $0x1f0] sm:$0xff] %vm2655_vm1, %v3974_v12 }
 0x202   :  { %2716 = vst.msk [vmem:[%s5159_s3 + $0x1e0] sm:$0xff] %vm2655_vm1, %v3976_v14 }
 0x206   :  { %v3978_v15 = vpop.eup %3977 }
 0x207   :  { %v3980_v16 = vpop.eup %3979  ;;  %2719 = vst.msk [vmem:[%s5159_s3 + $0x1f8] sm:$0xff] %vm2655_vm1, %v3978_v15 }
 0x208   :  { %2717 = vst.msk [vmem:[%s5159_s3 + $0x1e8] sm:$0xff] %vm2655_vm1, %v3980_v16 }

</bundles_post_ra>
